<compile_context>
chip_gen: v5e
topology: v5e:2x2
jax: 0.10.0
libtpu: 0.0.40
codegen_flags: <defaults>
</compile_context>

<pallas_src>
import functools

import jax
import jax.numpy as jnp
from jax.experimental import pallas as pl
from jax.experimental.pallas import tpu as pltpu

NEG_INF = -1e30          # additive mask value (representable in bf16)
_LANE = 128
_DEF_TILE_DST = 256      # destination-row tile (multiple of 16: bf16 mask sublanes)
_DEF_TILE_SRC = 512      # source-column tile (multiple of 128: mask lane axis)
_DEF_TILE_PROJ = 512     # projection row tile (independent of the attention tiles)


def _round_up(x, m):
    return (x + m - 1) // m * m


def _pick_tile(n_pad, preferred):
    t = preferred
    while t > _LANE and n_pad % t != 0:
        t //= 2
    return min(t, n_pad)


def _pick_vmem_limit():
    # v7x: 64 MiB physical VMEM per TensorCore; v5e/v6e: 128 MiB.
    try:
        cap = pltpu.get_tpu_info().vmem_capacity_bytes
    except Exception:
        cap = 128 * 1024 * 1024
    if cap <= 64 * 1024 * 1024:
        return 44 * 1024 * 1024
    return 56 * 1024 * 1024


_VMEM_LIMIT = _pick_vmem_limit()


# ---------------------------------------------------------------------------
# Kernels
# ---------------------------------------------------------------------------
def _proj_kernel(x_ref, w_ref, al_ref, ar_ref, wx_ref, el_ref, er_ref, *, heads):
    """Head-major projection: wx[h] = x @ W[h] (bf16 out), plus the per-node attention
    scores el (lane-major, (1, T)) and er (sublane-major, (T, 1)) folded into the same
    pass so the attention kernel never recomputes them per dst tile."""
    xb = x_ref[...].astype(jnp.bfloat16)
    for h in range(heads):                                        # heads small: unroll
        wx = jnp.dot(xb, w_ref[h].astype(jnp.bfloat16),
                     preferred_element_type=jnp.float32)          # (T, F) f32 acc
        wx_ref[h] = wx.astype(jnp.bfloat16)                       # bf16 writeback
        # el lane-major: (1, F) . (T, F)^T -> (1, T)
        el_ref[h] = jax.lax.dot_general(al_ref[h], wx, (((1,), (1,)), ((), ())),
                                        preferred_element_type=jnp.float32)
        er_ref[h] = jnp.sum(wx * ar_ref[h], axis=-1, keepdims=True)   # (T, 1)


def _gat_attn_kernel(blk_ref, *refs, heads, fuse_norm_relu, fuse_linear):
    """Flash-style (src-tiled) edge softmax + aggregation for one dst-row tile,
    mean over heads, optional fused LayerNorm+ReLU and optional fused final Linear."""
    wx_ref, el_ref, er_ref, adj_ref, bmean_ref = refs[:5]
    idx = 5
    if fuse_norm_relu:
        g_ref, bt_ref = refs[idx], refs[idx + 1]
        idx += 2
    if fuse_linear:
        w2_ref, b2_ref = refs[idx], refs[idx + 1]
        idx += 2
    o_ref = refs[idx]
    m_sc, l_sc, acc_sc = refs[idx + 1:idx + 4]

    d = pl.program_id(0)
    s = pl.program_id(1)

    @pl.when(s == 0)
    def _init():
        m_sc[...] = jnp.full(m_sc.shape, NEG_INF, jnp.float32)
        l_sc[...] = jnp.zeros(l_sc.shape, jnp.float32)
        acc_sc[...] = jnp.zeros(acc_sc.shape, jnp.float32)

    # Skip blocks that contain no edges at all (sparse graphs / padded rows):
    # removes the dominant exp (EUP) and MXU work for those blocks.
    @pl.when(blk_ref[d, s] > 0)
    def _update():
        adjb = adj_ref[...]                             # (Td, Ts) bf16 additive mask
        for h in range(heads):                          # static unroll
            e = er_ref[h] + el_ref[h]                   # (Td,1)+(1,Ts) -> (Td, Ts)
            e = jnp.where(e > 0, e, 0.2 * e)            # leaky_relu(0.2)
            e = e + adjb                                # bf16 mask promoted per-op
            m_prev = m_sc[h]
            m_new = jnp.maximum(m_prev, jnp.max(e, axis=-1, keepdims=True))
            corr = jnp.exp(m_prev - m_new)
            # TODO(synk): a bf16 exp (EUP bf16 path) is a further v6e/v7x lever; kept
            # in f32 here for portable lowering (v5e has no bf16 EUP).
            p = jnp.exp(e - m_new)                      # (Td, Ts) f32, masked -> 0
            l_sc[h] = corr * l_sc[h] + jnp.sum(p, axis=-1, keepdims=True)
            acc_sc[h] = corr * acc_sc[h] + jnp.dot(
                p.astype(jnp.bfloat16), wx_ref[h],
                preferred_element_type=jnp.float32)
            m_sc[h] = m_new

    @pl.when(s == pl.num_programs(1) - 1)
    def _finalize():
        out = jnp.zeros(acc_sc.shape[1:], jnp.float32)            # (Td, F)
        for h in range(heads):
            inv_l = pl.reciprocal(jnp.maximum(l_sc[h], 1e-20), approx=True)
            out = out + acc_sc[h] * inv_l
        out = out * (1.0 / heads) + bmean_ref[...]                # mean over heads + bias
        if fuse_norm_relu:                                        # LayerNorm + relu
            mu = jnp.mean(out, axis=-1, keepdims=True)
            dx = out - mu
            var = jnp.mean(dx * dx, axis=-1, keepdims=True)
            out = dx * jax.lax.rsqrt(var + 1e-5)
            out = jnp.maximum(out * g_ref[...] + bt_ref[...], 0.0)
        if fuse_linear:                                           # fused trailing Linear
            out = jnp.dot(out.astype(jnp.bfloat16),
                          w2_ref[...].astype(jnp.bfloat16),
                          preferred_element_type=jnp.float32) + b2_ref[...]
        o_ref[...] = out


def _linear_kernel(x_ref, w_ref, b_ref, o_ref):
    o_ref[...] = (jnp.dot(x_ref[...].astype(jnp.bfloat16),
                          w_ref[...].astype(jnp.bfloat16),
                          preferred_element_type=jnp.float32) + b_ref[...])


def _linear_ln_relu_kernel(x_ref, w_ref, b_ref, g_ref, bt_ref, o_ref):
    y = (jnp.dot(x_ref[...].astype(jnp.bfloat16),
                 w_ref[...].astype(jnp.bfloat16),
                 preferred_element_type=jnp.float32) + b_ref[...])
    mu = jnp.mean(y, axis=-1, keepdims=True)
    dy = y - mu
    var = jnp.mean(dy * dy, axis=-1, keepdims=True)
    y = dy * jax.lax.rsqrt(var + 1e-5)
    o_ref[...] = jnp.maximum(y * g_ref[...] + bt_ref[...], 0.0)


# ---------------------------------------------------------------------------
# pallas_call wrappers
# ---------------------------------------------------------------------------
def gat_project(x, w_hm, attn_l, attn_r, *, heads, out_feats, tile):
    n_pad, f_in = x.shape
    al = attn_l[:, None, :]                                   # (heads, 1, F)
    ar = attn_r[:, None, :]
    return pl.pallas_call(
        functools.partial(_proj_kernel, heads=heads),
        out_shape=(jax.ShapeDtypeStruct((heads, n_pad, out_feats), jnp.bfloat16),
                   jax.ShapeDtypeStruct((heads, 1, n_pad), jnp.float32),
                   jax.ShapeDtypeStruct((heads, n_pad, 1), jnp.float32)),
        grid_spec=pltpu.PrefetchScalarGridSpec(
            num_scalar_prefetch=0, grid=(n_pad // tile,),
            in_specs=[
                pl.BlockSpec((tile, f_in), lambda i: (i, 0)),
                pl.BlockSpec((heads, f_in, out_feats), lambda i: (0, 0, 0)),
                pl.BlockSpec((heads, 1, out_feats), lambda i: (0, 0, 0)),
                pl.BlockSpec((heads, 1, out_feats), lambda i: (0, 0, 0)),
            ],
            out_specs=(
                pl.BlockSpec((heads, tile, out_feats), lambda i: (0, i, 0)),
                pl.BlockSpec((heads, 1, tile), lambda i: (0, 0, i)),
                pl.BlockSpec((heads, tile, 1), lambda i: (0, i, 0)),
            )),
        compiler_params=pltpu.CompilerParams(
            dimension_semantics=("parallel",), vmem_limit_bytes=_VMEM_LIMIT),
        cost_estimate=pl.CostEstimate(
            flops=2 * n_pad * f_in * heads * out_feats + 4 * heads * n_pad * out_feats,
            transcendentals=0,
            bytes_accessed=4 * n_pad * f_in + 4 * heads * f_in * out_feats
                           + 2 * heads * n_pad * out_feats + 8 * heads * n_pad),
    )(x, w_hm, al, ar)


def gat_attention(blk_tbl, wx, el_row, er_col, adj_bias, bias_mean, gamma, beta,
                  w2, b2, *, heads, out_feats, fuse_norm_relu, fuse_linear,
                  tile_dst, tile_src):
    n_pad = wx.shape[1]
    nd, ns = n_pad // tile_dst, n_pad // tile_src
    f_out = w2.shape[1] if fuse_linear else out_feats

    in_specs = [
        pl.BlockSpec((heads, tile_src, out_feats), lambda d, s, blk: (0, s, 0)),  # wx
        pl.BlockSpec((heads, 1, tile_src), lambda d, s, blk: (0, 0, s)),          # el
        pl.BlockSpec((heads, tile_dst, 1), lambda d, s, blk: (0, d, 0)),          # er
        pl.BlockSpec((tile_dst, tile_src), lambda d, s, blk: (d, s)),             # mask
        pl.BlockSpec((1, out_feats), lambda d, s, blk: (0, 0)),                   # bias
    ]
    args = [wx, el_row, er_col, adj_bias, bias_mean]
    if fuse_norm_relu:
        in_specs += [pl.BlockSpec((1, out_feats), lambda d, s, blk: (0, 0))] * 2
        args += [gamma, beta]
    if fuse_linear:
        in_specs += [pl.BlockSpec(w2.shape, lambda d, s, blk: (0, 0)),
                     pl.BlockSpec((1, f_out), lambda d, s, blk: (0, 0))]
        args += [w2, b2]

    kern = functools.partial(_gat_attn_kernel, heads=heads,
                             fuse_norm_relu=fuse_norm_relu, fuse_linear=fuse_linear)
    cost = pl.CostEstimate(
        flops=2 * heads * n_pad * n_pad * out_feats
              + (2 * n_pad * out_feats * f_out if fuse_linear else 0),
        transcendentals=heads * n_pad * n_pad,
        bytes_accessed=2 * n_pad * n_pad + 2 * heads * n_pad * out_feats
                       + 4 * n_pad * f_out)
    return pl.pallas_call(
        kern,
        out_shape=jax.ShapeDtypeStruct((n_pad, f_out), jnp.float32),
        grid_spec=pltpu.PrefetchScalarGridSpec(
            num_scalar_prefetch=1,
            grid=(nd, ns),                       # src (reduction) axis last
            in_specs=in_specs,
            out_specs=pl.BlockSpec((tile_dst, f_out), lambda d, s, blk: (d, 0)),
            scratch_shapes=[pltpu.VMEM((heads, tile_dst, 1), jnp.float32),
                            pltpu.VMEM((heads, tile_dst, 1), jnp.float32),
                            pltpu.VMEM((heads, tile_dst, out_feats), jnp.float32)]),
        compiler_params=pltpu.CompilerParams(
            dimension_semantics=("parallel", "arbitrary"),
            vmem_limit_bytes=_VMEM_LIMIT),
        cost_estimate=cost,
    )(blk_tbl, *args)


def linear(x, w, b, gamma, beta, *, fuse_norm_relu, tile):
    # TODO(synk): training-mode dropout before the Linear is identity in eval mode.
    n_pad, f_in = x.shape
    f_out = w.shape[1]
    if fuse_norm_relu:
        kern, extra = _linear_ln_relu_kernel, [gamma, beta]
        extra_specs = [pl.BlockSpec((1, f_out), lambda i: (0, 0))] * 2
    else:
        kern, extra, extra_specs = _linear_kernel, [], []
    return pl.pallas_call(
        kern,
        out_shape=jax.ShapeDtypeStruct((n_pad, f_out), jnp.float32),
        grid_spec=pltpu.PrefetchScalarGridSpec(
            num_scalar_prefetch=0, grid=(n_pad // tile,),
            in_specs=[pl.BlockSpec((tile, f_in), lambda i: (i, 0)),
                      pl.BlockSpec((f_in, f_out), lambda i: (0, 0)),
                      pl.BlockSpec((1, f_out), lambda i: (0, 0))] + extra_specs,
            out_specs=pl.BlockSpec((tile, f_out), lambda i: (i, 0))),
        compiler_params=pltpu.CompilerParams(
            dimension_semantics=("parallel",), vmem_limit_bytes=_VMEM_LIMIT),
        cost_estimate=pl.CostEstimate(
            flops=2 * n_pad * f_in * f_out, transcendentals=0,
            bytes_accessed=4 * (n_pad * f_in + f_in * f_out + n_pad * f_out)),
    )(x, w, b, *extra)


# ---------------------------------------------------------------------------
# Forward pass (mirrors GAT.forward in eval mode)
# ---------------------------------------------------------------------------
def gat_forward(feat, adj, params, *, heads, n_linear,
                tile_dst=_DEF_TILE_DST, tile_src=_DEF_TILE_SRC,
                tile_proj=_DEF_TILE_PROJ):
    """adj[dst, src] != 0 means edge src -> dst.
    TODO(synk): the ctx.buffer / use_pp path is a training-only distributed
    communication buffer and does not change the eval-mode math."""
    n_layers = len(params)
    n, f0 = feat.shape

    # Pad the node axis once so all tiles are (16, 128)-aligned; padded rows carry no
    # edges, are skipped by the block table, and are sliced off at the end.
    n_pad = _round_up(max(n, _LANE), _LANE)
    tile_dst = _pick_tile(n_pad, tile_dst)
    tile_src = _pick_tile(n_pad, tile_src)
    tile_proj = _pick_tile(n_pad, tile_proj)

    adj_p = jnp.zeros((n_pad, n_pad), jnp.float32).at[:n, :n].set(adj)
    # Additive edge mask: built once per forward, stored bf16 (halves O(N^2) HBM).
    adj_bias = jnp.where(adj_p > 0, 0.0, NEG_INF).astype(jnp.bfloat16)
    # Per-(dst-tile, src-tile) edge indicator -> SMEM scalar prefetch (block skipping).
    blk_tbl = (adj_p.reshape(n_pad // tile_dst, tile_dst, n_pad // tile_src, tile_src)
               .sum(axis=(1, 3)) > 0).astype(jnp.int32)

    h = jnp.zeros((n_pad, f0), jnp.float32).at[:n].set(feat)

    i = 0
    while i < n_layers:
        p = params[i]
        is_gat = i < n_layers - n_linear
        fuse_nr = i < n_layers - 1
        gamma = p.get("ln_gamma") if fuse_nr else None
        beta = p.get("ln_beta") if fuse_nr else None
        if is_gat:
            w = p["w"]                                    # (heads, f_in, F) head-major
            out_feats = w.shape[2]
            bias_mean = jnp.mean(p["bias"], axis=0, keepdims=True)   # (1, F)
            # Fuse the final Linear into the attention epilogue when it directly
            # follows the last GATConv and is the last layer.
            fuse_lin = (i + 1 == n_layers - 1) and (i + 1 >= n_layers - n_linear)
            if fuse_lin:
                w2, b2 = params[i + 1]["w"], params[i + 1]["bias"]
            else:
                w2 = b2 = None

            wx, el_row, er_col = gat_project(h, w, p["attn_l"], p["attn_r"],
                                             heads=heads, out_feats=out_feats,
                                             tile=tile_proj)
            h = gat_attention(blk_tbl, wx, el_row, er_col, adj_bias, bias_mean,
                              gamma, beta, w2, b2, heads=heads, out_feats=out_feats,
                              fuse_norm_relu=fuse_nr, fuse_linear=fuse_lin,
                              tile_dst=tile_dst, tile_src=tile_src)
            i += 2 if fuse_lin else 1
        else:
            h = linear(h, p["w"], p["bias"], gamma, beta,
                       fuse_norm_relu=fuse_nr, tile=tile_proj)
            i += 1
    return h[:n]


# ---------------------------------------------------------------------------
# Pure-JAX reference (f32) for a correctness sanity check
# ---------------------------------------------------------------------------
def _reference_forward(feat, adj, params, *, heads, n_linear):
    h = feat
    n_layers = len(params)
    for i, p in enumerate(params):
        if i < n_layers - n_linear:
            wx = jnp.einsum("nf,hfo->hno", h, p["w"])
            el = jnp.einsum("hno,ho->hn", wx, p["attn_l"])
            er = jnp.einsum("hno,ho->hn", wx, p["attn_r"])
            e = el[:, None, :] + er[:, :, None]              # (heads, dst, src)
            e = jnp.where(e > 0, e, 0.2 * e)
            e = jnp.where(adj[None] > 0, e, -jnp.inf)
            a = jax.nn.softmax(e, axis=-1)
            h = (jnp.einsum("hds,hso->hdo", a, wx) + p["bias"][:, None, :]).mean(0)
        else:
            h = h @ p["w"] + p["bias"]
        if i < n_layers - 1:
            mu = h.mean(-1, keepdims=True)
            var = ((h - mu) ** 2).mean(-1, keepdims=True)
            h = (h - mu) / jnp.sqrt(var + 1e-5)
            h = h * p["ln_gamma"] + p["ln_beta"]
            h = jnp.maximum(h, 0.0)
    return h


# ---------------------------------------------------------------------------
# Deterministic example
# ---------------------------------------------------------------------------
if __name__ == "__main__":
    key = jax.random.PRNGKey(0)
    N = 16                                 # nodes
    layer_size = [16, 32, 8]               # GATConv(16->32, heads=2) then Linear(32->8)
    heads = 2
    n_linear = 1

    k = jax.random.split(key, 12)
    feat = jax.random.normal(k[0], (N, layer_size[0]), jnp.float32)

    # random directed graph with self-loops (no 0-in-degree nodes, as in DGL)
    adj = jax.random.bernoulli(k[1], 0.3, (N, N)).astype(jnp.float32)
    adj = jnp.maximum(adj, jnp.eye(N, dtype=jnp.float32))

    params = [
        {   # layer 0: GATConv(16 -> 32, heads=2) + LayerNorm(32) + relu
            "w": 0.1 * jax.random.normal(k[2], (heads, layer_size[0], layer_size[1]),
                                         jnp.float32),
            "attn_l": 0.1 * jax.random.normal(k[3], (heads, layer_size[1]), jnp.float32),
            "attn_r": 0.1 * jax.random.normal(k[4], (heads, layer_size[1]), jnp.float32),
            "bias": 0.1 * jax.random.normal(k[5], (heads, layer_size[1]), jnp.float32),
            "ln_gamma": 1.0 + 0.1 * jax.random.normal(k[6], (1, layer_size[1]),
                                                      jnp.float32),
            "ln_beta": 0.1 * jax.random.normal(k[7], (1, layer_size[1]), jnp.float32),
        },
        {   # layer 1: Linear(32 -> 8)   (last layer: no norm / activation)
            "w": 0.1 * jax.random.normal(k[8], (layer_size[1], layer_size[2]),
                                         jnp.float32),
            "bias": 0.1 * jax.random.normal(k[9], (1, layer_size[2]), jnp.float32),
        },
    ]

    fwd = jax.jit(functools.partial(gat_forward, heads=heads, n_linear=n_linear))
    out = jax.block_until_ready(fwd(feat, adj, params))

    ref = _reference_forward(feat, adj, params, heads=heads, n_linear=n_linear)
    err = float(jnp.max(jnp.abs(out - ref)))

    assert out.shape == (N, layer_size[-1])
    assert bool(jnp.all(jnp.isfinite(out)))
    assert err < 0.1, f"max abs error vs f32 reference too large: {err}"
    print("KERNEL_OK")
</pallas_src>

<mosaic_0001>
module attributes {stable_mosaic.version = 11 : i64} {
  func.func @_proj_kernel(%arg0: i32, %arg1: memref<128x16xf32, #tpu.memory_space<vmem>>, %arg2: memref<2x16x32xf32, #tpu.memory_space<vmem>>, %arg3: memref<2x1x32xf32, #tpu.memory_space<vmem>>, %arg4: memref<2x1x32xf32, #tpu.memory_space<vmem>>, %arg5: memref<2x128x32xbf16, #tpu.memory_space<vmem>>, %arg6: memref<2x1x128xf32, #tpu.memory_space<vmem>>, %arg7: memref<2x128x1xf32, #tpu.memory_space<vmem>>) attributes {dimension_semantics = [#tpu.dimension_semantics<parallel>], iteration_bounds = array<i64: 1>, scalar_prefetch = 0 : i64, scratch_operands = 0 : i64, tpu.core_type = #tpu.core_type<tc>, window_params = [{transform_indices = @transform_0, window_bounds = array<i64: 128, 16>}, {pipeline_mode = #tpu.pipeline_mode<synchronous>, transform_indices = @transform_1, window_bounds = array<i64: 2, 16, 32>}, {pipeline_mode = #tpu.pipeline_mode<synchronous>, transform_indices = @transform_2, window_bounds = array<i64: 2, 1, 32>}, {pipeline_mode = #tpu.pipeline_mode<synchronous>, transform_indices = @transform_3, window_bounds = array<i64: 2, 1, 32>}, {transform_indices = @transform_4, window_bounds = array<i64: 2, 128, 32>}, {transform_indices = @transform_5, window_bounds = array<i64: 2, 1, 128>}, {transform_indices = @transform_6, window_bounds = array<i64: 2, 128, 1>}]} {
    %c0 = arith.constant 0 : index
    %c0_0 = arith.constant 0 : index
    %0 = vector.load %arg1[%c0, %c0_0] : memref<128x16xf32, #tpu.memory_space<vmem>>, vector<128x16xf32>
    %1 = arith.truncf %0 : vector<128x16xf32> to vector<128x16xbf16>
    %c0_1 = arith.constant 0 : index
    %c0_2 = arith.constant 0 : index
    %c0_3 = arith.constant 0 : index
    %2 = vector.load %arg2[%c0_1, %c0_2, %c0_3] : memref<2x16x32xf32, #tpu.memory_space<vmem>>, vector<1x16x32xf32>
    %3 = vector.shape_cast %2 : vector<1x16x32xf32> to vector<16x32xf32>
    %4 = arith.truncf %3 : vector<16x32xf32> to vector<16x32xbf16>
    %cst = arith.constant dense<0.000000e+00> : vector<128x32xf32>
    %5 = tpu.matmul %1, %4, %cst {dimension_numbers = #tpu.dot_dimension_numbers<[1], [0], [0], [1], [0, 0, 1, 1], [], []>} : vector<128x16xbf16>, vector<16x32xbf16>, vector<128x32xf32> -> vector<128x32xf32>
    %6 = arith.truncf %5 : vector<128x32xf32> to vector<128x32xbf16>
    %c0_4 = arith.constant 0 : index
    %c0_5 = arith.constant 0 : index
    %c0_6 = arith.constant 0 : index
    %7 = vector.load %arg5[%c0_4, %c0_5, %c0_6] : memref<2x128x32xbf16, #tpu.memory_space<vmem>>, vector<1x128x32xbf16>
    %8 = vector.shape_cast %7 : vector<1x128x32xbf16> to vector<128x32xbf16>
    %9 = vector.shape_cast %6 : vector<128x32xbf16> to vector<1x128x32xbf16>
    tpu.vector_store %arg5[%c0_4, %c0_5, %c0_6], %9 {strides = array<i32>} : memref<2x128x32xbf16, #tpu.memory_space<vmem>>, vector<1x128x32xbf16>,
    %c0_7 = arith.constant 0 : index
    %c0_8 = arith.constant 0 : index
    %c0_9 = arith.constant 0 : index
    %10 = vector.load %arg3[%c0_7, %c0_8, %c0_9] : memref<2x1x32xf32, #tpu.memory_space<vmem>>, vector<1x1x32xf32>
    %11 = vector.shape_cast %10 : vector<1x1x32xf32> to vector<1x32xf32>
    %cst_10 = arith.constant dense<0.000000e+00> : vector<1x128xf32>
    %12 = tpu.matmul %11, %5, %cst_10 {dimension_numbers = #tpu.dot_dimension_numbers<[1], [1], [0], [0], [0, 0, 1, 0], [], []>} : vector<1x32xf32>, vector<128x32xf32>, vector<1x128xf32> -> vector<1x128xf32>
    %c0_11 = arith.constant 0 : index
    %c0_12 = arith.constant 0 : index
    %c0_13 = arith.constant 0 : index
    %13 = vector.load %arg6[%c0_11, %c0_12, %c0_13] : memref<2x1x128xf32, #tpu.memory_space<vmem>>, vector<1x1x128xf32>
    %14 = vector.shape_cast %13 : vector<1x1x128xf32> to vector<1x128xf32>
    %15 = vector.shape_cast %12 : vector<1x128xf32> to vector<1x1x128xf32>
    tpu.vector_store %arg6[%c0_11, %c0_12, %c0_13], %15 {strides = array<i32>} : memref<2x1x128xf32, #tpu.memory_space<vmem>>, vector<1x1x128xf32>,
    %c0_14 = arith.constant 0 : index
    %c0_15 = arith.constant 0 : index
    %c0_16 = arith.constant 0 : index
    %16 = vector.load %arg4[%c0_14, %c0_15, %c0_16] : memref<2x1x32xf32, #tpu.memory_space<vmem>>, vector<1x1x32xf32>
    %17 = vector.shape_cast %16 : vector<1x1x32xf32> to vector<1x32xf32>
    %18 = vector.broadcast %17 : vector<1x32xf32> to vector<128x32xf32>
    %19 = arith.mulf %5, %18 : vector<128x32xf32>
    %cst_17 = arith.constant dense<0.000000e+00> : vector<128xf32>
    %20 = vector.multi_reduction <add>, %19, %cst_17 [1] : vector<128x32xf32> to vector<128xf32>
    %21 = vector.shape_cast %20 : vector<128xf32> to vector<128x1xf32>
    %c0_18 = arith.constant 0 : index
    %c0_19 = arith.constant 0 : index
    %c0_20 = arith.constant 0 : index
    %22 = vector.load %arg7[%c0_18, %c0_19, %c0_20] : memref<2x128x1xf32, #tpu.memory_space<vmem>>, vector<1x128x1xf32>
    %23 = vector.shape_cast %22 : vector<1x128x1xf32> to vector<128x1xf32>
    %24 = vector.shape_cast %21 : vector<128x1xf32> to vector<1x128x1xf32>
    tpu.vector_store %arg7[%c0_18, %c0_19, %c0_20], %24 {strides = array<i32>} : memref<2x128x1xf32, #tpu.memory_space<vmem>>, vector<1x128x1xf32>,
    %c1 = arith.constant 1 : index
    %c0_21 = arith.constant 0 : index
    %c0_22 = arith.constant 0 : index
    %25 = vector.load %arg2[%c1, %c0_21, %c0_22] : memref<2x16x32xf32, #tpu.memory_space<vmem>>, vector<1x16x32xf32>
    %26 = vector.shape_cast %25 : vector<1x16x32xf32> to vector<16x32xf32>
    %27 = arith.truncf %26 : vector<16x32xf32> to vector<16x32xbf16>
    %cst_23 = arith.constant dense<0.000000e+00> : vector<128x32xf32>
    %28 = tpu.matmul %1, %27, %cst_23 {dimension_numbers = #tpu.dot_dimension_numbers<[1], [0], [0], [1], [0, 0, 1, 1], [], []>} : vector<128x16xbf16>, vector<16x32xbf16>, vector<128x32xf32> -> vector<128x32xf32>
    %29 = arith.truncf %28 : vector<128x32xf32> to vector<128x32xbf16>
    %c1_24 = arith.constant 1 : index
    %c0_25 = arith.constant 0 : index
    %c0_26 = arith.constant 0 : index
    %30 = vector.load %arg5[%c1_24, %c0_25, %c0_26] : memref<2x128x32xbf16, #tpu.memory_space<vmem>>, vector<1x128x32xbf16>
    %31 = vector.shape_cast %30 : vector<1x128x32xbf16> to vector<128x32xbf16>
    %32 = vector.shape_cast %29 : vector<128x32xbf16> to vector<1x128x32xbf16>
    tpu.vector_store %arg5[%c1_24, %c0_25, %c0_26], %32 {strides = array<i32>} : memref<2x128x32xbf16, #tpu.memory_space<vmem>>, vector<1x128x32xbf16>,
    %c1_27 = arith.constant 1 : index
    %c0_28 = arith.constant 0 : index
    %c0_29 = arith.constant 0 : index
    %33 = vector.load %arg3[%c1_27, %c0_28, %c0_29] : memref<2x1x32xf32, #tpu.memory_space<vmem>>, vector<1x1x32xf32>
    %34 = vector.shape_cast %33 : vector<1x1x32xf32> to vector<1x32xf32>
    %cst_30 = arith.constant dense<0.000000e+00> : vector<1x128xf32>
    %35 = tpu.matmul %34, %28, %cst_30 {dimension_numbers = #tpu.dot_dimension_numbers<[1], [1], [0], [0], [0, 0, 1, 0], [], []>} : vector<1x32xf32>, vector<128x32xf32>, vector<1x128xf32> -> vector<1x128xf32>
    %c1_31 = arith.constant 1 : index
    %c0_32 = arith.constant 0 : index
    %c0_33 = arith.constant 0 : index
    %36 = vector.load %arg6[%c1_31, %c0_32, %c0_33] : memref<2x1x128xf32, #tpu.memory_space<vmem>>, vector<1x1x128xf32>
    %37 = vector.shape_cast %36 : vector<1x1x128xf32> to vector<1x128xf32>
    %38 = vector.shape_cast %35 : vector<1x128xf32> to vector<1x1x128xf32>
    tpu.vector_store %arg6[%c1_31, %c0_32, %c0_33], %38 {strides = array<i32>} : memref<2x1x128xf32, #tpu.memory_space<vmem>>, vector<1x1x128xf32>,
    %c1_34 = arith.constant 1 : index
    %c0_35 = arith.constant 0 : index
    %c0_36 = arith.constant 0 : index
    %39 = vector.load %arg4[%c1_34, %c0_35, %c0_36] : memref<2x1x32xf32, #tpu.memory_space<vmem>>, vector<1x1x32xf32>
    %40 = vector.shape_cast %39 : vector<1x1x32xf32> to vector<1x32xf32>
    %41 = vector.broadcast %40 : vector<1x32xf32> to vector<128x32xf32>
    %42 = arith.mulf %28, %41 : vector<128x32xf32>
    %cst_37 = arith.constant dense<0.000000e+00> : vector<128xf32>
    %43 = vector.multi_reduction <add>, %42, %cst_37 [1] : vector<128x32xf32> to vector<128xf32>
    %44 = vector.shape_cast %43 : vector<128xf32> to vector<128x1xf32>
    %c1_38 = arith.constant 1 : index
    %c0_39 = arith.constant 0 : index
    %c0_40 = arith.constant 0 : index
    %45 = vector.load %arg7[%c1_38, %c0_39, %c0_40] : memref<2x128x1xf32, #tpu.memory_space<vmem>>, vector<1x128x1xf32>
    %46 = vector.shape_cast %45 : vector<1x128x1xf32> to vector<128x1xf32>
    %47 = vector.shape_cast %44 : vector<128x1xf32> to vector<1x128x1xf32>
    tpu.vector_store %arg7[%c1_38, %c0_39, %c0_40], %47 {strides = array<i32>} : memref<2x128x1xf32, #tpu.memory_space<vmem>>, vector<1x128x1xf32>,
    return
  }
  func.func @transform_0(%arg0: i32) -> (i32, i32) {
    %c0_i32 = arith.constant 0 : i32
    %c0_i32_0 = arith.constant 0 : i32
    return %arg0, %c0_i32 : i32, i32
  }
  func.func @transform_1(%arg0: i32) -> (i32, i32, i32) {
    %c0_i32 = arith.constant 0 : i32
    %c0_i32_0 = arith.constant 0 : i32
    %c0_i32_1 = arith.constant 0 : i32
    %c0_i32_2 = arith.constant 0 : i32
    return %c0_i32, %c0_i32_0, %c0_i32_1 : i32, i32, i32
  }
  func.func @transform_2(%arg0: i32) -> (i32, i32, i32) {
    %c0_i32 = arith.constant 0 : i32
    %c0_i32_0 = arith.constant 0 : i32
    %c0_i32_1 = arith.constant 0 : i32
    %c0_i32_2 = arith.constant 0 : i32
    return %c0_i32, %c0_i32_0, %c0_i32_1 : i32, i32, i32
  }
  func.func @transform_3(%arg0: i32) -> (i32, i32, i32) {
    %c0_i32 = arith.constant 0 : i32
    %c0_i32_0 = arith.constant 0 : i32
    %c0_i32_1 = arith.constant 0 : i32
    %c0_i32_2 = arith.constant 0 : i32
    return %c0_i32, %c0_i32_0, %c0_i32_1 : i32, i32, i32
  }
  func.func @transform_4(%arg0: i32) -> (i32, i32, i32) {
    %c0_i32 = arith.constant 0 : i32
    %c0_i32_0 = arith.constant 0 : i32
    %c0_i32_1 = arith.constant 0 : i32
    return %c0_i32, %arg0, %c0_i32_0 : i32, i32, i32
  }
  func.func @transform_5(%arg0: i32) -> (i32, i32, i32) {
    %c0_i32 = arith.constant 0 : i32
    %c0_i32_0 = arith.constant 0 : i32
    %c0_i32_1 = arith.constant 0 : i32
    return %c0_i32, %c0_i32_0, %arg0 : i32, i32, i32
  }
  func.func @transform_6(%arg0: i32) -> (i32, i32, i32) {
    %c0_i32 = arith.constant 0 : i32
    %c0_i32_0 = arith.constant 0 : i32
    %c0_i32_1 = arith.constant 0 : i32
    return %c0_i32, %arg0, %c0_i32_0 : i32, i32, i32
  }
}

module attributes {stable_mosaic.version = 11 : i64} {
  func.func @_gat_attn_kernel(%arg0: i32, %arg1: i32, %arg2: memref<1x1xi32, #tpu.memory_space<smem>>, %arg3: memref<2x128x32xbf16, #tpu.memory_space<vmem>>, %arg4: memref<2x1x128xf32, #tpu.memory_space<vmem>>, %arg5: memref<2x128x1xf32, #tpu.memory_space<vmem>>, %arg6: memref<128x128xbf16, #tpu.memory_space<vmem>>, %arg7: memref<1x32xf32, #tpu.memory_space<vmem>>, %arg8: memref<1x32xf32, #tpu.memory_space<vmem>>, %arg9: memref<1x32xf32, #tpu.memory_space<vmem>>, %arg10: memref<32x8xf32, #tpu.memory_space<vmem>>, %arg11: memref<1x8xf32, #tpu.memory_space<vmem>>, %arg12: memref<128x8xf32, #tpu.memory_space<vmem>>, %arg13: memref<2x128x1xf32, #tpu.memory_space<vmem>>, %arg14: memref<2x128x1xf32, #tpu.memory_space<vmem>>, %arg15: memref<2x128x32xf32, #tpu.memory_space<vmem>>) attributes {dimension_semantics = [#tpu.dimension_semantics<parallel>, #tpu.dimension_semantics<arbitrary>], iteration_bounds = array<i64: 1, 1>, scalar_prefetch = 1 : i64, scratch_operands = 3 : i64, tpu.core_type = #tpu.core_type<tc>, window_params = [{transform_indices = @transform_0, window_bounds = array<i64: 2, 128, 32>}, {transform_indices = @transform_1, window_bounds = array<i64: 2, 1, 128>}, {transform_indices = @transform_2, window_bounds = array<i64: 2, 128, 1>}, {transform_indices = @transform_3, window_bounds = array<i64: 128, 128>}, {pipeline_mode = #tpu.pipeline_mode<synchronous>, transform_indices = @transform_4, window_bounds = array<i64: 1, 32>}, {pipeline_mode = #tpu.pipeline_mode<synchronous>, transform_indices = @transform_5, window_bounds = array<i64: 1, 32>}, {pipeline_mode = #tpu.pipeline_mode<synchronous>, transform_indices = @transform_6, window_bounds = array<i64: 1, 32>}, {pipeline_mode = #tpu.pipeline_mode<synchronous>, transform_indices = @transform_7, window_bounds = array<i64: 32, 8>}, {pipeline_mode = #tpu.pipeline_mode<synchronous>, transform_indices = @transform_8, window_bounds = array<i64: 1, 8>}, {transform_indices = @transform_9, window_bounds = array<i64: 128, 8>}]} {
    %c0_i32 = arith.constant 0 : i32
    %0 = arith.cmpi eq, %arg1, %c0_i32 : i32
    %1 = arith.extui %0 : i1 to i32
    %c0_i32_0 = arith.constant 0 : i32
    %2 = arith.cmpi ne, %1, %c0_i32_0 : i32
    scf.if %2 {
      %cst = arith.constant -1.000000e+30 : f32
      %12 = vector.broadcast %cst : f32 to vector<2x128x1xf32>
      %c0 = arith.constant 0 : index
      %c0_5 = arith.constant 0 : index
      %c0_6 = arith.constant 0 : index
      %13 = vector.load %arg13[%c0, %c0_5, %c0_6] : memref<2x128x1xf32, #tpu.memory_space<vmem>>, vector<2x128x1xf32>
      tpu.vector_store %arg13[%c0, %c0_5, %c0_6], %12 {strides = array<i32>} : memref<2x128x1xf32, #tpu.memory_space<vmem>>, vector<2x128x1xf32>,
      %cst_7 = arith.constant 0.000000e+00 : f32
      %14 = vector.broadcast %cst_7 : f32 to vector<2x128x1xf32>
      %c0_8 = arith.constant 0 : index
      %c0_9 = arith.constant 0 : index
      %c0_10 = arith.constant 0 : index
      %15 = vector.load %arg14[%c0_8, %c0_9, %c0_10] : memref<2x128x1xf32, #tpu.memory_space<vmem>>, vector<2x128x1xf32>
      tpu.vector_store %arg14[%c0_8, %c0_9, %c0_10], %14 {strides = array<i32>} : memref<2x128x1xf32, #tpu.memory_space<vmem>>, vector<2x128x1xf32>,
      %cst_11 = arith.constant 0.000000e+00 : f32
      %16 = vector.broadcast %cst_11 : f32 to vector<2x128x32xf32>
      %c0_12 = arith.constant 0 : index
      %c0_13 = arith.constant 0 : index
      %c0_14 = arith.constant 0 : index
      %17 = vector.load %arg15[%c0_12, %c0_13, %c0_14] : memref<2x128x32xf32, #tpu.memory_space<vmem>>, vector<2x128x32xf32>
      tpu.vector_store %arg15[%c0_12, %c0_13, %c0_14], %16 {strides = array<i32>} : memref<2x128x32xf32, #tpu.memory_space<vmem>>, vector<2x128x32xf32>,
    } else {
    }
    %3 = arith.index_cast %arg0 : i32 to index
    %4 = arith.index_cast %arg1 : i32 to index
    %5 = memref.load %arg2[%3, %4] : memref<1x1xi32, #tpu.memory_space<smem>>
    %c0_i32_1 = arith.constant 0 : i32
    %6 = arith.cmpi sgt, %5, %c0_i32_1 : i32
    %7 = arith.extui %6 : i1 to i32
    %c0_i32_2 = arith.constant 0 : i32
    %8 = arith.cmpi ne, %7, %c0_i32_2 : i32
    scf.if %8 {
      %c0 = arith.constant 0 : index
      %c0_5 = arith.constant 0 : index
      %12 = vector.load %arg6[%c0, %c0_5] : memref<128x128xbf16, #tpu.memory_space<vmem>>, vector<128x128xbf16>
      %c0_6 = arith.constant 0 : index
      %c0_7 = arith.constant 0 : index
      %c0_8 = arith.constant 0 : index
      %13 = vector.load %arg5[%c0_6, %c0_7, %c0_8] : memref<2x128x1xf32, #tpu.memory_space<vmem>>, vector<1x128x1xf32>
      %14 = vector.shape_cast %13 : vector<1x128x1xf32> to vector<128x1xf32>
      %c0_9 = arith.constant 0 : index
      %c0_10 = arith.constant 0 : index
      %c0_11 = arith.constant 0 : index
      %15 = vector.load %arg4[%c0_9, %c0_10, %c0_11] : memref<2x1x128xf32, #tpu.memory_space<vmem>>, vector<1x1x128xf32>
      %16 = vector.shape_cast %15 : vector<1x1x128xf32> to vector<1x128xf32>
      %17 = vector.broadcast %14 : vector<128x1xf32> to vector<128x128xf32>
      %18 = vector.broadcast %16 : vector<1x128xf32> to vector<128x128xf32>
      %19 = arith.addf %17, %18 : vector<128x128xf32>
      %cst = arith.constant 0.000000e+00 : f32
      %20 = vector.broadcast %cst : f32 to vector<128x128xf32>
      %21 = arith.cmpf ogt, %19, %20 : vector<128x128xf32>
      %cst_12 = arith.constant 2.000000e-01 : f32
      %22 = vector.broadcast %cst_12 : f32 to vector<128x128xf32>
      %23 = arith.mulf %22, %19 : vector<128x128xf32>
      %24 = arith.select %21, %19, %23 : vector<128x128xi1>, vector<128x128xf32>
      %25 = arith.extf %12 : vector<128x128xbf16> to vector<128x128xf32>
      %26 = arith.addf %24, %25 : vector<128x128xf32>
      %c0_13 = arith.constant 0 : index
      %c0_14 = arith.constant 0 : index
      %c0_15 = arith.constant 0 : index
      %27 = vector.load %arg13[%c0_13, %c0_14, %c0_15] : memref<2x128x1xf32, #tpu.memory_space<vmem>>, vector<1x128x1xf32>
      %28 = vector.shape_cast %27 : vector<1x128x1xf32> to vector<128x1xf32>
      %cst_16 = arith.constant dense<0xFF800000> : vector<128xf32>
      %29 = vector.multi_reduction <maximumf>, %26, %cst_16 [1] : vector<128x128xf32> to vector<128xf32>
      %30 = vector.shape_cast %29 : vector<128xf32> to vector<128x1xf32>
      %31 = arith.maximumf %28, %30 : vector<128x1xf32>
      %32 = arith.subf %28, %31 : vector<128x1xf32>
      %33 = math.exp %32 : vector<128x1xf32>
      %34 = vector.broadcast %31 : vector<128x1xf32> to vector<128x128xf32>
      %35 = arith.subf %26, %34 : vector<128x128xf32>
      %36 = math.exp %35 : vector<128x128xf32>
      %c0_17 = arith.constant 0 : index
      %c0_18 = arith.constant 0 : index
      %c0_19 = arith.constant 0 : index
      %37 = vector.load %arg14[%c0_17, %c0_18, %c0_19] : memref<2x128x1xf32, #tpu.memory_space<vmem>>, vector<1x128x1xf32>
      %38 = vector.shape_cast %37 : vector<1x128x1xf32> to vector<128x1xf32>
      %39 = arith.mulf %33, %38 : vector<128x1xf32>
      %cst_20 = arith.constant dense<0.000000e+00> : vector<128xf32>
      %40 = vector.multi_reduction <add>, %36, %cst_20 [1] : vector<128x128xf32> to vector<128xf32>
      %41 = vector.shape_cast %40 : vector<128xf32> to vector<128x1xf32>
      %42 = arith.addf %39, %41 : vector<128x1xf32>
      %c0_21 = arith.constant 0 : index
      %c0_22 = arith.constant 0 : index
      %c0_23 = arith.constant 0 : index
      %43 = vector.load %arg14[%c0_21, %c0_22, %c0_23] : memref<2x128x1xf32, #tpu.memory_space<vmem>>, vector<1x128x1xf32>
      %44 = vector.shape_cast %43 : vector<1x128x1xf32> to vector<128x1xf32>
      %45 = vector.shape_cast %42 : vector<128x1xf32> to vector<1x128x1xf32>
      tpu.vector_store %arg14[%c0_21, %c0_22, %c0_23], %45 {strides = array<i32>} : memref<2x128x1xf32, #tpu.memory_space<vmem>>, vector<1x128x1xf32>,
      %c0_24 = arith.constant 0 : index
      %c0_25 = arith.constant 0 : index
      %c0_26 = arith.constant 0 : index
      %46 = vector.load %arg15[%c0_24, %c0_25, %c0_26] : memref<2x128x32xf32, #tpu.memory_space<vmem>>, vector<1x128x32xf32>
      %47 = vector.shape_cast %46 : vector<1x128x32xf32> to vector<128x32xf32>
      %48 = vector.broadcast %33 : vector<128x1xf32> to vector<128x32xf32>
      %49 = arith.mulf %48, %47 : vector<128x32xf32>
      %50 = arith.truncf %36 : vector<128x128xf32> to vector<128x128xbf16>
      %c0_27 = arith.constant 0 : index
      %c0_28 = arith.constant 0 : index
      %c0_29 = arith.constant 0 : index
      %51 = vector.load %arg3[%c0_27, %c0_28, %c0_29] : memref<2x128x32xbf16, #tpu.memory_space<vmem>>, vector<1x128x32xbf16>
      %52 = vector.shape_cast %51 : vector<1x128x32xbf16> to vector<128x32xbf16>
      %cst_30 = arith.constant dense<0.000000e+00> : vector<128x32xf32>
      %53 = tpu.matmul %50, %52, %cst_30 {dimension_numbers = #tpu.dot_dimension_numbers<[1], [0], [0], [1], [0, 0, 1, 1], [], []>} : vector<128x128xbf16>, vector<128x32xbf16>, vector<128x32xf32> -> vector<128x32xf32>
      %54 = arith.addf %49, %53 : vector<128x32xf32>
      %c0_31 = arith.constant 0 : index
      %c0_32 = arith.constant 0 : index
      %c0_33 = arith.constant 0 : index
      %55 = vector.load %arg15[%c0_31, %c0_32, %c0_33] : memref<2x128x32xf32, #tpu.memory_space<vmem>>, vector<1x128x32xf32>
      %56 = vector.shape_cast %55 : vector<1x128x32xf32> to vector<128x32xf32>
      %57 = vector.shape_cast %54 : vector<128x32xf32> to vector<1x128x32xf32>
      tpu.vector_store %arg15[%c0_31, %c0_32, %c0_33], %57 {strides = array<i32>} : memref<2x128x32xf32, #tpu.memory_space<vmem>>, vector<1x128x32xf32>,
      %c0_34 = arith.constant 0 : index
      %c0_35 = arith.constant 0 : index
      %c0_36 = arith.constant 0 : index
      %58 = vector.load %arg13[%c0_34, %c0_35, %c0_36] : memref<2x128x1xf32, #tpu.memory_space<vmem>>, vector<1x128x1xf32>
      %59 = vector.shape_cast %58 : vector<1x128x1xf32> to vector<128x1xf32>
      %60 = vector.shape_cast %31 : vector<128x1xf32> to vector<1x128x1xf32>
      tpu.vector_store %arg13[%c0_34, %c0_35, %c0_36], %60 {strides = array<i32>} : memref<2x128x1xf32, #tpu.memory_space<vmem>>, vector<1x128x1xf32>,
      %c1 = arith.constant 1 : index
      %c0_37 = arith.constant 0 : index
      %c0_38 = arith.constant 0 : index
      %61 = vector.load %arg5[%c1, %c0_37, %c0_38] : memref<2x128x1xf32, #tpu.memory_space<vmem>>, vector<1x128x1xf32>
      %62 = vector.shape_cast %61 : vector<1x128x1xf32> to vector<128x1xf32>
      %c1_39 = arith.constant 1 : index
      %c0_40 = arith.constant 0 : index
      %c0_41 = arith.constant 0 : index
      %63 = vector.load %arg4[%c1_39, %c0_40, %c0_41] : memref<2x1x128xf32, #tpu.memory_space<vmem>>, vector<1x1x128xf32>
      %64 = vector.shape_cast %63 : vector<1x1x128xf32> to vector<1x128xf32>
      %65 = vector.broadcast %62 : vector<128x1xf32> to vector<128x128xf32>
      %66 = vector.broadcast %64 : vector<1x128xf32> to vector<128x128xf32>
      %67 = arith.addf %65, %66 : vector<128x128xf32>
      %cst_42 = arith.constant 0.000000e+00 : f32
      %68 = vector.broadcast %cst_42 : f32 to vector<128x128xf32>
      %69 = arith.cmpf ogt, %67, %68 : vector<128x128xf32>
      %cst_43 = arith.constant 2.000000e-01 : f32
      %70 = vector.broadcast %cst_43 : f32 to vector<128x128xf32>
      %71 = arith.mulf %70, %67 : vector<128x128xf32>
      %72 = arith.select %69, %67, %71 : vector<128x128xi1>, vector<128x128xf32>
      %73 = arith.extf %12 : vector<128x128xbf16> to vector<128x128xf32>
      %74 = arith.addf %72, %73 : vector<128x128xf32>
      %c1_44 = arith.constant 1 : index
      %c0_45 = arith.constant 0 : index
      %c0_46 = arith.constant 0 : index
      %75 = vector.load %arg13[%c1_44, %c0_45, %c0_46] : memref<2x128x1xf32, #tpu.memory_space<vmem>>, vector<1x128x1xf32>
      %76 = vector.shape_cast %75 : vector<1x128x1xf32> to vector<128x1xf32>
      %cst_47 = arith.constant dense<0xFF800000> : vector<128xf32>
      %77 = vector.multi_reduction <maximumf>, %74, %cst_47 [1] : vector<128x128xf32> to vector<128xf32>
      %78 = vector.shape_cast %77 : vector<128xf32> to vector<128x1xf32>
      %79 = arith.maximumf %76, %78 : vector<128x1xf32>
      %80 = arith.subf %76, %79 : vector<128x1xf32>
      %81 = math.exp %80 : vector<128x1xf32>
      %82 = vector.broadcast %79 : vector<128x1xf32> to vector<128x128xf32>
      %83 = arith.subf %74, %82 : vector<128x128xf32>
      %84 = math.exp %83 : vector<128x128xf32>
      %c1_48 = arith.constant 1 : index
      %c0_49 = arith.constant 0 : index
      %c0_50 = arith.constant 0 : index
      %85 = vector.load %arg14[%c1_48, %c0_49, %c0_50] : memref<2x128x1xf32, #tpu.memory_space<vmem>>, vector<1x128x1xf32>
      %86 = vector.shape_cast %85 : vector<1x128x1xf32> to vector<128x1xf32>
      %87 = arith.mulf %81, %86 : vector<128x1xf32>
      %cst_51 = arith.constant dense<0.000000e+00> : vector<128xf32>
      %88 = vector.multi_reduction <add>, %84, %cst_51 [1] : vector<128x128xf32> to vector<128xf32>
      %89 = vector.shape_cast %88 : vector<128xf32> to vector<128x1xf32>
      %90 = arith.addf %87, %89 : vector<128x1xf32>
      %c1_52 = arith.constant 1 : index
      %c0_53 = arith.constant 0 : index
      %c0_54 = arith.constant 0 : index
      %91 = vector.load %arg14[%c1_52, %c0_53, %c0_54] : memref<2x128x1xf32, #tpu.memory_space<vmem>>, vector<1x128x1xf32>
      %92 = vector.shape_cast %91 : vector<1x128x1xf32> to vector<128x1xf32>
      %93 = vector.shape_cast %90 : vector<128x1xf32> to vector<1x128x1xf32>
      tpu.vector_store %arg14[%c1_52, %c0_53, %c0_54], %93 {strides = array<i32>} : memref<2x128x1xf32, #tpu.memory_space<vmem>>, vector<1x128x1xf32>,
      %c1_55 = arith.constant 1 : index
      %c0_56 = arith.constant 0 : index
      %c0_57 = arith.constant 0 : index
      %94 = vector.load %arg15[%c1_55, %c0_56, %c0_57] : memref<2x128x32xf32, #tpu.memory_space<vmem>>, vector<1x128x32xf32>
      %95 = vector.shape_cast %94 : vector<1x128x32xf32> to vector<128x32xf32>
      %96 = vector.broadcast %81 : vector<128x1xf32> to vector<128x32xf32>
      %97 = arith.mulf %96, %95 : vector<128x32xf32>
      %98 = arith.truncf %84 : vector<128x128xf32> to vector<128x128xbf16>
      %c1_58 = arith.constant 1 : index
      %c0_59 = arith.constant 0 : index
      %c0_60 = arith.constant 0 : index
      %99 = vector.load %arg3[%c1_58, %c0_59, %c0_60] : memref<2x128x32xbf16, #tpu.memory_space<vmem>>, vector<1x128x32xbf16>
      %100 = vector.shape_cast %99 : vector<1x128x32xbf16> to vector<128x32xbf16>
      %cst_61 = arith.constant dense<0.000000e+00> : vector<128x32xf32>
      %101 = tpu.matmul %98, %100, %cst_61 {dimension_numbers = #tpu.dot_dimension_numbers<[1], [0], [0], [1], [0, 0, 1, 1], [], []>} : vector<128x128xbf16>, vector<128x32xbf16>, vector<128x32xf32> -> vector<128x32xf32>
      %102 = arith.addf %97, %101 : vector<128x32xf32>
      %c1_62 = arith.constant 1 : index
      %c0_63 = arith.constant 0 : index
      %c0_64 = arith.constant 0 : index
      %103 = vector.load %arg15[%c1_62, %c0_63, %c0_64] : memref<2x128x32xf32, #tpu.memory_space<vmem>>, vector<1x128x32xf32>
      %104 = vector.shape_cast %103 : vector<1x128x32xf32> to vector<128x32xf32>
      %105 = vector.shape_cast %102 : vector<128x32xf32> to vector<1x128x32xf32>
      tpu.vector_store %arg15[%c1_62, %c0_63, %c0_64], %105 {strides = array<i32>} : memref<2x128x32xf32, #tpu.memory_space<vmem>>, vector<1x128x32xf32>,
      %c1_65 = arith.constant 1 : index
      %c0_66 = arith.constant 0 : index
      %c0_67 = arith.constant 0 : index
      %106 = vector.load %arg13[%c1_65, %c0_66, %c0_67] : memref<2x128x1xf32, #tpu.memory_space<vmem>>, vector<1x128x1xf32>
      %107 = vector.shape_cast %106 : vector<1x128x1xf32> to vector<128x1xf32>
      %108 = vector.shape_cast %79 : vector<128x1xf32> to vector<1x128x1xf32>
      tpu.vector_store %arg13[%c1_65, %c0_66, %c0_67], %108 {strides = array<i32>} : memref<2x128x1xf32, #tpu.memory_space<vmem>>, vector<1x128x1xf32>,
    } else {
    }
    %c0_i32_3 = arith.constant 0 : i32
    %9 = arith.cmpi eq, %arg1, %c0_i32_3 : i32
    %10 = arith.extui %9 : i1 to i32
    %c0_i32_4 = arith.constant 0 : i32
    %11 = arith.cmpi ne, %10, %c0_i32_4 : i32
    scf.if %11 {
      %cst = arith.constant 0.000000e+00 : f32
      %12 = vector.broadcast %cst : f32 to vector<128x32xf32>
      %c0 = arith.constant 0 : index
      %c0_5 = arith.constant 0 : index
      %c0_6 = arith.constant 0 : index
      %13 = vector.load %arg14[%c0, %c0_5, %c0_6] : memref<2x128x1xf32, #tpu.memory_space<vmem>>, vector<1x128x1xf32>
      %14 = vector.shape_cast %13 : vector<1x128x1xf32> to vector<128x1xf32>
      %cst_7 = arith.constant 9.99999968E-21 : f32
      %15 = vector.broadcast %cst_7 : f32 to vector<128x1xf32>
      %16 = arith.maximumf %14, %15 : vector<128x1xf32>
      %17 = tpu.reciprocal %16 {approx = true} : vector<128x1xf32> -> vector<128x1xf32>
      %c0_8 = arith.constant 0 : index
      %c0_9 = arith.constant 0 : index
      %c0_10 = arith.constant 0 : index
      %18 = vector.load %arg15[%c0_8, %c0_9, %c0_10] : memref<2x128x32xf32, #tpu.memory_space<vmem>>, vector<1x128x32xf32>
      %19 = vector.shape_cast %18 : vector<1x128x32xf32> to vector<128x32xf32>
      %20 = vector.broadcast %17 : vector<128x1xf32> to vector<128x32xf32>
      %21 = arith.mulf %19, %20 : vector<128x32xf32>
      %22 = arith.addf %12, %21 : vector<128x32xf32>
      %c1 = arith.constant 1 : index
      %c0_11 = arith.constant 0 : index
      %c0_12 = arith.constant 0 : index
      %23 = vector.load %arg14[%c1, %c0_11, %c0_12] : memref<2x128x1xf32, #tpu.memory_space<vmem>>, vector<1x128x1xf32>
      %24 = vector.shape_cast %23 : vector<1x128x1xf32> to vector<128x1xf32>
      %cst_13 = arith.constant 9.99999968E-21 : f32
      %25 = vector.broadcast %cst_13 : f32 to vector<128x1xf32>
      %26 = arith.maximumf %24, %25 : vector<128x1xf32>
      %27 = tpu.reciprocal %26 {approx = true} : vector<128x1xf32> -> vector<128x1xf32>
      %c1_14 = arith.constant 1 : index
      %c0_15 = arith.constant 0 : index
      %c0_16 = arith.constant 0 : index
      %28 = vector.load %arg15[%c1_14, %c0_15, %c0_16] : memref<2x128x32xf32, #tpu.memory_space<vmem>>, vector<1x128x32xf32>
      %29 = vector.shape_cast %28 : vector<1x128x32xf32> to vector<128x32xf32>
      %30 = vector.broadcast %27 : vector<128x1xf32> to vector<128x32xf32>
      %31 = arith.mulf %29, %30 : vector<128x32xf32>
      %32 = arith.addf %22, %31 : vector<128x32xf32>
      %cst_17 = arith.constant 5.000000e-01 : f32
      %33 = vector.broadcast %cst_17 : f32 to vector<128x32xf32>
      %34 = arith.mulf %32, %33 : vector<128x32xf32>
      %c0_18 = arith.constant 0 : index
      %c0_19 = arith.constant 0 : index
      %35 = vector.load %arg7[%c0_18, %c0_19] : memref<1x32xf32, #tpu.memory_space<vmem>>, vector<1x32xf32>
      %36 = vector.broadcast %35 : vector<1x32xf32> to vector<128x32xf32>
      %37 = arith.addf %34, %36 : vector<128x32xf32>
      %cst_20 = arith.constant dense<0.000000e+00> : vector<128xf32>
      %38 = vector.multi_reduction <add>, %37, %cst_20 [1] : vector<128x32xf32> to vector<128xf32>
      %39 = vector.shape_cast %38 : vector<128xf32> to vector<128x1xf32>
      %cst_21 = arith.constant 3.200000e+01 : f32
      %40 = vector.broadcast %cst_21 : f32 to vector<128x1xf32>
      %41 = arith.divf %39, %40 : vector<128x1xf32>
      %42 = vector.broadcast %41 : vector<128x1xf32> to vector<128x32xf32>
      %43 = arith.subf %37, %42 : vector<128x32xf32>
      %44 = arith.mulf %43, %43 : vector<128x32xf32>
      %cst_22 = arith.constant dense<0.000000e+00> : vector<128xf32>
      %45 = vector.multi_reduction <add>, %44, %cst_22 [1] : vector<128x32xf32> to vector<128xf32>
      %46 = vector.shape_cast %45 : vector<128xf32> to vector<128x1xf32>
      %cst_23 = arith.constant 3.200000e+01 : f32
      %47 = vector.broadcast %cst_23 : f32 to vector<128x1xf32>
      %48 = arith.divf %46, %47 : vector<128x1xf32>
      %cst_24 = arith.constant 9.99999974E-6 : f32
      %49 = vector.broadcast %cst_24 : f32 to vector<128x1xf32>
      %50 = arith.addf %48, %49 : vector<128x1xf32>
      %51 = math.rsqrt %50 : vector<128x1xf32>
      %52 = vector.broadcast %51 : vector<128x1xf32> to vector<128x32xf32>
      %53 = arith.mulf %43, %52 : vector<128x32xf32>
      %c0_25 = arith.constant 0 : index
      %c0_26 = arith.constant 0 : index
      %54 = vector.load %arg8[%c0_25, %c0_26] : memref<1x32xf32, #tpu.memory_space<vmem>>, vector<1x32xf32>
      %55 = vector.broadcast %54 : vector<1x32xf32> to vector<128x32xf32>
      %56 = arith.mulf %53, %55 : vector<128x32xf32>
      %c0_27 = arith.constant 0 : index
      %c0_28 = arith.constant 0 : index
      %57 = vector.load %arg9[%c0_27, %c0_28] : memref<1x32xf32, #tpu.memory_space<vmem>>, vector<1x32xf32>
      %58 = vector.broadcast %57 : vector<1x32xf32> to vector<128x32xf32>
      %59 = arith.addf %56, %58 : vector<128x32xf32>
      %cst_29 = arith.constant 0.000000e+00 : f32
      %60 = vector.broadcast %cst_29 : f32 to vector<128x32xf32>
      %61 = arith.maximumf %59, %60 : vector<128x32xf32>
      %62 = arith.truncf %61 : vector<128x32xf32> to vector<128x32xbf16>
      %c0_30 = arith.constant 0 : index
      %c0_31 = arith.constant 0 : index
      %63 = vector.load %arg10[%c0_30, %c0_31] : memref<32x8xf32, #tpu.memory_space<vmem>>, vector<32x8xf32>
      %64 = arith.truncf %63 : vector<32x8xf32> to vector<32x8xbf16>
      %cst_32 = arith.constant dense<0.000000e+00> : vector<128x8xf32>
      %65 = tpu.matmul %62, %64, %cst_32 {dimension_numbers = #tpu.dot_dimension_numbers<[1], [0], [0], [1], [0, 0, 1, 1], [], []>} : vector<128x32xbf16>, vector<32x8xbf16>, vector<128x8xf32> -> vector<128x8xf32>
      %c0_33 = arith.constant 0 : index
      %c0_34 = arith.constant 0 : index
      %66 = vector.load %arg11[%c0_33, %c0_34] : memref<1x8xf32, #tpu.memory_space<vmem>>, vector<1x8xf32>
      %67 = vector.broadcast %66 : vector<1x8xf32> to vector<128x8xf32>
      %68 = arith.addf %65, %67 : vector<128x8xf32>
      %c0_35 = arith.constant 0 : index
      %c0_36 = arith.constant 0 : index
      %69 = vector.load %arg12[%c0_35, %c0_36] : memref<128x8xf32, #tpu.memory_space<vmem>>, vector<128x8xf32>
      tpu.vector_store %arg12[%c0_35, %c0_36], %68 {strides = array<i32>} : memref<128x8xf32, #tpu.memory_space<vmem>>, vector<128x8xf32>,
    } else {
    }
    return
  }
  func.func @transform_0(%arg0: i32, %arg1: i32, %arg2: memref<1x1xi32, #tpu.memory_space<smem>>) -> (i32, i32, i32) {
    %c0_i32 = arith.constant 0 : i32
    %c0_i32_0 = arith.constant 0 : i32
    %c0_i32_1 = arith.constant 0 : i32
    return %c0_i32, %arg1, %c0_i32_0 : i32, i32, i32
  }
  func.func @transform_1(%arg0: i32, %arg1: i32, %arg2: memref<1x1xi32, #tpu.memory_space<smem>>) -> (i32, i32, i32) {
    %c0_i32 = arith.constant 0 : i32
    %c0_i32_0 = arith.constant 0 : i32
    %c0_i32_1 = arith.constant 0 : i32
    return %c0_i32, %c0_i32_0, %arg1 : i32, i32, i32
  }
  func.func @transform_2(%arg0: i32, %arg1: i32, %arg2: memref<1x1xi32, #tpu.memory_space<smem>>) -> (i32, i32, i32) {
    %c0_i32 = arith.constant 0 : i32
    %c0_i32_0 = arith.constant 0 : i32
    %c0_i32_1 = arith.constant 0 : i32
    return %c0_i32, %arg0, %c0_i32_0 : i32, i32, i32
  }
  func.func @transform_3(%arg0: i32, %arg1: i32, %arg2: memref<1x1xi32, #tpu.memory_space<smem>>) -> (i32, i32) {
    %c0_i32 = arith.constant 0 : i32
    return %arg0, %arg1 : i32, i32
  }
  func.func @transform_4(%arg0: i32, %arg1: i32, %arg2: memref<1x1xi32, #tpu.memory_space<smem>>) -> (i32, i32) {
    %c0_i32 = arith.constant 0 : i32
    %c0_i32_0 = arith.constant 0 : i32
    %c0_i32_1 = arith.constant 0 : i32
    return %c0_i32, %c0_i32_0 : i32, i32
  }
  func.func @transform_5(%arg0: i32, %arg1: i32, %arg2: memref<1x1xi32, #tpu.memory_space<smem>>) -> (i32, i32) {
    %c0_i32 = arith.constant 0 : i32
    %c0_i32_0 = arith.constant 0 : i32
    %c0_i32_1 = arith.constant 0 : i32
    return %c0_i32, %c0_i32_0 : i32, i32
  }
  func.func @transform_6(%arg0: i32, %arg1: i32, %arg2: memref<1x1xi32, #tpu.memory_space<smem>>) -> (i32, i32) {
    %c0_i32 = arith.constant 0 : i32
    %c0_i32_0 = arith.constant 0 : i32
    %c0_i32_1 = arith.constant 0 : i32
    return %c0_i32, %c0_i32_0 : i32, i32
  }
  func.func @transform_7(%arg0: i32, %arg1: i32, %arg2: memref<1x1xi32, #tpu.memory_space<smem>>) -> (i32, i32) {
    %c0_i32 = arith.constant 0 : i32
    %c0_i32_0 = arith.constant 0 : i32
    %c0_i32_1 = arith.constant 0 : i32
    return %c0_i32, %c0_i32_0 : i32, i32
  }
  func.func @transform_8(%arg0: i32, %arg1: i32, %arg2: memref<1x1xi32, #tpu.memory_space<smem>>) -> (i32, i32) {
    %c0_i32 = arith.constant 0 : i32
    %c0_i32_0 = arith.constant 0 : i32
    %c0_i32_1 = arith.constant 0 : i32
    return %c0_i32, %c0_i32_0 : i32, i32
  }
  func.func @transform_9(%arg0: i32, %arg1: i32, %arg2: memref<1x1xi32, #tpu.memory_space<smem>>) -> (i32, i32) {
    %c0_i32 = arith.constant 0 : i32
    %c0_i32_0 = arith.constant 0 : i32
    return %arg0, %c0_i32 : i32, i32
  }
}

</mosaic_0001>

<bundles_post_ra>
// kernel: gat_forward.2
= control target key start
LH: loop header
LB: loop body
LE: loop exit
PB: predicated region body
PF: predicated region fallthrough
CT: control target
= control target key end

     0   :  { %vm48_vm0 = vcmask 130048   ;;  %vm156_vm1 = vcmask 261120   ;;  %vm138_vm2 = vcmask 257024   ;;  %vm297_vm3 = vcmask 7168   ;;  %s1303_s1 = inlined_call_operand.vmem [shape: f32[2,16,32], index: 1, kind: input, shape index: {}]   ;;  %s1304_s0 = inlined_call_operand.vmem [shape: f32[128,16], index: 0, kind: input, shape index: {}]   ;;  %s1305_s3 = inlined_call_operand.vmem [shape: f32[2,1,32], index: 3, kind: input, shape index: {}]   ;;  %s1306_s4 = inlined_call_operand.vmem [shape: bf16[2,128,32], index: 4, kind: output, shape index: {0}]   ;;  %s1307_s2 = inlined_call_operand.vmem [shape: f32[2,1,32], index: 2, kind: input, shape index: {}]   ;;  %s1308_s6 = inlined_call_operand.vmem [shape: f32[2,128,1], index: 6, kind: output, shape index: {2}]   ;;  %s1309_s5 = inlined_call_operand.vmem [shape: f32[2,1,128], index: 5, kind: output, shape index: {1}]  }
   0x1   :  { %v45_v0 = vld [vmem:[%s1303_s1] sm:$0xff]  ;;  %v46_v1 = vld [vmem:[%s1303_s1 + $0x8] sm:$0xff]  ;;  %v598_v2 = vld [vmem:[%s1303_s1 + $0x10] sm:$0xff] }
   0x2   :  { %v47_v3 = vpack.c.bf16 %v46_v1, %v45_v0  ;;  %v599_v4 = vld [vmem:[%s1303_s1 + $0x18] sm:$0xff]  ;;  %v21_v5 = vld [vmem:[%s1304_s0] sm:$0xff]  ;;  %v22_v6 = vld [vmem:[%s1304_s0 + $0x8] sm:$0xff] }
   0x3   :  { %v317_v7 = vpack.c.bf16 %v599_v4, %v598_v2  ;;  %v37_v8 = vpack.c.bf16 %v22_v6, %v21_v5  ;;  %v27_v9 = vld [vmem:[%s1304_s0 + $0x30] sm:$0xff]  ;;  %v28_v10 = vld [vmem:[%s1304_s0 + $0x38] sm:$0xff]  ;;  %v29_v11 = vld [vmem:[%s1304_s0 + $0x40] sm:$0xff] }
   0x4   :  { %80 = vmatpush.bf16.msra.mxu0 %v47_v3  ;;  %660 = vmatpush.bf16.msra.mxu1 %v47_v3  ;;  %v40_v12 = vpack.c.bf16 %v28_v10, %v27_v9  ;;  %v30_v13 = vld [vmem:[%s1304_s0 + $0x48] sm:$0xff]  ;;  %v35_v14 = vld [vmem:[%s1304_s0 + $0x70] sm:$0xff]  ;;  %v36_v15 = vld [vmem:[%s1304_s0 + $0x78] sm:$0xff] }
   0x5   :  { %663 = vmatpush.bf16.msra.mxu3 %v317_v7  ;;  %661 = vmatpush.bf16.msra.mxu2 %v47_v3  ;;  %v41_v16 = vpack.c.bf16 %v30_v13, %v29_v11  ;;  %v44_v17 = vpack.c.bf16 %v36_v15, %v35_v14  ;;  %v23_v18 = vld [vmem:[%s1304_s0 + $0x10] sm:$0xff]  ;;  %v24_v19 = vld [vmem:[%s1304_s0 + $0x18] sm:$0xff]  ;;  %v25_v24 = vld [vmem:[%s1304_s0 + $0x20] sm:$0xff] }
   0x6   :  { %v31_v20 = vld [vmem:[%s1304_s0 + $0x50] sm:$0xff]  ;;  %v32_v21 = vld [vmem:[%s1304_s0 + $0x58] sm:$0xff]  ;;  %v38_v22 = vpack.c.bf16 %v24_v19, %v23_v18  ;;  %v26_v25 = vld [vmem:[%s1304_s0 + $0x28] sm:$0xff] }
   0x7   :  { %573 = vmatmul.msk.bf16.vlgmr.msra.gmra.mxu0 %vm48_vm0, %v37_v8  ;;  %576 = vmatmul.msk.bf16.vlgmr.msra.gmra.mxu1 %vm48_vm0, %v40_v12  ;;  %v42_v23 = vpack.c.bf16 %v32_v21, %v31_v20  ;;  %v33_v26 = vld [vmem:[%s1304_s0 + $0x60] sm:$0xff]  ;;  %v34_v27 = vld [vmem:[%s1304_s0 + $0x68] sm:$0xff]  ;;  %v39_v28 = vpack.c.bf16 %v26_v25, %v25_v24 }
   0x8   :  { %325 = vmatpush.bf16.msrb.mxu0 %v317_v7  ;;  %604 = vmatmul.msk.bf16.vlgmr.msra.gmra.mxu3 %vm48_vm0, %v41_v16  ;;  %v43_v29 = vpack.c.bf16 %v34_v27, %v33_v26  ;;  %v780_v30 = vld [vmem:[%s1305_s3] ss:$0 sm:$0xff]  ;;  %v836_v51 = vld [vmem:[%s1305_s3 + $0x1] ss:$0 sm:$0xff] }
   0x9   :  { %662 = vmatpush.bf16.msrb.mxu2 %v317_v7 }
   0xa   :  { %580 = vmatmul.msk.bf16.vlgmr.msra.gmra.mxu2 %vm48_vm0, %v44_v17 }
  0x17   :  { %574 = vmatmul.msk.bf16.gmra.mxu0 %vm48_vm0, %v38_v22  ;;  %577 = vmatmul.msk.bf16.gmra.mxu1 %vm48_vm0, %v41_v16 }
  0x18   :  { %605 = vmatmul.msk.bf16.gmra.mxu3 %vm48_vm0, %v42_v23 }
  0x1a   :  { %601 = vmatmul.msk.bf16.vlgmr.msrb.gmra.mxu2 %vm48_vm0, %v38_v22 }
  0x27   :  { %575 = vmatmul.msk.bf16.gmra.mxu0 %vm48_vm0, %v39_v28  ;;  %578 = vmatmul.msk.bf16.gmra.mxu1 %vm48_vm0, %v42_v23 }
  0x28   :  { %606 = vmatmul.msk.bf16.gmra.mxu3 %vm48_vm0, %v43_v29 }
  0x2a   :  { %602 = vmatmul.msk.bf16.gmra.mxu2 %vm48_vm0, %v39_v28 }
  0x37   :  { %579 = vmatmul.msk.bf16.gmra.mxu1 %vm48_vm0, %v43_v29  ;;  %600 = vmatmul.msk.bf16.vlgmr.msrb.gmra.mxu0 %vm48_vm0, %v37_v8 }
  0x38   :  { %607 = vmatmul.msk.bf16.gmra.mxu3 %vm48_vm0, %v44_v17 }
  0x3a   :  { %603 = vmatmul.msk.bf16.gmra.mxu2 %vm48_vm0, %v40_v12 }
  0x84   :  { %v782_v31 = vpop.f32.mrf.mxu0  ;;  %v784_v32 = vpop.f32.mrf.mxu1 }
  0x85   :  { %v122_v33 = vpack.c.bf16 %v782_v31, %v782_v31  ;;  %v128_v34 = vpack.c.bf16 %v784_v32, %v784_v32  ;;  %v233_v35 = vmul.f32 %v780_v30, %v782_v31  ;;  %v239_v37 = vmul.f32 %v780_v30, %v784_v32 }
  0x87   :  { %139 = vst.msk [vmem:[%s1306_s4] sm:$0xf] %vm138_vm2, %v122_v33  ;;  %v249_v36 = vsel %vm156_vm1, %v233_v35, 0.0  ;;  %v267_v44 = vsel %vm156_vm1, %v239_v37, 0.0 }
  0x88   :  { %145 = vst.msk [vmem:[%s1306_s4 + $0x18] sm:$0xf] %vm138_vm2, %v128_v34  ;;  %250 = vadd.xlane.f32.xlu0 %v249_v36 }
  0x8b   :  { %v803_v38 = vpop.f32.mrf.mxu3 }
  0x8c   :  { %v375_v40 = vpack.c.bf16 %v803_v38, %v803_v38  ;;  %v807_v41 = vpop.f32.mrf.mxu0  ;;  %v809_v42 = vpop.f32.mrf.mxu1  ;;  %v488_v58 = vmul.f32 %v836_v51, %v803_v38 }
  0x8d   :  { %v117_v39 = vpop.f32.mrf.mxu2  ;;  %v123_v45 = vpack.c.bf16 %v807_v41, %v807_v41  ;;  %v129_v46 = vpack.c.bf16 %v809_v42, %v809_v42  ;;  %v240_v48 = vmul.f32 %v780_v30, %v809_v42  ;;  %v234_v3 = vmul.f32 %v780_v30, %v807_v41 }
  0x8e   :  { %v247_v43 = vmul.f32 %v780_v30, %v117_v39  ;;  %v136_v47 = vpack.c.bf16 %v117_v39, %v117_v39  ;;  %616 = vst.msk [vmem:[%s1306_s4 + $0x60] sm:$0xf] %vm138_vm2, %v375_v40  ;;  %v520_v1 = vsel %vm156_vm1, %v488_v58, 0.0 }
  0x8f   :  { %140 = vst.msk [vmem:[%s1306_s4 + $0x4] sm:$0xf] %vm138_vm2, %v123_v45  ;;  %v270_v50 = vsel %vm156_vm1, %v240_v48, 0.0  ;;  %v252_v14 = vsel %vm156_vm1, %v234_v3, 0.0 }
  0x90   :  { %v291_v49 = vsel %vm156_vm1, %v247_v43, 0.0  ;;  %146 = vst.msk [vmem:[%s1306_s4 + $0x1c] sm:$0xf] %vm138_vm2, %v129_v46  ;;  %271 = vadd.xlane.f32.xlu1 %v270_v50  ;;  %268 = vadd.xlane.f32.xlu0 %v267_v44 }
  0x91   :  { %292 = vadd.xlane.f32.xlu2 %v291_v49  ;;  %153 = vst.msk [vmem:[%s1306_s4 + $0x38] sm:$0xf] %vm138_vm2, %v136_v47 }
  0x93   :  { %v842_v52 = vpop.f32.mrf.mxu3 }
  0x94   :  { %v376_v54 = vpack.c.bf16 %v842_v52, %v842_v52  ;;  %v846_v55 = vpop.f32.mrf.mxu0  ;;  %v848_v56 = vpop.f32.mrf.mxu1  ;;  %v489_v57 = vmul.f32 %v836_v51, %v842_v52 }
  0x95   :  { %v119_v53 = vpop.f32.mrf.mxu2  ;;  %v124_v59 = vpack.c.bf16 %v846_v55, %v846_v55  ;;  %v130_v60 = vpack.c.bf16 %v848_v56, %v848_v56  ;;  %v241_v62 = vmul.f32 %v780_v30, %v848_v56  ;;  %v235_v2 = vmul.f32 %v780_v30, %v846_v55 }
  0x96   :  { %581 = vmatpush.xpose.msk.msrb.mxu1 %vm156_vm1, %v119_v53  ;;  %v137_v61 = vpack.c.bf16 %v119_v53, %v119_v53  ;;  %617 = vst.msk [vmem:[%s1306_s4 + $0x64] sm:$0xf] %vm138_vm2, %v376_v54  ;;  %v523_v63 = vsel %vm156_vm1, %v489_v57, 0.0  ;;  %v248_v17 = vmul.f32 %v780_v30, %v119_v53 }
  0x97   :  { %141 = vst.msk [vmem:[%s1306_s4 + $0x8] sm:$0xf] %vm138_vm2, %v124_v59  ;;  %v273_v0 = vsel %vm156_vm1, %v241_v62, 0.0  ;;  %v255_v13 = vsel %vm156_vm1, %v235_v2, 0.0 }
  0x98   :  { %147 = vst.msk [vmem:[%s1306_s4 + $0x20] sm:$0xf] %vm138_vm2, %v130_v60  ;;  %524 = vadd.xlane.f32.xlu1 %v523_v63  ;;  %521 = vadd.xlane.f32.xlu0 %v520_v1  ;;  %v294_v28 = vsel %vm156_vm1, %v248_v17, 0.0 }
  0x99   :  { %274 = vadd.xlane.f32.xlu2 %v273_v0  ;;  %154 = vst.msk [vmem:[%s1306_s4 + $0x3c] sm:$0xf] %vm138_vm2, %v137_v61 }
  0x9a   :  { %582 = vmatpush.xpose.msk.msrb.mxu1 %vm156_vm1, %v117_v39 }
  0x9b   :  { %v885_v4 = vpop.f32.mrf.mxu3 }
  0x9c   :  { %v377_v6 = vpack.c.bf16 %v885_v4, %v885_v4  ;;  %v891_v7 = vpop.f32.mrf.mxu0  ;;  %v893_v8 = vpop.f32.mrf.mxu1  ;;  %v490_v9 = vmul.f32 %v836_v51, %v885_v4 }
  0x9d   :  { %v887_v5 = vpop.f32.mrf.mxu2  ;;  %v125_v10 = vpack.c.bf16 %v891_v7, %v891_v7  ;;  %v131_v11 = vpack.c.bf16 %v893_v8, %v893_v8  ;;  %v236_v16 = vmul.f32 %v780_v30, %v891_v7  ;;  %v242_v60 = vmul.f32 %v780_v30, %v893_v8 }
  0x9e   :  { %v369_v12 = vpack.c.bf16 %v887_v5, %v887_v5  ;;  %618 = vst.msk [vmem:[%s1306_s4 + $0x68] sm:$0xf] %vm138_vm2, %v377_v6  ;;  %v526_v15 = vsel %vm156_vm1, %v490_v9, 0.0  ;;  %v482_v34 = vmul.f32 %v836_v51, %v887_v5 }
  0x9f   :  { %142 = vst.msk [vmem:[%s1306_s4 + $0xc] sm:$0xf] %vm138_vm2, %v125_v10  ;;  %v258_v23 = vsel %vm156_vm1, %v236_v16, 0.0  ;;  %v276_v3 = vsel %vm156_vm1, %v242_v60, 0.0 }
  0xa0   :  { %148 = vst.msk [vmem:[%s1306_s4 + $0x24] sm:$0xf] %vm138_vm2, %v131_v11  ;;  %256 = vadd.xlane.f32.xlu1 %v255_v13  ;;  %253 = vadd.xlane.f32.xlu0 %v252_v14  ;;  %v502_v48 = vsel %vm156_vm1, %v482_v34, 0.0 }
  0xa1   :  { %527 = vadd.xlane.f32.xlu2 %v526_v15  ;;  %610 = vst.msk [vmem:[%s1306_s4 + $0x48] sm:$0xf] %vm138_vm2, %v369_v12 }
  0xa3   :  { %v925_v18 = vpop.f32.mrf.mxu3 }
  0xa4   :  { %v378_v20 = vpack.c.bf16 %v925_v18, %v925_v18  ;;  %v931_v21 = vpop.f32.mrf.mxu0  ;;  %v933_v22 = vpop.f32.mrf.mxu1  ;;  %v491_v14 = vmul.f32 %v836_v51, %v925_v18 }
  0xa5   :  { %v927_v19 = vpop.f32.mrf.mxu2  ;;  %v126_v24 = vpack.c.bf16 %v931_v21, %v931_v21  ;;  %v132_v25 = vpack.c.bf16 %v933_v22, %v933_v22  ;;  %v237_v27 = vmul.f32 %v780_v30, %v931_v21  ;;  %v243_v50 = vmul.f32 %v780_v30, %v933_v22 }
  0xa6   :  { %v370_v26 = vpack.c.bf16 %v927_v19, %v927_v19  ;;  %619 = vst.msk [vmem:[%s1306_s4 + $0x6c] sm:$0xf] %vm138_vm2, %v378_v20  ;;  %v483_v33 = vmul.f32 %v836_v51, %v927_v19 }
  0xa7   :  { %143 = vst.msk [vmem:[%s1306_s4 + $0x10] sm:$0xf] %vm138_vm2, %v126_v24  ;;  %v261_v29 = vsel %vm156_vm1, %v237_v27, 0.0  ;;  %v279_v61 = vsel %vm156_vm1, %v243_v50, 0.0 }
  0xa8   :  { %149 = vst.msk [vmem:[%s1306_s4 + $0x28] sm:$0xf] %vm138_vm2, %v132_v25  ;;  %259 = vadd.xlane.f32.xlu1 %v258_v23  ;;  %295 = vadd.xlane.f32.xlu0 %v294_v28  ;;  %v505_v46 = vsel %vm156_vm1, %v483_v33, 0.0  ;;  %v529_v25 = vsel %vm156_vm1, %v491_v14, 0.0 }
  0xa9   :  { %262 = vadd.xlane.f32.xlu2 %v261_v29  ;;  %611 = vst.msk [vmem:[%s1306_s4 + $0x4c] sm:$0xf] %vm138_vm2, %v370_v26 }
  0xab   :  { %v966_v35 = vpop.f32.mrf.mxu3 }
  0xac   :  { %v379_v37 = vpack.c.bf16 %v966_v35, %v966_v35  ;;  %v972_v39 = vpop.f32.mrf.mxu1  ;;  %v978_v44 = vpop.f32.mrf.mxu0  ;;  %v492_v9 = vmul.f32 %v836_v51, %v966_v35 }
  0xad   :  { %v968_v36 = vpop.f32.mrf.mxu2  ;;  %v133_v45 = vpack.c.bf16 %v972_v39, %v972_v39  ;;  %v127_v47 = vpack.c.bf16 %v978_v44, %v978_v44  ;;  %v238_v53 = vmul.f32 %v780_v30, %v978_v44  ;;  %v244_v10 = vmul.f32 %v780_v30, %v972_v39 }
  0xae   :  { %v371_v40 = vpack.c.bf16 %v968_v36, %v968_v36  ;;  %v484_v43 = vmul.f32 %v836_v51, %v968_v36  ;;  %620 = vst.msk [vmem:[%s1306_s4 + $0x70] sm:$0xf] %vm138_vm2, %v379_v37  ;;  %v532_v23 = vsel %vm156_vm1, %v492_v9, 0.0 }
  0xaf   :  { %150 = vst.msk [vmem:[%s1306_s4 + $0x2c] sm:$0xf] %vm138_vm2, %v133_v45  ;;  %v264_v0 = vsel %vm156_vm1, %v238_v53, 0.0  ;;  %v282_v24 = vsel %vm156_vm1, %v244_v10, 0.0 }
  0xb0   :  { %v508_v49 = vsel %vm156_vm1, %v484_v43, 0.0  ;;  %612 = vst.msk [vmem:[%s1306_s4 + $0x50] sm:$0xf] %vm138_vm2, %v371_v40  ;;  %506 = vadd.xlane.f32.xlu1 %v505_v46  ;;  %503 = vadd.xlane.f32.xlu0 %v502_v48 }
  0xb1   :  { %509 = vadd.xlane.f32.xlu2 %v508_v49  ;;  %144 = vst.msk [vmem:[%s1306_s4 + $0x14] sm:$0xf] %vm138_vm2, %v127_v47 }
  0xb3   :  { %v1007_v54 = vpop.f32.mrf.mxu3 }
  0xb4   :  { %v380_v58 = vpack.c.bf16 %v1007_v54, %v1007_v54  ;;  %v112_v59 = vpop.f32.mrf.mxu1  ;;  %v1016_v62 = vpop.f32.mrf.mxu0  ;;  %v493_v53 = vmul.f32 %v836_v51, %v1007_v54 }
  0xb5   :  { %v1009_v57 = vpop.f32.mrf.mxu2  ;;  %v134_v63 = vpack.c.bf16 %v112_v59, %v112_v59  ;;  %v367_v1 = vpack.c.bf16 %v1016_v62, %v1016_v62  ;;  %v480_v26 = vmul.f32 %v836_v51, %v1016_v62  ;;  %v245_v47 = vmul.f32 %v780_v30, %v112_v59 }
  0xb6   :  { %v372_v2 = vpack.c.bf16 %v1009_v57, %v1009_v57  ;;  %621 = vst.msk [vmem:[%s1306_s4 + $0x74] sm:$0xf] %vm138_vm2, %v380_v58  ;;  %v485_v28 = vmul.f32 %v836_v51, %v1009_v57 }
  0xb7   :  { %151 = vst.msk [vmem:[%s1306_s4 + $0x30] sm:$0xf] %vm138_vm2, %v134_v63  ;;  %v496_v40 = vsel %vm156_vm1, %v480_v26, 0.0  ;;  %v285_v50 = vsel %vm156_vm1, %v245_v47, 0.0 }
  0xb8   :  { %280 = vadd.xlane.f32.xlu1 %v279_v61  ;;  %608 = vst.msk [vmem:[%s1306_s4 + $0x40] sm:$0xf] %vm138_vm2, %v367_v1  ;;  %277 = vadd.xlane.f32.xlu0 %v276_v3  ;;  %v511_v43 = vsel %vm156_vm1, %v485_v28, 0.0 }
  0xb9   :  { %265 = vadd.xlane.f32.xlu2 %v264_v0  ;;  %613 = vst.msk [vmem:[%s1306_s4 + $0x54] sm:$0xf] %vm138_vm2, %v372_v2 }
  0xbb   :  { %v362_v6 = vpop.f32.mrf.mxu3 }
  0xbc   :  { %v381_v12 = vpack.c.bf16 %v362_v6, %v362_v6  ;;  %v114_v13 = vpop.f32.mrf.mxu1  ;;  %v1048_v15 = vpop.f32.mrf.mxu0 }
  0xbd   :  { %v1044_v11 = vpop.f32.mrf.mxu2  ;;  %v135_v16 = vpack.c.bf16 %v114_v13, %v114_v13  ;;  %583 = vmatpush.xpose.msk.msrb.mxu1 %vm156_vm1, %v114_v13  ;;  %v368_v17 = vpack.c.bf16 %v1048_v15, %v1048_v15  ;;  %v481_v27 = vmul.f32 %v836_v51, %v1048_v15 }
  0xbe   :  { %v373_v20 = vpack.c.bf16 %v1044_v11, %v1044_v11  ;;  %622 = vst.msk [vmem:[%s1306_s4 + $0x78] sm:$0xf] %vm138_vm2, %v381_v12 }
  0xbf   :  { %152 = vst.msk [vmem:[%s1306_s4 + $0x34] sm:$0xf] %vm138_vm2, %v135_v16  ;;  %v499_v45 = vsel %vm156_vm1, %v481_v27, 0.0 }
  0xc0   :  { %533 = vadd.xlane.f32.xlu1 %v532_v23  ;;  %609 = vst.msk [vmem:[%s1306_s4 + $0x44] sm:$0xf] %vm138_vm2, %v368_v17  ;;  %530 = vadd.xlane.f32.xlu0 %v529_v25 }
  0xc1   :  { %283 = vadd.xlane.f32.xlu2 %v282_v24  ;;  %584 = vmatpush.xpose.msk.msrb.mxu1 %vm156_vm1, %v112_v59  ;;  %614 = vst.msk [vmem:[%s1306_s4 + $0x58] sm:$0xf] %vm138_vm2, %v373_v20 }
  0xc3   :  { %v364_v29 = vpop.f32.mrf.mxu3 }
  0xc4   :  { %v382_v34 = vpack.c.bf16 %v364_v29, %v364_v29  ;;  %625 = vmatpush.xpose.msk.msrb.mxu3 %vm156_vm1, %v364_v29 }
  0xc5   :  { %v344_v33 = vpop.f32.mrf.mxu2  ;;  %585 = vmatpush.xpose.msk.msrb.mxu1 %vm156_vm1, %v972_v39  ;;  %v486_v39 = vmul.f32 %v836_v51, %v1044_v11 }
  0xc6   :  { %v374_v37 = vpack.c.bf16 %v344_v33, %v344_v33  ;;  %623 = vst.msk [vmem:[%s1306_s4 + $0x7c] sm:$0xf] %vm138_vm2, %v382_v34  ;;  %v487_v46 = vmul.f32 %v836_v51, %v344_v33 }
  0xc7   :  { %v514_v48 = vsel %vm156_vm1, %v486_v39, 0.0 }
  0xc8   :  { %615 = vst.msk [vmem:[%s1306_s4 + $0x5c] sm:$0xf] %vm138_vm2, %v374_v37  ;;  %626 = vmatpush.xpose.msk.msrb.mxu3 %vm156_vm1, %v362_v6  ;;  %497 = vadd.xlane.f32.xlu1 %v496_v40  ;;  %v517_v49 = vsel %vm156_vm1, %v487_v46, 0.0 }
  0xc9   :  { %512 = vadd.xlane.f32.xlu0 %v511_v43  ;;  %500 = vadd.xlane.f32.xlu2 %v499_v45 }
  0xca   :  { %586 = vmatpush.xpose.msk.msrb.mxu1 %vm156_vm1, %v933_v22  ;;  %v246_v22 = vmul.f32 %v780_v30, %v114_v13  ;;  %v535_v30 = vsel %vm156_vm1, %v493_v53, 0.0 }
  0xcc   :  { %627 = vmatpush.xpose.msk.msrb.mxu3 %vm156_vm1, %v1007_v54 }
  0xce   :  { %587 = vmatpush.xpose.msk.msrb.mxu1 %vm156_vm1, %v893_v8  ;;  %v494_v8 = vmul.f32 %v836_v51, %v362_v6 }
  0xd0   :  { %628 = vmatpush.xpose.msk.msrb.mxu3 %vm156_vm1, %v966_v35  ;;  %515 = vadd.xlane.f32.xlu1 %v514_v48  ;;  %v288_v35 = vsel %vm156_vm1, %v246_v22, 0.0 }
  0xd1   :  { %286 = vadd.xlane.f32.xlu0 %v285_v50  ;;  %518 = vadd.xlane.f32.xlu2 %v517_v49 }
  0xd2   :  { %588 = vmatpush.xpose.msk.msrb.mxu1 %vm156_vm1, %v848_v56  ;;  %v538_v56 = vsel %vm156_vm1, %v494_v8, 0.0 }
  0xd4   :  { %629 = vmatpush.xpose.msk.msrb.mxu3 %vm156_vm1, %v925_v18  ;;  %v495_v18 = vmul.f32 %v836_v51, %v364_v29 }
  0xd6   :  { %589 = vmatpush.xpose.msk.msrb.mxu1 %vm156_vm1, %v809_v42  ;;  %v541_v42 = vsel %vm156_vm1, %v495_v18, 0.0 }
  0xd8   :  { %630 = vmatpush.xpose.msk.msrb.mxu3 %vm156_vm1, %v885_v4  ;;  %289 = vadd.xlane.f32.xlu1 %v288_v35 }
  0xd9   :  { %539 = vadd.xlane.f32.xlu0 %v538_v56  ;;  %536 = vadd.xlane.f32.xlu2 %v535_v30 }
  0xda   :  { %590 = vmatpush.xpose.msk.msrb.mxu1 %vm156_vm1, %v784_v32  ;;  %v155_v32 = vld [vmem:[%s1307_s2] sm:$0x1] }
  0xdc   :  { %631 = vmatpush.xpose.msk.msrb.mxu3 %vm156_vm1, %v842_v52 }
  0xde   :  { %591 = vmatpush.xpose.msk.msrb.mxu1 %vm156_vm1, %v978_v44 }
  0xe0   :  { %632 = vmatpush.xpose.msk.msrb.mxu3 %vm156_vm1, %v803_v38  ;;  %542 = vadd.xlane.f32.xlu1 %v541_v42 }
  0xe2   :  { %592 = vmatpush.xpose.msk.msrb.mxu1 %vm156_vm1, %v931_v21 }
  0xe4   :  { %633 = vmatpush.xpose.msk.msrb.mxu3 %vm156_vm1, %v344_v33 }
  0xe6   :  { %593 = vmatpush.xpose.msk.msrb.mxu1 %vm156_vm1, %v891_v7 }
  0xe8   :  { %634 = vmatpush.xpose.msk.msrb.mxu3 %vm156_vm1, %v1044_v11 }
  0xea   :  { %594 = vmatpush.xpose.msk.msrb.mxu1 %vm156_vm1, %v846_v55 }
  0xec   :  { %635 = vmatpush.xpose.msk.msrb.mxu3 %vm156_vm1, %v1009_v57 }
  0xee   :  { %595 = vmatpush.xpose.msk.msrb.mxu1 %vm156_vm1, %v807_v41 }
  0xf0   :  { %636 = vmatpush.xpose.msk.msrb.mxu3 %vm156_vm1, %v968_v36 }
  0xf2   :  { %596 = vmatpush.xpose.msk.msrb.mxu1 %vm156_vm1, %v782_v31  ;;  %v624_v31 = vld [vmem:[%s1307_s2 + $0x1] sm:$0x1] }
  0xf4   :  { %637 = vmatpush.xpose.msk.msrb.mxu3 %vm156_vm1, %v927_v19 }
  0xf5   :  { %597 = vmatmul.msk.f32.vlgmr.msrb.gmra.mxu1 %vm156_vm1, %v155_v32 }
  0xf8   :  { %638 = vmatpush.xpose.msk.msrb.mxu3 %vm156_vm1, %v887_v5 }
  0xfb   :  { %v251_v38 = vpop.xlane.xlu0 %250 }
  0xfc   :  { %298 = vst.msk [vmem:[%s1308_s6] sm:$0xff] %vm297_vm3, %v251_v38  ;;  %639 = vmatpush.xpose.msk.msrb.mxu3 %vm156_vm1, %v1048_v15 }
 0x100   :  { %640 = vmatpush.xpose.msk.msrb.mxu3 %vm156_vm1, %v1016_v62 }
 0x103   :  { %v272_v51 = vpop.xlane.xlu1 %271  ;;  %v269_v52 = vpop.xlane.xlu0 %268  ;;  %641 = vmatmul.msk.f32.vlgmr.msrb.gmra.mxu3 %vm156_vm1, %v624_v31 }
 0x104   :  { %v293_v41 = vpop.xlane.xlu2 %292  ;;  %305 = vst.msk [vmem:[%s1308_s6 + $0x38] sm:$0xff] %vm297_vm3, %v272_v51 }
 0x105   :  { %312 = vst.msk [vmem:[%s1308_s6 + $0x70] sm:$0xff] %vm297_vm3, %v293_v41 }
 0x106   :  { %304 = vst.msk [vmem:[%s1308_s6 + $0x30] sm:$0xff] %vm297_vm3, %v269_v52 }
 0x10b   :  { %v525_v55 = vpop.xlane.xlu1 %524  ;;  %v522_v5 = vpop.xlane.xlu0 %521 }
 0x10c   :  { %v275_v4 = vpop.xlane.xlu2 %274  ;;  %653 = vst.msk [vmem:[%s1308_s6 + $0xc8] sm:$0xff] %vm297_vm3, %v525_v55 }
 0x10d   :  { %306 = vst.msk [vmem:[%s1308_s6 + $0x40] sm:$0xff] %vm297_vm3, %v275_v4 }
 0x10e   :  { %652 = vst.msk [vmem:[%s1308_s6 + $0xc0] sm:$0xff] %vm297_vm3, %v522_v5 }
 0x113   :  { %v257_v19 = vpop.xlane.xlu1 %256  ;;  %v254_v21 = vpop.xlane.xlu0 %253 }
 0x114   :  { %v528_v7 = vpop.xlane.xlu2 %527  ;;  %299 = vst.msk [vmem:[%s1308_s6 + $0x8] sm:$0xff] %vm297_vm3, %v254_v21 }
 0x115   :  { %654 = vst.msk [vmem:[%s1308_s6 + $0xd0] sm:$0xff] %vm297_vm3, %v528_v7 }
 0x116   :  { %300 = vst.msk [vmem:[%s1308_s6 + $0x10] sm:$0xff] %vm297_vm3, %v257_v19 }
 0x11b   :  { %v260_v36 = vpop.xlane.xlu1 %259  ;;  %v296_v54 = vpop.xlane.xlu0 %295 }
 0x11c   :  { %v263_v44 = vpop.xlane.xlu2 %262  ;;  %301 = vst.msk [vmem:[%s1308_s6 + $0x18] sm:$0xff] %vm297_vm3, %v260_v36 }
 0x11d   :  { %313 = vst.msk [vmem:[%s1308_s6 + $0x78] sm:$0xff] %vm297_vm3, %v296_v54 }
 0x11e   :  { %302 = vst.msk [vmem:[%s1308_s6 + $0x20] sm:$0xff] %vm297_vm3, %v263_v44 }
 0x123   :  { %v507_v57 = vpop.xlane.xlu1 %506  ;;  %v504_v59 = vpop.xlane.xlu0 %503 }
 0x124   :  { %v510_v58 = vpop.xlane.xlu2 %509  ;;  %647 = vst.msk [vmem:[%s1308_s6 + $0x98] sm:$0xff] %vm297_vm3, %v507_v57 }
 0x125   :  { %646 = vst.msk [vmem:[%s1308_s6 + $0x90] sm:$0xff] %vm297_vm3, %v504_v59 }
 0x126   :  { %648 = vst.msk [vmem:[%s1308_s6 + $0xa0] sm:$0xff] %vm297_vm3, %v510_v58 }
 0x12b   :  { %v281_v60 = vpop.xlane.xlu1 %280  ;;  %v278_v62 = vpop.xlane.xlu0 %277 }
 0x12c   :  { %v266_v61 = vpop.xlane.xlu2 %265  ;;  %308 = vst.msk [vmem:[%s1308_s6 + $0x50] sm:$0xff] %vm297_vm3, %v281_v60 }
 0x12d   :  { %307 = vst.msk [vmem:[%s1308_s6 + $0x48] sm:$0xff] %vm297_vm3, %v278_v62 }
 0x12e   :  { %303 = vst.msk [vmem:[%s1308_s6 + $0x28] sm:$0xff] %vm297_vm3, %v266_v61 }
 0x133   :  { %v534_v63 = vpop.xlane.xlu1 %533  ;;  %v531_v1 = vpop.xlane.xlu0 %530 }
 0x134   :  { %v284_v0 = vpop.xlane.xlu2 %283  ;;  %656 = vst.msk [vmem:[%s1308_s6 + $0xe0] sm:$0xff] %vm297_vm3, %v534_v63 }
 0x135   :  { %655 = vst.msk [vmem:[%s1308_s6 + $0xd8] sm:$0xff] %vm297_vm3, %v531_v1 }
 0x136   :  { %309 = vst.msk [vmem:[%s1308_s6 + $0x58] sm:$0xff] %vm297_vm3, %v284_v0 }
 0x13b   :  { %v498_v2 = vpop.xlane.xlu1 %497 }
 0x13c   :  { %v513_v3 = vpop.xlane.xlu0 %512  ;;  %644 = vst.msk [vmem:[%s1308_s6 + $0x80] sm:$0xff] %vm297_vm3, %v498_v2  ;;  %v501_v6 = vpop.xlane.xlu2 %500 }
 0x13d   :  { %649 = vst.msk [vmem:[%s1308_s6 + $0xa8] sm:$0xff] %vm297_vm3, %v513_v3 }
 0x13e   :  { %645 = vst.msk [vmem:[%s1308_s6 + $0x88] sm:$0xff] %vm297_vm3, %v501_v6 }
 0x143   :  { %v516_v9 = vpop.xlane.xlu1 %515 }
 0x144   :  { %v287_v10 = vpop.xlane.xlu0 %286  ;;  %650 = vst.msk [vmem:[%s1308_s6 + $0xb0] sm:$0xff] %vm297_vm3, %v516_v9  ;;  %v519_v11 = vpop.xlane.xlu2 %518 }
 0x145   :  { %310 = vst.msk [vmem:[%s1308_s6 + $0x60] sm:$0xff] %vm297_vm3, %v287_v10 }
 0x146   :  { %651 = vst.msk [vmem:[%s1308_s6 + $0xb8] sm:$0xff] %vm297_vm3, %v519_v11 }
 0x14b   :  { %v290_v12 = vpop.xlane.xlu1 %289 }
 0x14c   :  { %v540_v13 = vpop.xlane.xlu0 %539  ;;  %311 = vst.msk [vmem:[%s1308_s6 + $0x68] sm:$0xff] %vm297_vm3, %v290_v12  ;;  %v537_v14 = vpop.xlane.xlu2 %536 }
 0x14d   :  { %658 = vst.msk [vmem:[%s1308_s6 + $0xf0] sm:$0xff] %vm297_vm3, %v540_v13 }
 0x14e   :  { %657 = vst.msk [vmem:[%s1308_s6 + $0xe8] sm:$0xff] %vm297_vm3, %v537_v14 }
 0x153   :  { %v543_v15 = vpop.xlane.xlu1 %542 }
 0x154   :  { %659 = vst.msk [vmem:[%s1308_s6 + $0xf8] sm:$0xff] %vm297_vm3, %v543_v15 }
 0x172   :  { %v225_v16 = vpop.f32.mrf.mxu1 }
 0x173   :  { %228 = vst [vmem:[%s1309_s5] sm:$0x1] %v225_v16 }
 0x186   :  { %v470_v17 = vpop.f32.mrf.mxu3 }
 0x187   :  { %642 = vst [vmem:[%s1309_s5 + $0x1] sm:$0x1] %v470_v17 }

// kernel: gat_forward.3
= control target key start
LH: loop header
LB: loop body
LE: loop exit
PB: predicated region body
PF: predicated region fallthrough
CT: control target
= control target key end

     0   :  { %vm39_vm0 = vcmask 7168   ;;  %v3126_v0 = vmov -1e+30   ;;  %v3127_v1 = vmov 0.0   ;;  %vm104_vm1 = vcmask 261120   ;;  %s4817_s0 = inlined_call_operand.<no memory space> [shape: s32[1,1], index: 0, kind: input, shape index: {}]   ;;  %s4818_s1 = inlined_call_operand.vmem [shape: bf16[2,128,32], index: 1, kind: input, shape index: {}]   ;;  %s4819_s2 = inlined_call_operand.vmem [shape: f32[2,1,128], index: 2, kind: input, shape index: {}]   ;;  %s4820_s3 = inlined_call_operand.vmem [shape: f32[2,128,1], index: 3, kind: input, shape index: {}]   ;;  %s4821_s4 = inlined_call_operand.vmem [shape: bf16[128,128], index: 4, kind: input, shape index: {}]   ;;  %s4822_s5 = inlined_call_operand.vmem [shape: f32[1,32], index: 5, kind: input, shape index: {}]   ;;  %s4823_s6 = inlined_call_operand.vmem [shape: f32[1,32], index: 6, kind: input, shape index: {}]   ;;  %s4824_s7 = inlined_call_operand.vmem [shape: f32[1,32], index: 7, kind: input, shape index: {}]   ;;  %s4825_s8 = inlined_call_operand.vmem [shape: f32[32,8], index: 8, kind: input, shape index: {}]   ;;  %s4826_s9 = inlined_call_operand.vmem [shape: f32[1,8], index: 9, kind: input, shape index: {}]   ;;  %s4827_s10 = inlined_call_operand.vmem [shape: f32[128,8], index: 10, kind: output, shape index: {}]  }
   0x1   :  { %40 = vst.msk [vmem:[#allocation2] sm:$0xff] %vm39_vm0, %v3126_v0  ;;  %p2700_p0 = scmp.le.s32.totalorder %s4817_s0, 0 }
   0x2   :  { %41 = vst.msk [vmem:[#allocation2 + $0x8] sm:$0xff] %vm39_vm0, %v3126_v0 }
   0x3   :  { %42 = vst.msk [vmem:[#allocation2 + $0x10] sm:$0xff] %vm39_vm0, %v3126_v0 }
   0x4   :  { %43 = vst.msk [vmem:[#allocation2 + $0x18] sm:$0xff] %vm39_vm0, %v3126_v0 }
   0x5   :  { %44 = vst.msk [vmem:[#allocation2 + $0x20] sm:$0xff] %vm39_vm0, %v3126_v0 }
   0x6   :  { %45 = vst.msk [vmem:[#allocation2 + $0x28] sm:$0xff] %vm39_vm0, %v3126_v0 }
   0x7   :  { %46 = vst.msk [vmem:[#allocation2 + $0x30] sm:$0xff] %vm39_vm0, %v3126_v0 }
   0x8   :  { %47 = vst.msk [vmem:[#allocation2 + $0x38] sm:$0xff] %vm39_vm0, %v3126_v0 }
   0x9   :  { %48 = vst.msk [vmem:[#allocation2 + $0x40] sm:$0xff] %vm39_vm0, %v3126_v0 }
   0xa   :  { %49 = vst.msk [vmem:[#allocation2 + $0x48] sm:$0xff] %vm39_vm0, %v3126_v0 }
   0xb   :  { %50 = vst.msk [vmem:[#allocation2 + $0x50] sm:$0xff] %vm39_vm0, %v3126_v0 }
   0xc   :  { %51 = vst.msk [vmem:[#allocation2 + $0x58] sm:$0xff] %vm39_vm0, %v3126_v0 }
   0xd   :  { %52 = vst.msk [vmem:[#allocation2 + $0x60] sm:$0xff] %vm39_vm0, %v3126_v0 }
   0xe   :  { %53 = vst.msk [vmem:[#allocation2 + $0x68] sm:$0xff] %vm39_vm0, %v3126_v0 }
   0xf   :  { %54 = vst.msk [vmem:[#allocation2 + $0x70] sm:$0xff] %vm39_vm0, %v3126_v0 }
  0x10   :  { %55 = vst.msk [vmem:[#allocation2 + $0x78] sm:$0xff] %vm39_vm0, %v3126_v0 }
  0x11   :  { %56 = vst.msk [vmem:[#allocation2 + $0x80] sm:$0xff] %vm39_vm0, %v3126_v0 }
  0x12   :  { %57 = vst.msk [vmem:[#allocation2 + $0x88] sm:$0xff] %vm39_vm0, %v3126_v0 }
  0x13   :  { %58 = vst.msk [vmem:[#allocation2 + $0x90] sm:$0xff] %vm39_vm0, %v3126_v0 }
  0x14   :  { %59 = vst.msk [vmem:[#allocation2 + $0x98] sm:$0xff] %vm39_vm0, %v3126_v0 }
  0x15   :  { %60 = vst.msk [vmem:[#allocation2 + $0xa0] sm:$0xff] %vm39_vm0, %v3126_v0 }
  0x16   :  { %61 = vst.msk [vmem:[#allocation2 + $0xa8] sm:$0xff] %vm39_vm0, %v3126_v0 }
  0x17   :  { %62 = vst.msk [vmem:[#allocation2 + $0xb0] sm:$0xff] %vm39_vm0, %v3126_v0 }
  0x18   :  { %63 = vst.msk [vmem:[#allocation2 + $0xb8] sm:$0xff] %vm39_vm0, %v3126_v0 }
  0x19   :  { %64 = vst.msk [vmem:[#allocation2 + $0xc0] sm:$0xff] %vm39_vm0, %v3126_v0 }
  0x1a   :  { %65 = vst.msk [vmem:[#allocation2 + $0xc8] sm:$0xff] %vm39_vm0, %v3126_v0 }
  0x1b   :  { %66 = vst.msk [vmem:[#allocation2 + $0xd0] sm:$0xff] %vm39_vm0, %v3126_v0 }
  0x1c   :  { %67 = vst.msk [vmem:[#allocation2 + $0xd8] sm:$0xff] %vm39_vm0, %v3126_v0 }
  0x1d   :  { %68 = vst.msk [vmem:[#allocation2 + $0xe0] sm:$0xff] %vm39_vm0, %v3126_v0 }
  0x1e   :  { %69 = vst.msk [vmem:[#allocation2 + $0xe8] sm:$0xff] %vm39_vm0, %v3126_v0 }
  0x1f   :  { %70 = vst.msk [vmem:[#allocation2 + $0xf0] sm:$0xff] %vm39_vm0, %v3126_v0 }
  0x20   :  { %71 = vst.msk [vmem:[#allocation2 + $0xf8] sm:$0xff] %vm39_vm0, %v3126_v0 }
  0x21   :  { %72 = vst.msk [vmem:[#allocation3] sm:$0xff] %vm39_vm0, %v3127_v1 }
  0x22   :  { %73 = vst.msk [vmem:[#allocation3 + $0x8] sm:$0xff] %vm39_vm0, %v3127_v1 }
  0x23   :  { %74 = vst.msk [vmem:[#allocation3 + $0x10] sm:$0xff] %vm39_vm0, %v3127_v1 }
  0x24   :  { %75 = vst.msk [vmem:[#allocation3 + $0x18] sm:$0xff] %vm39_vm0, %v3127_v1 }
  0x25   :  { %76 = vst.msk [vmem:[#allocation3 + $0x20] sm:$0xff] %vm39_vm0, %v3127_v1 }
  0x26   :  { %77 = vst.msk [vmem:[#allocation3 + $0x28] sm:$0xff] %vm39_vm0, %v3127_v1 }
  0x27   :  { %78 = vst.msk [vmem:[#allocation3 + $0x30] sm:$0xff] %vm39_vm0, %v3127_v1 }
  0x28   :  { %79 = vst.msk [vmem:[#allocation3 + $0x38] sm:$0xff] %vm39_vm0, %v3127_v1 }
  0x29   :  { %80 = vst.msk [vmem:[#allocation3 + $0x40] sm:$0xff] %vm39_vm0, %v3127_v1 }
  0x2a   :  { %81 = vst.msk [vmem:[#allocation3 + $0x48] sm:$0xff] %vm39_vm0, %v3127_v1 }
  0x2b   :  { %82 = vst.msk [vmem:[#allocation3 + $0x50] sm:$0xff] %vm39_vm0, %v3127_v1 }
  0x2c   :  { %83 = vst.msk [vmem:[#allocation3 + $0x58] sm:$0xff] %vm39_vm0, %v3127_v1 }
  0x2d   :  { %84 = vst.msk [vmem:[#allocation3 + $0x60] sm:$0xff] %vm39_vm0, %v3127_v1 }
  0x2e   :  { %85 = vst.msk [vmem:[#allocation3 + $0x68] sm:$0xff] %vm39_vm0, %v3127_v1 }
  0x2f   :  { %86 = vst.msk [vmem:[#allocation3 + $0x70] sm:$0xff] %vm39_vm0, %v3127_v1 }
  0x30   :  { %87 = vst.msk [vmem:[#allocation3 + $0x78] sm:$0xff] %vm39_vm0, %v3127_v1 }
  0x31   :  { %88 = vst.msk [vmem:[#allocation3 + $0x80] sm:$0xff] %vm39_vm0, %v3127_v1 }
  0x32   :  { %89 = vst.msk [vmem:[#allocation3 + $0x88] sm:$0xff] %vm39_vm0, %v3127_v1 }
  0x33   :  { %90 = vst.msk [vmem:[#allocation3 + $0x90] sm:$0xff] %vm39_vm0, %v3127_v1 }
  0x34   :  { %91 = vst.msk [vmem:[#allocation3 + $0x98] sm:$0xff] %vm39_vm0, %v3127_v1 }
  0x35   :  { %92 = vst.msk [vmem:[#allocation3 + $0xa0] sm:$0xff] %vm39_vm0, %v3127_v1 }
  0x36   :  { %93 = vst.msk [vmem:[#allocation3 + $0xa8] sm:$0xff] %vm39_vm0, %v3127_v1 }
  0x37   :  { %94 = vst.msk [vmem:[#allocation3 + $0xb0] sm:$0xff] %vm39_vm0, %v3127_v1 }
  0x38   :  { %95 = vst.msk [vmem:[#allocation3 + $0xb8] sm:$0xff] %vm39_vm0, %v3127_v1 }
  0x39   :  { %96 = vst.msk [vmem:[#allocation3 + $0xc0] sm:$0xff] %vm39_vm0, %v3127_v1 }
  0x3a   :  { %97 = vst.msk [vmem:[#allocation3 + $0xc8] sm:$0xff] %vm39_vm0, %v3127_v1 }
  0x3b   :  { %98 = vst.msk [vmem:[#allocation3 + $0xd0] sm:$0xff] %vm39_vm0, %v3127_v1 }
  0x3c   :  { %99 = vst.msk [vmem:[#allocation3 + $0xd8] sm:$0xff] %vm39_vm0, %v3127_v1 }
  0x3d   :  { %100 = vst.msk [vmem:[#allocation3 + $0xe0] sm:$0xff] %vm39_vm0, %v3127_v1 }
  0x3e   :  { %101 = vst.msk [vmem:[#allocation3 + $0xe8] sm:$0xff] %vm39_vm0, %v3127_v1 }
  0x3f   :  { %102 = vst.msk [vmem:[#allocation3 + $0xf0] sm:$0xff] %vm39_vm0, %v3127_v1 }
  0x40   :  { %103 = vst.msk [vmem:[#allocation3 + $0xf8] sm:$0xff] %vm39_vm0, %v3127_v1 }
  0x41   :  { %105 = vst.msk [vmem:[#allocation4] sm:$0xff] %vm104_vm1, %v3127_v1 }
  0x42   :  { %106 = vst.msk [vmem:[#allocation4 + $0x8] sm:$0xff] %vm104_vm1, %v3127_v1 }
  0x43   :  { %107 = vst.msk [vmem:[#allocation4 + $0x10] sm:$0xff] %vm104_vm1, %v3127_v1 }
  0x44   :  { %108 = vst.msk [vmem:[#allocation4 + $0x18] sm:$0xff] %vm104_vm1, %v3127_v1 }
  0x45   :  { %109 = vst.msk [vmem:[#allocation4 + $0x20] sm:$0xff] %vm104_vm1, %v3127_v1 }
  0x46   :  { %110 = vst.msk [vmem:[#allocation4 + $0x28] sm:$0xff] %vm104_vm1, %v3127_v1 }
  0x47   :  { %111 = vst.msk [vmem:[#allocation4 + $0x30] sm:$0xff] %vm104_vm1, %v3127_v1 }
  0x48   :  { %112 = vst.msk [vmem:[#allocation4 + $0x38] sm:$0xff] %vm104_vm1, %v3127_v1 }
  0x49   :  { %113 = vst.msk [vmem:[#allocation4 + $0x40] sm:$0xff] %vm104_vm1, %v3127_v1 }
  0x4a   :  { %114 = vst.msk [vmem:[#allocation4 + $0x48] sm:$0xff] %vm104_vm1, %v3127_v1 }
  0x4b   :  { %115 = vst.msk [vmem:[#allocation4 + $0x50] sm:$0xff] %vm104_vm1, %v3127_v1 }
  0x4c   :  { %116 = vst.msk [vmem:[#allocation4 + $0x58] sm:$0xff] %vm104_vm1, %v3127_v1 }
  0x4d   :  { %117 = vst.msk [vmem:[#allocation4 + $0x60] sm:$0xff] %vm104_vm1, %v3127_v1 }
  0x4e   :  { %118 = vst.msk [vmem:[#allocation4 + $0x68] sm:$0xff] %vm104_vm1, %v3127_v1 }
  0x4f   :  { %119 = vst.msk [vmem:[#allocation4 + $0x70] sm:$0xff] %vm104_vm1, %v3127_v1 }
  0x50   :  { %120 = vst.msk [vmem:[#allocation4 + $0x78] sm:$0xff] %vm104_vm1, %v3127_v1 }
  0x51   :  { %121 = vst.msk [vmem:[#allocation4 + $0x80] sm:$0xff] %vm104_vm1, %v3127_v1 }
  0x52   :  { %122 = vst.msk [vmem:[#allocation4 + $0x88] sm:$0xff] %vm104_vm1, %v3127_v1 }
  0x53   :  { %123 = vst.msk [vmem:[#allocation4 + $0x90] sm:$0xff] %vm104_vm1, %v3127_v1 }
  0x54   :  { %124 = vst.msk [vmem:[#allocation4 + $0x98] sm:$0xff] %vm104_vm1, %v3127_v1 }
  0x55   :  { %125 = vst.msk [vmem:[#allocation4 + $0xa0] sm:$0xff] %vm104_vm1, %v3127_v1 }
  0x56   :  { %126 = vst.msk [vmem:[#allocation4 + $0xa8] sm:$0xff] %vm104_vm1, %v3127_v1 }
  0x57   :  { %127 = vst.msk [vmem:[#allocation4 + $0xb0] sm:$0xff] %vm104_vm1, %v3127_v1 }
  0x58   :  { %128 = vst.msk [vmem:[#allocation4 + $0xb8] sm:$0xff] %vm104_vm1, %v3127_v1 }
  0x59   :  { %129 = vst.msk [vmem:[#allocation4 + $0xc0] sm:$0xff] %vm104_vm1, %v3127_v1 }
  0x5a   :  { %130 = vst.msk [vmem:[#allocation4 + $0xc8] sm:$0xff] %vm104_vm1, %v3127_v1 }
  0x5b   :  { %131 = vst.msk [vmem:[#allocation4 + $0xd0] sm:$0xff] %vm104_vm1, %v3127_v1 }
  0x5c   :  { %132 = vst.msk [vmem:[#allocation4 + $0xd8] sm:$0xff] %vm104_vm1, %v3127_v1  ;;  %144 = sbr.rel (%p2700_p0) target bundleno = 1026 (0x402), region = 45 }
  0x5d   :  { %133 = vst.msk [vmem:[#allocation4 + $0xe0] sm:$0xff] %vm104_vm1, %v3127_v1 }
  0x5e   :  { %134 = vst.msk [vmem:[#allocation4 + $0xe8] sm:$0xff] %vm104_vm1, %v3127_v1 }
  0x5f   :  { %135 = vst.msk [vmem:[#allocation4 + $0xf0] sm:$0xff] %vm104_vm1, %v3127_v1 }
  0x60   :  { %136 = vst.msk [vmem:[#allocation4 + $0xf8] sm:$0xff] %vm104_vm1, %v3127_v1 }
  0x61   :  { %v165_v2 = vld [vmem:[%s4820_s3 + $0x20] sm:$0xff]  ;;  %v163_v3 = vld [vmem:[%s4820_s3 + $0x10] sm:$0xff]  ;;  %v3128_v5 = vmov 0   ;;  %v166_v6 = vld [vmem:[%s4820_s3 + $0x28] sm:$0xff] }
  0x62   :  { %v161_v4 = vld [vmem:[%s4820_s3] sm:$0xff]  ;;  %2890 = vset.pattern.permute.xlu2 %v3128_v5  ;;  %2889 = vset.pattern.permute.xlu1 %v3128_v5  ;;  %v164_v7 = vld [vmem:[%s4820_s3 + $0x18] sm:$0xff]  ;;  %v162_v8 = vld [vmem:[%s4820_s3 + $0x8] sm:$0xff] }
  0x63   :  { %2888 = vset.pattern.permute.xlu0 %v3128_v5  ;;  %200 = vperm.xlu2 %2890, %v165_v2   ;;  %v169_v9 = vld [vmem:[%s4820_s3 + $0x40] sm:$0xff]  ;;  %v168_v10 = vld [vmem:[%s4820_s3 + $0x38] sm:$0xff]  ;;  %v167_v11 = vld [vmem:[%s4820_s3 + $0x30] sm:$0xff] }
  0x64   :  { %190 = vperm.xlu1 %2889, %v163_v3   ;;  %180 = vperm.xlu0 %2888, %v161_v4   ;;  %v172_v12 = vld [vmem:[%s4820_s3 + $0x58] sm:$0xff]  ;;  %v171_v13 = vld [vmem:[%s4820_s3 + $0x50] sm:$0xff]  ;;  %v170_v14 = vld [vmem:[%s4820_s3 + $0x48] sm:$0xff] }
  0x65   :  { %v175_v15 = vld [vmem:[%s4820_s3 + $0x70] sm:$0xff]  ;;  %v174_v16 = vld [vmem:[%s4820_s3 + $0x68] sm:$0xff]  ;;  %v173_v17 = vld [vmem:[%s4820_s3 + $0x60] sm:$0xff] }
  0x66   :  { %v2735_v18 = vld [vmem:[%s4820_s3 + $0x90] sm:$0xff]  ;;  %v2734_v19 = vld [vmem:[%s4820_s3 + $0x88] sm:$0xff]  ;;  %v176_v20 = vld [vmem:[%s4820_s3 + $0x78] sm:$0xff] }
  0x67   :  { %v2733_v21 = vld [vmem:[%s4820_s3 + $0x80] sm:$0xff]  ;;  %v3414_v24 = vld [vmem:[%s4821_s4 + $0x8] sm:$0xff]   ;;  %v3429_v38 = vld [vmem:[%s4821_s4 + $0x10] sm:$0xff]  }
  0x68   :  { %v3409_v22 = vld [vmem:[%s4819_s2] ss:$0 sm:$0xff]  ;;  %v4842_v31 = vunpack.c.l.bf16 %v3414_v24  ;;  %v4836_v43 = vunpack.c.l.bf16 %v3429_v38  ;;  %v3456_v54 = vld [vmem:[%s4821_s4 + $0x18] sm:$0xff]   ;;  %v4841_v59 = vunpack.c.h.bf16 %v3414_v24 }
  0x69   :  { %v3419_v25 = vld [vmem:[%s4821_s4] sm:$0xff]   ;;  %v4838_v61 = vunpack.c.l.bf16 %v3456_v54  ;;  %v4833_v63 = vunpack.c.h.bf16 %v3456_v54 }
  0x6a   :  { %v4843_v32 = vunpack.c.l.bf16 %v3419_v25  ;;  %v4839_v47 = vunpack.c.h.bf16 %v3419_v25 }
  0x6b   :  { %205 = vperm.xlu2 %2890, %v166_v6  }
  0x6c   :  { %195 = vperm.xlu1 %2889, %v164_v7   ;;  %185 = vperm.xlu0 %2888, %v162_v8  }
  0x73   :  { %220 = vperm.xlu2 %2890, %v169_v9  }
  0x74   :  { %215 = vperm.xlu1 %2889, %v168_v10   ;;  %210 = vperm.xlu0 %2888, %v167_v11  }
  0x7b   :  { %235 = vperm.xlu2 %2890, %v172_v12  }
  0x7c   :  { %230 = vperm.xlu1 %2889, %v171_v13   ;;  %225 = vperm.xlu0 %2888, %v170_v14   ;;  %v3486_v13 = vld [vmem:[%s4821_s4 + $0x20] sm:$0xff]   ;;  %v4840_v14 = vunpack.c.h.bf16 %v3429_v38 }
  0x83   :  { %250 = vperm.xlu2 %2890, %v175_v15   ;;  %v3492_v15 = vld [vmem:[%s4821_s4 + $0x28] sm:$0xff]  }
  0x84   :  { %245 = vperm.xlu1 %2889, %v174_v16   ;;  %240 = vperm.xlu0 %2888, %v173_v17   ;;  %v4835_v17 = vunpack.c.h.bf16 %v3486_v13 }
  0x8b   :  { %1007 = vperm.xlu2 %2890, %v2735_v18  }
  0x8c   :  { %1002 = vperm.xlu1 %2889, %v2734_v19   ;;  %255 = vperm.xlu0 %2888, %v176_v20   ;;  %v4830_v19 = vunpack.c.l.bf16 %v3492_v15 }
  0x94   :  { %997 = vperm.xlu0 %2888, %v2733_v21  }
  0xbd   :  { %v201_v23 = vpop.permute.xlu2 %200 }
  0xbe   :  { %v265_v28 = vadd.f32 %v3409_v22, %v201_v23 }
  0xc0   :  { %v297_v35 = vmul.f32 0.2, %v265_v28  ;;  %vm281_vm4 = vcmp.gt.f32.partialorder %v265_v28, 0.0 }
  0xc2   :  { %v313_v45 = vsel %vm281_vm4, %v265_v28, %v297_v35 }
  0xc3   :  { %v3447_v50 = vadd.f32 %v4836_v43, %v313_v45 }
  0xc5   :  { %v206_v48 = vpop.permute.xlu2 %205 }
  0xc6   :  { %v266_v60 = vadd.f32 %v3409_v22, %v206_v48 }
  0xc8   :  { %v298_v5 = vmul.f32 0.2, %v266_v60  ;;  %vm282_vm9 = vcmp.gt.f32.partialorder %v266_v60, 0.0 }
  0xca   :  { %v314_v18 = vsel %vm282_vm9, %v266_v60, %v298_v5 }
  0xcd   :  { %v221_v2 = vpop.permute.xlu2 %220 }
  0xce   :  { %v269_v16 = vadd.f32 %v3409_v22, %v221_v2 }
  0xd0   :  { %vm285_vm12 = vcmp.gt.f32.partialorder %v269_v16, 0.0 }
  0xd6   :  { %v191_v26 = vpop.permute.xlu1 %190  ;;  %v181_v27 = vpop.permute.xlu0 %180 }
  0xd7   :  { %v263_v29 = vadd.f32 %v3409_v22, %v191_v26  ;;  %v261_v30 = vadd.f32 %v3409_v22, %v181_v27  ;;  %v301_v27 = vmul.f32 0.2, %v269_v16 }
  0xd9   :  { %v295_v33 = vmul.f32 0.2, %v263_v29  ;;  %v293_v34 = vmul.f32 0.2, %v261_v30  ;;  %vm279_vm2 = vcmp.gt.f32.partialorder %v263_v29, 0.0  ;;  %vm277_vm3 = vcmp.gt.f32.partialorder %v261_v30, 0.0 }
  0xdb   :  { %v311_v36 = vsel %vm279_vm2, %v263_v29, %v295_v33  ;;  %v309_v37 = vsel %vm277_vm3, %v261_v30, %v293_v34  ;;  %v3503_v29 = vadd.f32 %v4840_v14, %v314_v18  ;;  %v236_v33 = vpop.permute.xlu2 %235  ;;  %v3512_v34 = vld [vmem:[%s4821_s4 + $0x30] sm:$0xff]  }
  0xdc   :  { %v3433_v39 = vadd.f32 %v4842_v31, %v311_v36  ;;  %v3437_v40 = vadd.f32 %v4843_v32, %v309_v37  ;;  %v4832_v45 = vunpack.c.l.bf16 %v3512_v34  ;;  %v4828_v48 = vunpack.c.h.bf16 %v3512_v34 }
  0xde   :  { %v196_v41 = vpop.permute.xlu1 %195  ;;  %v186_v42 = vpop.permute.xlu0 %185  ;;  %377 = vmax.xlane.f32.xlu0 %v3433_v39  ;;  %373 = vmax.xlane.f32.xlu1 %v3437_v40 }
  0xdf   :  { %v262_v44 = vadd.f32 %v3409_v22, %v186_v42  ;;  %v264_v46 = vadd.f32 %v3409_v22, %v196_v41  ;;  %v4837_v42 = vunpack.c.l.bf16 %v3486_v13 }
  0xe1   :  { %v294_v49 = vmul.f32 0.2, %v262_v44  ;;  %vm278_vm5 = vcmp.gt.f32.partialorder %v262_v44, 0.0  ;;  %v296_v52 = vmul.f32 0.2, %v264_v46  ;;  %vm280_vm6 = vcmp.gt.f32.partialorder %v264_v46, 0.0 }
  0xe3   :  { %v310_v51 = vsel %vm278_vm5, %v262_v44, %v294_v49  ;;  %v312_v62 = vsel %vm280_vm6, %v264_v46, %v296_v52  ;;  %v272_v44 = vadd.f32 %v3409_v22, %v236_v33  ;;  %v317_v46 = vsel %vm285_vm12, %v269_v16, %v301_v27  ;;  %v251_v2 = vpop.permute.xlu2 %250  ;;  %v2740_v27 = vld [vmem:[%s4820_s3 + $0xb8] sm:$0xff]  ;;  %v2739_v33 = vld [vmem:[%s4820_s3 + $0xb0] sm:$0xff] }
  0xe4   :  { %v3451_v53 = vadd.f32 %v4839_v47, %v310_v51  ;;  %v3472_v7 = vadd.f32 %v4841_v59, %v312_v62  ;;  %v275_v5 = vadd.f32 %v3409_v22, %v251_v2 }
  0xe5   :  { %v304_v60 = vmul.f32 0.2, %v272_v44  ;;  %vm288_vm15 = vcmp.gt.f32.partialorder %v272_v44, 0.0 }
  0xe6   :  { %v216_v55 = vpop.permute.xlu1 %215  ;;  %v211_v56 = vpop.permute.xlu0 %210  ;;  %375 = vmax.xlane.f32.xlu2 %v3451_v53  ;;  %381 = vmax.xlane.f32.xlu1 %v3447_v50  ;;  %v307_v18 = vmul.f32 0.2, %v275_v5  ;;  %vm291_vm3 = vcmp.gt.f32.partialorder %v275_v5, 0.0 }
  0xe7   :  { %v268_v57 = vadd.f32 %v3409_v22, %v216_v55  ;;  %v267_v58 = vadd.f32 %v3409_v22, %v211_v56 }
  0xe9   :  { %v300_v0 = vmul.f32 0.2, %v268_v57  ;;  %v299_v1 = vmul.f32 0.2, %v267_v58  ;;  %vm283_vm7 = vcmp.gt.f32.partialorder %v267_v58, 0.0  ;;  %vm284_vm8 = vcmp.gt.f32.partialorder %v268_v57, 0.0 }
  0xeb   :  { %v315_v3 = vsel %vm283_vm7, %v267_v58, %v299_v1  ;;  %v316_v4 = vsel %vm284_vm8, %v268_v57, %v300_v0  ;;  %v3529_v57 = vadd.f32 %v4837_v42, %v317_v46  ;;  %v3542_v1 = vld [vmem:[%s4821_s4 + $0x38] sm:$0xff]   ;;  %v3584_v46 = vpop.permute.xlu2 %1007 }
  0xec   :  { %v3468_v6 = vadd.f32 %v4838_v61, %v315_v3  ;;  %v3476_v8 = vadd.f32 %v4833_v63, %v316_v4  ;;  %v4829_v3 = vunpack.c.h.bf16 %v3542_v1  ;;  %v4834_v4 = vunpack.c.h.bf16 %v3492_v15 }
  0xee   :  { %v231_v9 = vpop.permute.xlu1 %230  ;;  %v226_v10 = vpop.permute.xlu0 %225  ;;  %385 = vmax.xlane.f32.xlu0 %v3468_v6  ;;  %379 = vmax.xlane.f32.xlu2 %v3472_v7 }
  0xef   :  { %v271_v11 = vadd.f32 %v3409_v22, %v231_v9  ;;  %v270_v12 = vadd.f32 %v3409_v22, %v226_v10  ;;  %387 = vmax.xlane.f32.xlu1 %v3476_v8  ;;  %v320_v10 = vsel %vm288_vm15, %v272_v44, %v304_v60  ;;  %v3582_v44 = vld [vmem:[#allocation2] sm:$0xff]  ;;  %v3593_v60 = vld [vmem:[#allocation2 + $0x8] sm:$0xff] }
  0xf0   :  { %v3553_v16 = vadd.f32 %v4834_v4, %v320_v10  ;;  %v3602_v10 = vld [vmem:[#allocation2 + $0x30] sm:$0xff] }
  0xf1   :  { %v303_v20 = vmul.f32 0.2, %v271_v11  ;;  %v302_v21 = vmul.f32 0.2, %v270_v12  ;;  %vm286_vm10 = vcmp.gt.f32.partialorder %v270_v12, 0.0  ;;  %vm287_vm11 = vcmp.gt.f32.partialorder %v271_v11, 0.0 }
  0xf3   :  { %v318_v23 = vsel %vm286_vm10, %v270_v12, %v302_v21  ;;  %v319_v26 = vsel %vm287_vm11, %v271_v11, %v303_v20  ;;  %v323_v20 = vsel %vm291_vm3, %v275_v5, %v307_v18  ;;  %v3606_v18 = vld [vmem:[#allocation2 + $0x38] sm:$0xff] }
  0xf4   :  { %v3499_v28 = vadd.f32 %v4835_v17, %v318_v23  ;;  %v3507_v30 = vadd.f32 %v4830_v19, %v319_v26  ;;  %v2737_v23 = vld [vmem:[%s4820_s3 + $0xa0] sm:$0xff]  ;;  %v2736_v26 = vld [vmem:[%s4820_s3 + $0x98] sm:$0xff]  ;;  %v3649_v19 = vld [vmem:[#allocation2 + $0x68] sm:$0xff] }
  0xf6   :  { %v246_v35 = vpop.permute.xlu1 %245  ;;  %v241_v36 = vpop.permute.xlu0 %240  ;;  %391 = vmax.xlane.f32.xlu0 %v3499_v28  ;;  %383 = vmax.xlane.f32.xlu2 %v3503_v29 }
  0xf7   :  { %v274_v37 = vadd.f32 %v3409_v22, %v246_v35  ;;  %v273_v41 = vadd.f32 %v3409_v22, %v241_v36  ;;  %393 = vmax.xlane.f32.xlu1 %v3507_v30  ;;  %v2738_v35 = vld [vmem:[%s4820_s3 + $0xa8] sm:$0xff] }
  0xf9   :  { %v306_v49 = vmul.f32 0.2, %v274_v37  ;;  %v305_v51 = vmul.f32 0.2, %v273_v41  ;;  %vm289_vm13 = vcmp.gt.f32.partialorder %v273_v41, 0.0  ;;  %vm290_vm14 = vcmp.gt.f32.partialorder %v274_v37, 0.0 }
  0xfb   :  { %v321_v52 = vsel %vm289_vm13, %v273_v41, %v305_v51  ;;  %v322_v55 = vsel %vm290_vm14, %v274_v37, %v306_v49  ;;  %v359_v41 = vld [vmem:[#allocation2 + $0x10] sm:$0xff] }
  0xfc   :  { %v3525_v56 = vadd.f32 %v4832_v45, %v321_v52  ;;  %v3533_v58 = vadd.f32 %v4828_v48, %v322_v55 }
  0xfe   :  { %v256_v62 = vpop.permute.xlu0 %255  ;;  %397 = vmax.xlane.f32.xlu0 %v3525_v56  ;;  %389 = vmax.xlane.f32.xlu2 %v3529_v57  ;;  %v3578_v36 = vpop.permute.xlu1 %1002 }
  0xff   :  { %v276_v0 = vadd.f32 %v3409_v22, %v256_v62  ;;  %399 = vmax.xlane.f32.xlu1 %v3533_v58  ;;  %v4831_v22 = vunpack.c.l.bf16 %v3542_v1  ;;  %v361_v62 = vld [vmem:[#allocation2 + $0x20] sm:$0xff] }
 0x101   :  { %v308_v9 = vmul.f32 0.2, %v276_v0  ;;  %vm292_vm2 = vcmp.gt.f32.partialorder %v276_v0, 0.0  ;;  %v3560_v21 = vadd.f32 %v4831_v22, %v323_v20 }
 0x103   :  { %v324_v11 = vsel %vm292_vm2, %v276_v0, %v308_v9 }
 0x104   :  { %v3549_v12 = vadd.f32 %v4829_v3, %v324_v11  ;;  %v3604_v11 = vld [vmem:[#allocation2 + $0x18] sm:$0xff] }
 0x106   :  { %403 = vmax.xlane.f32.xlu0 %v3549_v12  ;;  %395 = vmax.xlane.f32.xlu2 %v3553_v16  ;;  %v3580_v37 = vpop.permute.xlu0 %997 }
 0x10e   :  { %401 = vmax.xlane.f32.xlu2 %v3560_v21 }
 0x118   :  { %1017 = vperm.xlu1 %2889, %v2737_v23  }
 0x11a   :  { %1012 = vperm.xlu0 %2888, %v2736_v26  }
 0x120   :  { %1032 = vperm.xlu1 %2889, %v2740_v27  }
 0x122   :  { %1027 = vperm.xlu0 %2888, %v2739_v33  }
 0x126   :  { %1022 = vperm.xlu2 %2890, %v2738_v35  }
 0x151   :  { %v378_v49 = vpop.xlane.xlu0 %377  ;;  %v374_v51 = vpop.xlane.xlu1 %373 }
 0x152   :  { %v407_v52 = vmax.f32 %v359_v41, %v378_v49  ;;  %v3587_v55 = vmax.f32 %v3582_v44, %v374_v51  ;;  %v3621_v49 = vld [vmem:[#allocation2 + $0x48] sm:$0xff] }
 0x153   :  { %v3623_v51 = vld [vmem:[#allocation2 + $0x28] sm:$0xff] }
 0x154   :  { %962 = vst.msk [vmem:[#allocation2 + $0x10] sm:$0xff] %vm39_vm0, %v407_v52  ;;  %481 = vperm.xlu0 %2888, %v407_v52   ;;  %471 = vperm.xlu1 %2889, %v3587_v55  }
 0x155   :  { %960 = vst.msk [vmem:[#allocation2] sm:$0xff] %vm39_vm0, %v3587_v55 }
 0x159   :  { %v376_v0 = vpop.xlane.xlu2 %375  ;;  %v382_v2 = vpop.xlane.xlu1 %381 }
 0x15a   :  { %v3596_v5 = vmax.f32 %v3593_v60, %v376_v0  ;;  %v409_v9 = vmax.f32 %v361_v62, %v382_v2  ;;  %v3625_v0 = vld [vmem:[#allocation2 + $0x50] sm:$0xff] }
 0x15c   :  { %961 = vst.msk [vmem:[#allocation2 + $0x8] sm:$0xff] %vm39_vm0, %v3596_v5  ;;  %476 = vperm.xlu2 %2890, %v3596_v5   ;;  %491 = vperm.xlu0 %2888, %v409_v9  }
 0x15d   :  { %964 = vst.msk [vmem:[#allocation2 + $0x20] sm:$0xff] %vm39_vm0, %v409_v9 }
 0x161   :  { %v386_v20 = vpop.xlane.xlu0 %385  ;;  %v380_v23 = vpop.xlane.xlu2 %379 }
 0x162   :  { %v3609_v26 = vmax.f32 %v3602_v10, %v386_v20  ;;  %v3612_v27 = vmax.f32 %v3604_v11, %v380_v23  ;;  %v388_v33 = vpop.xlane.xlu1 %387 }
 0x163   :  { %v412_v35 = vmax.f32 %v3606_v18, %v388_v33 }
 0x164   :  { %966 = vst.msk [vmem:[#allocation2 + $0x30] sm:$0xff] %vm39_vm0, %v3609_v26  ;;  %486 = vperm.xlu1 %2889, %v3612_v27  }
 0x165   :  { %963 = vst.msk [vmem:[#allocation2 + $0x18] sm:$0xff] %vm39_vm0, %v3612_v27  ;;  %506 = vperm.xlu0 %2888, %v412_v35  }
 0x166   :  { %967 = vst.msk [vmem:[#allocation2 + $0x38] sm:$0xff] %vm39_vm0, %v412_v35 }
 0x169   :  { %v392_v2 = vpop.xlane.xlu0 %391  ;;  %v384_v20 = vpop.xlane.xlu2 %383 }
 0x16a   :  { %v3628_v23 = vmax.f32 %v3621_v49, %v392_v2  ;;  %v3631_v33 = vmax.f32 %v3623_v51, %v384_v20  ;;  %v394_v48 = vpop.xlane.xlu1 %393  ;;  %v423_v2 = vsub.f32 %v359_v41, %v407_v52  ;;  %v3645_v20 = vld [vmem:[#allocation2 + $0x60] sm:$0xff]  ;;  %v425_v52 = vsub.f32 %v361_v62, %v409_v9  ;;  %v3681_v9 = vld [vmem:[#allocation2 + $0x70] sm:$0xff] }
 0x16b   :  { %v3634_v3 = vmax.f32 %v3625_v0, %v394_v48  ;;  %v3647_v48 = vld [vmem:[#allocation2 + $0x40] sm:$0xff]  ;;  %v422_v62 = vsub.f32 %v3593_v60, %v3596_v5  ;;  %v424_v60 = vsub.f32 %v3604_v11, %v3612_v27 }
 0x16c   :  { %969 = vst.msk [vmem:[#allocation2 + $0x48] sm:$0xff] %vm39_vm0, %v3628_v23  ;;  %496 = vperm.xlu2 %2890, %v3631_v33   ;;  %501 = vperm.xlu1 %2889, %v3609_v26   ;;  %v441_v63 = vmul.f32 1.442695, %v423_v2  ;;  %v3663_v2 = vld [vmem:[#allocation2 + $0x58] sm:$0xff]  ;;  %v426_v5 = vsub.f32 %v3623_v51, %v3631_v33 }
 0x16d   :  { %965 = vst.msk [vmem:[#allocation2 + $0x28] sm:$0xff] %vm39_vm0, %v3631_v33  ;;  %521 = vperm.xlu0 %2888, %v3634_v3  }
 0x16e   :  { %970 = vst.msk [vmem:[#allocation2 + $0x50] sm:$0xff] %vm39_vm0, %v3634_v3  ;;  %2893 = vpow2.f32 %v441_v63  ;;  %v421_v63 = vsub.f32 %v3582_v44, %v3587_v55  ;;  %v439_v44 = vmul.f32 1.442695, %v422_v62 }
 0x171   :  { %v398_v22 = vpop.xlane.xlu0 %397  ;;  %v390_v45 = vpop.xlane.xlu2 %389 }
 0x172   :  { %v3652_v4 = vmax.f32 %v3645_v20, %v398_v22  ;;  %v413_v17 = vmax.f32 %v3647_v48, %v390_v45  ;;  %v400_v43 = vpop.xlane.xlu1 %399  ;;  %v3661_v22 = vld [vmem:[#allocation2 + $0x78] sm:$0xff] }
 0x173   :  { %v418_v41 = vmax.f32 %v3649_v19, %v400_v43  ;;  %v445_v43 = vmul.f32 1.442695, %v425_v52  ;;  %v437_v52 = vmul.f32 1.442695, %v421_v63 }
 0x174   :  { %972 = vst.msk [vmem:[#allocation2 + $0x60] sm:$0xff] %vm39_vm0, %v3652_v4  ;;  %511 = vperm.xlu2 %2890, %v413_v17   ;;  %516 = vperm.xlu1 %2889, %v3628_v23   ;;  %v3669_v14 = vpop.eup %2893 }
 0x175   :  { %968 = vst.msk [vmem:[#allocation2 + $0x40] sm:$0xff] %vm39_vm0, %v413_v17  ;;  %536 = vperm.xlu0 %2888, %v418_v41   ;;  %2895 = vpow2.f32 %v445_v43  ;;  %v447_v43 = vmul.f32 1.442695, %v426_v5  ;;  %v434_v51 = vsub.f32 %v3649_v19, %v418_v41  ;;  %v2813_v19 = vld [vmem:[%s4818_s1 + $0x38] sm:$0xff] }
 0x176   :  { %973 = vst.msk [vmem:[#allocation2 + $0x68] sm:$0xff] %vm39_vm0, %v418_v41  ;;  %2897 = vpow2.f32 %v437_v52  ;;  %878 = vmatpush.bf16.msra.mxu0 %v2813_v19  ;;  %2861 = vmatpush.bf16.msra.mxu2 %v2813_v19 }
 0x177   :  { %2899 = vpow2.f32 %v439_v44  ;;  %v463_v44 = vmul.f32 1.442695, %v434_v51 }
 0x179   :  { %v404_v45 = vpop.xlane.xlu0 %403  ;;  %v396_v42 = vpop.xlane.xlu2 %395 }
 0x17a   :  { %v3666_v61 = vmax.f32 %v3661_v22, %v404_v45  ;;  %v416_v47 = vmax.f32 %v3663_v2, %v396_v42  ;;  %v428_v42 = vsub.f32 %v3606_v18, %v412_v35  ;;  %v431_v18 = vsub.f32 %v3625_v0, %v3634_v3 }
 0x17b   :  { %v3686_v31 = vpop.eup %2895  ;;  %v443_v35 = vmul.f32 1.442695, %v424_v60  ;;  %v429_v3 = vsub.f32 %v3647_v48, %v413_v17  ;;  %v2811_v60 = vld [vmem:[%s4818_s1 + $0x28] sm:$0xff] }
 0x17c   :  { %975 = vst.msk [vmem:[#allocation2 + $0x78] sm:$0xff] %vm39_vm0, %v3666_v61  ;;  %526 = vperm.xlu2 %2890, %v416_v47   ;;  %531 = vperm.xlu1 %2889, %v3652_v4   ;;  %v451_v45 = vmul.f32 1.442695, %v428_v42  ;;  %v3699_v11 = vpop.eup %2897  ;;  %v457_v27 = vmul.f32 1.442695, %v431_v18  ;;  %v427_v42 = vsub.f32 %v3602_v10, %v3609_v26  ;;  %v430_v26 = vsub.f32 %v3621_v49, %v3628_v23  ;;  %v2812_v49 = vld [vmem:[%s4818_s1 + $0x30] sm:$0xff] }
 0x17d   :  { %971 = vst.msk [vmem:[#allocation2 + $0x58] sm:$0xff] %vm39_vm0, %v416_v47  ;;  %722 = vperm.xlu0 %2888, %v3669_v14   ;;  %v3701_v63 = vpop.eup %2899  ;;  %v453_v33 = vmul.f32 1.442695, %v429_v3  ;;  %v432_v17 = vsub.f32 %v3663_v2, %v416_v47  ;;  %879 = vmatpush.bf16.msra.mxu0 %v2812_v49  ;;  %v433_v2 = vsub.f32 %v3645_v20, %v3652_v4  ;;  %v2810_v18 = vld [vmem:[%s4818_s1 + $0x20] sm:$0xff]  ;;  %v2808_v3 = vld [vmem:[%s4818_s1 + $0x10] sm:$0xff] }
 0x17e   :  { %2901 = vpow2.f32 %v451_v45  ;;  %v449_v0 = vmul.f32 1.442695, %v427_v42  ;;  %v455_v48 = vmul.f32 1.442695, %v430_v26  ;;  %2862 = vmatpush.bf16.msra.mxu2 %v2812_v49  ;;  %v2748_v26 = vld [vmem:[%s4820_s3 + $0xf8] sm:$0xff]  ;;  %v2746_v49 = vld [vmem:[%s4820_s3 + $0xe8] sm:$0xff] }
 0x17f   :  { %2903 = vpow2.f32 %v443_v35  ;;  %v459_v41 = vmul.f32 1.442695, %v432_v17  ;;  %v461_v4 = vmul.f32 1.442695, %v433_v2  ;;  %v2741_v2 = vld [vmem:[%s4820_s3 + $0xc0] sm:$0xff] }
 0x180   :  { %2905 = vpow2.f32 %v447_v43  ;;  %v2742_v43 = vld [vmem:[%s4820_s3 + $0xc8] sm:$0xff] }
 0x181   :  { %v402_v55 = vpop.xlane.xlu2 %401  ;;  %2907 = vpow2.f32 %v457_v27  ;;  %880 = vmatpush.bf16.msra.mxu0 %v2811_v60 }
 0x182   :  { %v3684_v59 = vmax.f32 %v3681_v9, %v402_v55  ;;  %2909 = vpow2.f32 %v449_v0  ;;  %2863 = vmatpush.bf16.msra.mxu2 %v2811_v60  ;;  %v2745_v0 = vld [vmem:[%s4820_s3 + $0xe0] sm:$0xff] }
 0x183   :  { %2911 = vpow2.f32 %v453_v33 }
 0x184   :  { %974 = vst.msk [vmem:[#allocation2 + $0x70] sm:$0xff] %vm39_vm0, %v3684_v59  ;;  %541 = vperm.xlu2 %2890, %v3684_v59   ;;  %546 = vperm.xlu1 %2889, %v3666_v61   ;;  %v3703_v62 = vpop.eup %2901  ;;  %2913 = vpow2.f32 %v463_v44  ;;  %v435_v5 = vsub.f32 %v3681_v9, %v3684_v59  ;;  %v2809_v59 = vld [vmem:[%s4818_s1 + $0x18] sm:$0xff]  ;;  %v436_v9 = vsub.f32 %v3661_v22, %v3666_v61  ;;  %v2807_v61 = vld [vmem:[%s4818_s1 + $0x8] sm:$0xff]  ;;  %v2743_v22 = vld [vmem:[%s4820_s3 + $0xd0] sm:$0xff] }
 0x185   :  { %732 = vperm.xlu0 %2888, %v3686_v31   ;;  %v3712_v52 = vpop.eup %2903  ;;  %2915 = vpow2.f32 %v455_v48  ;;  %881 = vmatpush.bf16.msra.mxu0 %v2810_v18  ;;  %v2806_v44 = vld [vmem:[%s4818_s1] sm:$0xff] }
 0x186   :  { %v3714_v55 = vpop.eup %2905  ;;  %2917 = vpow2.f32 %v459_v41  ;;  %v465_v20 = vmul.f32 1.442695, %v435_v5  ;;  %2864 = vmatpush.bf16.msra.mxu2 %v2810_v18  ;;  %v467_v42 = vmul.f32 1.442695, %v436_v9 }
 0x187   :  { %v3716_v10 = vpop.eup %2907  ;;  %2919 = vpow2.f32 %v461_v4  ;;  %v2744_v4 = vld [vmem:[%s4820_s3 + $0xd8] sm:$0xff] }
 0x188   :  { %4847 = vst [vmem:[#allocation7_spill] sm:$0xff] %v3716_v10  ;;  %v3730_v23 = vpop.eup %2909  ;;  %2921 = vpow2.f32 %v465_v20 }
 0x189   :  { %v3732_v45 = vpop.eup %2911  ;;  %882 = vmatpush.bf16.msra.mxu0 %v2809_v59  ;;  %2923 = vpow2.f32 %v467_v42  ;;  %v3794_v41 = vpop.permute.xlu2 %1022 }
 0x18a   :  { %v3734_v47 = vpop.eup %2913  ;;  %2865 = vmatpush.bf16.msra.mxu2 %v2809_v59  ;;  %v3792_v48 = vpop.permute.xlu1 %1017 }
 0x18b   :  { %4848 = vst [vmem:[#allocation8_spill] sm:$0xff] %v3734_v47  ;;  %v3749_v35 = vpop.eup %2915 }
 0x18c   :  { %717 = vperm.xlu1 %2889, %v3701_v63   ;;  %712 = vperm.xlu2 %2890, %v3699_v11   ;;  %v3754_v27 = vpop.eup %2917  ;;  %v3789_v19 = vpop.permute.xlu0 %1012 }
 0x18d   :  { %747 = vperm.xlu0 %2888, %v3703_v62   ;;  %v3766_v51 = vpop.eup %2919  ;;  %883 = vmatpush.bf16.msra.mxu0 %v2808_v3 }
 0x18e   :  { %v3771_v33 = vpop.eup %2921  ;;  %2866 = vmatpush.bf16.msra.mxu2 %v2808_v3 }
 0x18f   :  { %v3787_v17 = vpop.eup %2923 }
 0x190   :  { %4849 = vst [vmem:[#allocation9_spill] sm:$0xff] %v3787_v17 }
 0x191   :  { %884 = vmatpush.bf16.msra.mxu0 %v2807_v61 }
 0x192   :  { %2867 = vmatpush.bf16.msra.mxu2 %v2807_v61  ;;  %v3804_v18 = vpop.permute.xlu1 %1032 }
 0x194   :  { %737 = vperm.xlu1 %2889, %v3714_v55   ;;  %727 = vperm.xlu2 %2890, %v3712_v52   ;;  %v3802_v60 = vpop.permute.xlu0 %1027 }
 0x195   :  { %762 = vperm.xlu0 %2888, %v3716_v10   ;;  %885 = vmatpush.bf16.msra.mxu0 %v2806_v44 }
 0x196   :  { %2868 = vmatpush.bf16.msra.mxu2 %v2806_v44 }
 0x19c   :  { %752 = vperm.xlu1 %2889, %v3732_v45   ;;  %742 = vperm.xlu2 %2890, %v3730_v23  }
 0x19d   :  { %777 = vperm.xlu0 %2888, %v3734_v47  }
 0x1a4   :  { %767 = vperm.xlu1 %2889, %v3754_v27   ;;  %757 = vperm.xlu2 %2890, %v3749_v35  }
 0x1a5   :  { %1042 = vperm.xlu0 %2888, %v2742_v43  }
 0x1ac   :  { %782 = vperm.xlu1 %2889, %v3771_v33   ;;  %772 = vperm.xlu2 %2890, %v3766_v51  }
 0x1ad   :  { %1057 = vperm.xlu0 %2888, %v2745_v0   ;;  %v2747_v0 = vld [vmem:[%s4820_s3 + $0xf0] sm:$0xff] }
 0x1b4   :  { %1047 = vperm.xlu1 %2889, %v2743_v22   ;;  %787 = vperm.xlu2 %2890, %v3787_v17  }
 0x1b5   :  { %1072 = vperm.xlu0 %2888, %v2748_v26  }
 0x1b6   :  { %v477_v5 = vpop.permute.xlu2 %476 }
 0x1b7   :  { %v550_v20 = vsub.f32 %v3451_v53, %v477_v5 }
 0x1b9   :  { %v567_v42 = vmul.f32 1.442695, %v550_v20 }
 0x1bb   :  { %2925 = vpow2.f32 %v567_v42 }
 0x1bc   :  { %1062 = vperm.xlu1 %2889, %v2746_v49   ;;  %1037 = vperm.xlu2 %2890, %v2741_v2  }
 0x1c1   :  { %v2926_v26 = vpop.eup %2925 }
 0x1c4   :  { %1052 = vperm.xlu2 %2890, %v2744_v4  }
 0x1c6   :  { %v482_v43 = vpop.permute.xlu0 %481  ;;  %v497_v59 = vpop.permute.xlu2 %496 }
 0x1c7   :  { %v472_v9 = vpop.permute.xlu1 %471  ;;  %v551_v53 = vsub.f32 %v3433_v39, %v482_v43 }
 0x1c8   :  { %v549_v3 = vsub.f32 %v3437_v40, %v472_v9 }
 0x1c9   :  { %v569_v9 = vmul.f32 1.442695, %v551_v53 }
 0x1ca   :  { %v565_v61 = vmul.f32 1.442695, %v549_v3 }
 0x1cc   :  { %1067 = vperm.xlu2 %2890, %v2747_v0   ;;  %2927 = vpow2.f32 %v565_v61  ;;  %v554_v0 = vsub.f32 %v3503_v29, %v497_v59 }
 0x1cd   :  { %2929 = vpow2.f32 %v569_v9 }
 0x1ce   :  { %v512_v22 = vpop.permute.xlu2 %511  ;;  %v492_v44 = vpop.permute.xlu0 %491  ;;  %v575_v17 = vmul.f32 1.442695, %v554_v0 }
 0x1cf   :  { %v557_v43 = vsub.f32 %v3529_v57, %v512_v22  ;;  %v553_v47 = vsub.f32 %v3447_v50, %v492_v44 }
 0x1d2   :  { %v2928_v49 = vpop.eup %2927 }
 0x1d3   :  { %v806_v2 = vpack.c.bf16 %v2926_v26, %v2928_v49 }
 0x1d5   :  { %886 = vmatmul.bf16.vlgmr.msra.gmra.mxu0 %v806_v2  ;;  %v2930_v2 = vpop.eup %2929 }
 0x1d6   :  { %v527_v5 = vpop.permute.xlu2 %526  ;;  %v487_v4 = vpop.permute.xlu1 %486 }
 0x1d7   :  { %v3815_v20 = vpop.permute.xlu0 %506  ;;  %v552_v40 = vsub.f32 %v3472_v7, %v487_v4  ;;  %v581_v4 = vmul.f32 1.442695, %v557_v43  ;;  %v560_v9 = vsub.f32 %v3553_v16, %v527_v5 }
 0x1d9   :  { %v571_v32 = vmul.f32 1.442695, %v552_v40  ;;  %v573_v40 = vmul.f32 1.442695, %v553_v47  ;;  %v587_v43 = vmul.f32 1.442695, %v560_v9 }
 0x1db   :  { %2931 = vpow2.f32 %v571_v32 }
 0x1dc   :  { %2933 = vpow2.f32 %v575_v17 }
 0x1de   :  { %v542_v42 = vpop.permute.xlu2 %541  ;;  %v502_v3 = vpop.permute.xlu1 %501 }
 0x1df   :  { %v522_v61 = vpop.permute.xlu0 %521  ;;  %629 = vadd.xlane.f32.xlu0 %v2928_v49  ;;  %v555_v39 = vsub.f32 %v3468_v6, %v502_v3 }
 0x1e0   :  { %v559_v0 = vsub.f32 %v3507_v30, %v522_v61 }
 0x1e1   :  { %v2932_v10 = vpop.eup %2931  ;;  %v577_v7 = vmul.f32 1.442695, %v555_v39 }
 0x1e2   :  { %v807_v53 = vpack.c.bf16 %v2932_v10, %v2930_v2  ;;  %v2934_v57 = vpop.eup %2933 }
 0x1e3   :  { %2935 = vpow2.f32 %v577_v7 }
 0x1e4   :  { %2937 = vpow2.f32 %v581_v4  ;;  %v585_v4 = vmul.f32 1.442695, %v559_v0 }
 0x1e5   :  { %891 = vmatmul.bf16.gmra.mxu0 %v807_v53  ;;  %2939 = vpow2.f32 %v573_v40  ;;  %v556_v53 = vsub.f32 %v3476_v8, %v3815_v20 }
 0x1e6   :  { %633 = vadd.xlane.f32.xlu1 %v2930_v2  ;;  %v3822_v32 = vpop.permute.xlu2 %712  ;;  %v517_v29 = vpop.permute.xlu1 %516 }
 0x1e7   :  { %v3824_v59 = vpop.permute.xlu0 %536  ;;  %635 = vadd.xlane.f32.xlu0 %v2932_v10  ;;  %v558_v6 = vsub.f32 %v3499_v28, %v517_v29  ;;  %v579_v61 = vmul.f32 1.442695, %v556_v53 }
 0x1e9   :  { %v583_v50 = vmul.f32 1.442695, %v558_v6  ;;  %v2936_v22 = vpop.eup %2935  ;;  %v3845_v6 = vld [vmem:[%s4819_s2 + $0x1] ss:$0 sm:$0xff] }
 0x1ea   :  { %v2938_v49 = vpop.eup %2937 }
 0x1eb   :  { %2941 = vpow2.f32 %v583_v50  ;;  %v2940_v10 = vpop.eup %2939 }
 0x1ec   :  { %v808_v7 = vpack.c.bf16 %v2934_v57, %v2940_v10  ;;  %2943 = vpow2.f32 %v587_v43 }
 0x1ee   :  { %639 = vadd.xlane.f32.xlu1 %v2934_v57  ;;  %v3827_v47 = vpop.permute.xlu2 %727  ;;  %v532_v44 = vpop.permute.xlu1 %531  ;;  %v1078_v57 = vadd.f32 %v3845_v6, %v3580_v37 }
 0x1ef   :  { %v3830_v17 = vpop.permute.xlu0 %722  ;;  %641 = vadd.xlane.f32.xlu0 %v2936_v22  ;;  %v561_v28 = vsub.f32 %v3525_v56, %v532_v44  ;;  %v563_v56 = vsub.f32 %v3560_v21, %v542_v42  ;;  %v1080_v44 = vadd.f32 %v3845_v6, %v3584_v46 }
 0x1f0   :  { %v1110_v0 = vmul.f32 0.2, %v1078_v57  ;;  %vm1094_vm4 = vcmp.gt.f32.partialorder %v1078_v57, 0.0 }
 0x1f1   :  { %v2942_v3 = vpop.eup %2941  ;;  %v589_v2 = vmul.f32 1.442695, %v561_v28  ;;  %v593_v29 = vmul.f32 1.442695, %v563_v56  ;;  %v1112_v43 = vmul.f32 0.2, %v1080_v44 }
 0x1f2   :  { %v810_v39 = vpack.c.bf16 %v2942_v3, %v2938_v49  ;;  %v2944_v20 = vpop.eup %2943  ;;  %vm1096_vm5 = vcmp.gt.f32.partialorder %v1080_v44, 0.0 }
 0x1f3   :  { %2945 = vpow2.f32 %v589_v2  ;;  %v1128_v53 = vsel %vm1096_vm5, %v1080_v44, %v1112_v43 }
 0x1f4   :  { %906 = vmatmul.bf16.vlgmr.msra.gmra.mxu2 %v810_v39  ;;  %2947 = vpow2.f32 %v585_v4  ;;  %v4850_v4 = vunpack.c.l.bf16 %v3419_v25 }
 0x1f5   :  { %631 = vadd.xlane.f32.xlu2 %v2926_v26  ;;  %896 = vmatmul.bf16.gmra.mxu0 %v808_v7  ;;  %2949 = vpow2.f32 %v579_v61 }
 0x1f6   :  { %645 = vadd.xlane.f32.xlu1 %v2938_v49  ;;  %v3836_v16 = vpop.permute.xlu2 %742  ;;  %v547_v5 = vpop.permute.xlu1 %546  ;;  %2951 = vpow2.f32 %v593_v29 }
 0x1f7   :  { %v3839_v40 = vpop.permute.xlu0 %732  ;;  %647 = vadd.xlane.f32.xlu0 %v2942_v3  ;;  %v564_v30 = vsub.f32 %v3549_v12, %v547_v5 }
 0x1f9   :  { %v595_v8 = vmul.f32 1.442695, %v564_v30  ;;  %v2946_v26 = vpop.eup %2945  ;;  %v4851_v30 = vunpack.c.l.bf16 %v3414_v24 }
 0x1fa   :  { %v2948_v50 = vpop.eup %2947 }
 0x1fb   :  { %2953 = vpow2.f32 %v595_v8  ;;  %v811_v49 = vpack.c.bf16 %v2944_v20, %v2948_v50  ;;  %v2950_v9 = vpop.eup %2949  ;;  %v3881_v61 = vadd.f32 %v4851_v30, %v1128_v53  ;;  %v4854_v30 = vunpack.c.h.bf16 %v3419_v25 }
 0x1fc   :  { %v809_v28 = vpack.c.bf16 %v2950_v9, %v2936_v22  ;;  %v3859_v3 = vpop.eup %2951  ;;  %v1083_v22 = vadd.f32 %v3845_v6, %v3794_v41 }
 0x1fd   :  { %637 = vadd.xlane.f32.xlu2 %v2940_v10  ;;  %v562_v10 = vsub.f32 %v3533_v58, %v3824_v59  ;;  %v1081_v58 = vadd.f32 %v3845_v6, %v3789_v19  ;;  %v1126_v59 = vsel %vm1094_vm4, %v1078_v57, %v1110_v0  ;;  %v1084_v57 = vadd.f32 %v3845_v6, %v3802_v60 }
 0x1fe   :  { %651 = vadd.xlane.f32.xlu1 %v2944_v20  ;;  %v3847_v21 = vpop.permute.xlu2 %757  ;;  %v3849_v42 = vpop.permute.xlu1 %717  ;;  %v3877_v5 = vadd.f32 %v4850_v4, %v1126_v59  ;;  %v1115_v29 = vmul.f32 0.2, %v1083_v22  ;;  %vm1099_vm7 = vcmp.gt.f32.partialorder %v1083_v22, 0.0  ;;  %v1079_v20 = vadd.f32 %v3845_v6, %v3578_v36 }
 0x1ff   :  { %v3851_v12 = vpop.permute.xlu0 %747  ;;  %653 = vadd.xlane.f32.xlu0 %v2946_v26  ;;  %v591_v2 = vmul.f32 1.442695, %v562_v10  ;;  %v1113_v56 = vmul.f32 0.2, %v1081_v58  ;;  %vm1097_vm6 = vcmp.gt.f32.partialorder %v1081_v58, 0.0  ;;  %vm1100_vm9 = vcmp.gt.f32.partialorder %v1084_v57, 0.0 }
 0x200   :  { %v1111_v10 = vmul.f32 0.2, %v1079_v20  ;;  %v1116_v43 = vmul.f32 0.2, %v1084_v57  ;;  %vm1095_vm8 = vcmp.gt.f32.partialorder %v1079_v20, 0.0 }
 0x201   :  { %v3861_v39 = vpop.eup %2953  ;;  %2955 = vpow2.f32 %v591_v2  ;;  %v1129_v44 = vsel %vm1097_vm6, %v1081_v58, %v1113_v56  ;;  %v4853_v2 = vunpack.c.h.bf16 %v3429_v38 }
 0x202   :  { %v1132_v56 = vsel %vm1100_vm9, %v1084_v57, %v1116_v43  ;;  %v1085_v43 = vadd.f32 %v3845_v6, %v3804_v18  ;;  %v4859_v18 = vunpack.c.h.bf16 %v3492_v15 }
 0x204   :  { %911 = vmatmul.bf16.gmra.mxu2 %v811_v49  ;;  %vm1101_vm14 = vcmp.gt.f32.partialorder %v1085_v43, 0.0 }
 0x205   :  { %643 = vadd.xlane.f32.xlu2 %v2950_v9  ;;  %901 = vmatmul.bf16.gmra.mxu0 %v809_v28  ;;  %v1131_v9 = vsel %vm1099_vm7, %v1083_v22, %v1115_v29  ;;  %v4852_v28 = vunpack.c.h.bf16 %v3414_v24  ;;  %v1082_v24 = vadd.f32 %v3845_v6, %v3792_v48  ;;  %v1127_v22 = vsel %vm1095_vm8, %v1079_v20, %v1111_v10 }
 0x206   :  { %657 = vadd.xlane.f32.xlu1 %v3859_v3  ;;  %v3864_v37 = vpop.permute.xlu2 %772  ;;  %v3866_v46 = vpop.permute.xlu1 %737  ;;  %v3901_v59 = vadd.f32 %v4853_v2, %v1131_v9  ;;  %v3913_v29 = vadd.f32 %v4854_v30, %v1127_v22 }
 0x207   :  { %v3868_v7 = vpop.permute.xlu0 %762  ;;  %659 = vadd.xlane.f32.xlu0 %v3861_v39  ;;  %v3897_v0 = vadd.f32 %v4852_v28, %v1129_v44  ;;  %v1114_v44 = vmul.f32 0.2, %v1082_v24  ;;  %v4856_v28 = vunpack.c.l.bf16 %v3486_v13  ;;  %vm1098_vm11 = vcmp.gt.f32.partialorder %v1082_v24, 0.0 }
 0x20d   :  { %649 = vadd.xlane.f32.xlu2 %v2948_v50  ;;  %v2956_v50 = vpop.eup %2955 }
 0x20e   :  { %1175 = vmax.xlane.f32.xlu1 %v3877_v5  ;;  %v3884_v19 = vpop.permute.xlu2 %787  ;;  %v3886_v8 = vpop.permute.xlu1 %752  ;;  %v812_v49 = vpack.c.bf16 %v2956_v50, %v2946_v26 }
 0x20f   :  { %v3888_v41 = vpop.permute.xlu0 %777  ;;  %1179 = vmax.xlane.f32.xlu0 %v3881_v61 }
 0x214   :  { %916 = vmatmul.bf16.gmra.mxu2 %v812_v49  ;;  %v4855_v49 = vunpack.c.l.bf16 %v3456_v54 }
 0x215   :  { %655 = vadd.xlane.f32.xlu2 %v2956_v50 }
 0x216   :  { %1181 = vmax.xlane.f32.xlu1 %v3897_v0  ;;  %v1038_v36 = vpop.permute.xlu2 %1037  ;;  %v3904_v60 = vpop.permute.xlu1 %767  ;;  %v3917_v9 = vadd.f32 %v4855_v49, %v1132_v56  ;;  %v4857_v56 = vunpack.c.l.bf16 %v3429_v38  ;;  %v1117_v49 = vmul.f32 0.2, %v1085_v43 }
 0x217   :  { %v1086_v26 = vadd.f32 %v3845_v6, %v1038_v36  ;;  %v1043_v58 = vpop.permute.xlu0 %1042  ;;  %1185 = vmax.xlane.f32.xlu0 %v3901_v59  ;;  %v1130_v36 = vsel %vm1098_vm11, %v1082_v24, %v1114_v44 }
 0x218   :  { %v1087_v4 = vadd.f32 %v3845_v6, %v1043_v58  ;;  %v3936_v30 = vadd.f32 %v4857_v56, %v1130_v36 }
 0x219   :  { %v1118_v53 = vmul.f32 0.2, %v1086_v26  ;;  %vm1102_vm10 = vcmp.gt.f32.partialorder %v1086_v26, 0.0 }
 0x21a   :  { %v1119_v48 = vmul.f32 0.2, %v1087_v4  ;;  %vm1103_vm12 = vcmp.gt.f32.partialorder %v1087_v4, 0.0 }
 0x21b   :  { %v1134_v50 = vsel %vm1102_vm10, %v1086_v26, %v1118_v53  ;;  %v813_v53 = vpack.c.bf16 %v3861_v39, %v3859_v3 }
 0x21c   :  { %v3921_v2 = vadd.f32 %v4856_v28, %v1134_v50  ;;  %v1135_v22 = vsel %vm1103_vm12, %v1087_v4, %v1119_v48  ;;  %v4858_v28 = vunpack.c.h.bf16 %v3486_v13  ;;  %v1133_v48 = vsel %vm1101_vm14, %v1085_v43, %v1117_v49 }
 0x21d   :  { %1177 = vmax.xlane.f32.xlu2 %v3913_v29 }
 0x21e   :  { %1187 = vmax.xlane.f32.xlu1 %v3917_v9  ;;  %v1053_v20 = vpop.permute.xlu2 %1052  ;;  %v3925_v25 = vpop.permute.xlu1 %782 }
 0x21f   :  { %v1089_v57 = vadd.f32 %v3845_v6, %v1053_v20  ;;  %v1058_v10 = vpop.permute.xlu0 %1057  ;;  %1191 = vmax.xlane.f32.xlu0 %v3921_v2  ;;  %v3940_v20 = vadd.f32 %v4858_v28, %v1135_v22 }
 0x220   :  { %v1090_v58 = vadd.f32 %v3845_v6, %v1058_v10 }
 0x221   :  { %v1121_v26 = vmul.f32 0.2, %v1089_v57  ;;  %vm1105_vm13 = vcmp.gt.f32.partialorder %v1089_v57, 0.0 }
 0x222   :  { %v1122_v4 = vmul.f32 0.2, %v1090_v58  ;;  %vm1106_vm15 = vcmp.gt.f32.partialorder %v1090_v58, 0.0 }
 0x223   :  { %v1137_v50 = vsel %vm1105_vm13, %v1089_v57, %v1121_v26  ;;  %v4860_v26 = vunpack.c.h.bf16 %v3456_v54 }
 0x224   :  { %921 = vmatmul.bf16.gmra.mxu2 %v813_v53  ;;  %v3944_v24 = vadd.f32 %v4859_v18, %v1137_v50  ;;  %v1138_v36 = vsel %vm1106_vm15, %v1090_v58, %v1122_v4  ;;  %v4861_v50 = vunpack.c.l.bf16 %v3512_v34  ;;  %v4862_v18 = vunpack.c.l.bf16 %v3542_v1 }
 0x225   :  { %1183 = vmax.xlane.f32.xlu2 %v3936_v30  ;;  %v3954_v22 = vadd.f32 %v4860_v26, %v1133_v48  ;;  %v4864_v48 = vunpack.c.h.bf16 %v3542_v1  ;;  %v4865_v26 = vunpack.c.h.bf16 %v3512_v34  ;;  %v600_v34 = vld [vmem:[#allocation3 + $0x18] sm:$0xff] }
 0x226   :  { %v1068_v3 = vpop.permute.xlu2 %1067  ;;  %1193 = vmax.xlane.f32.xlu1 %v3940_v20  ;;  %v1048_v38 = vpop.permute.xlu1 %1047  ;;  %v3958_v28 = vadd.f32 %v4861_v50, %v1138_v36 }
 0x227   :  { %v1092_v39 = vadd.f32 %v3845_v6, %v1068_v3  ;;  %v1073_v44 = vpop.permute.xlu0 %1072  ;;  %1197 = vmax.xlane.f32.xlu0 %v3944_v24  ;;  %v1088_v13 = vadd.f32 %v3845_v6, %v1048_v38  ;;  %v4863_v38 = vunpack.c.l.bf16 %v3492_v15  ;;  %v597_v15 = vld [vmem:[#allocation3] sm:$0xff] }
 0x228   :  { %v1093_v10 = vadd.f32 %v3845_v6, %v1073_v44 }
 0x229   :  { %v1124_v57 = vmul.f32 0.2, %v1092_v39  ;;  %vm1108_vm2 = vcmp.gt.f32.partialorder %v1092_v39, 0.0  ;;  %v1120_v56 = vmul.f32 0.2, %v1088_v13  ;;  %vm1104_vm3 = vcmp.gt.f32.partialorder %v1088_v13, 0.0 }
 0x22a   :  { %v1125_v43 = vmul.f32 0.2, %v1093_v10  ;;  %vm1109_vm4 = vcmp.gt.f32.partialorder %v1093_v10, 0.0 }
 0x22b   :  { %v1140_v53 = vsel %vm1108_vm2, %v1092_v39, %v1124_v57  ;;  %v1136_v49 = vsel %vm1104_vm3, %v1088_v13, %v1120_v56  ;;  %v694_v13 = vld [vmem:[#allocation4] sm:$0xff] }
 0x22c   :  { %v3962_v3 = vadd.f32 %v4862_v18, %v1140_v53  ;;  %v1141_v4 = vsel %vm1109_vm4, %v1093_v10, %v1125_v43  ;;  %v3970_v39 = vadd.f32 %v4863_v38, %v1136_v49  ;;  %v613_v10 = vmul.f32 %v3699_v11, %v597_v15  ;;  %v599_v43 = vld [vmem:[#allocation3 + $0x10] sm:$0xff] }
 0x22d   :  { %1189 = vmax.xlane.f32.xlu2 %v3954_v22  ;;  %v3974_v57 = vadd.f32 %v4864_v48, %v1141_v4  ;;  %v790_v1 = vmul.f32 %v3822_v32, %v694_v13  ;;  %v616_v49 = vmul.f32 %v3712_v52, %v600_v34  ;;  %v603_v15 = vld [vmem:[#allocation3 + $0x30] sm:$0xff]  ;;  %v605_v34 = vld [vmem:[#allocation3 + $0x40] sm:$0xff] }
 0x22e   :  { %1199 = vmax.xlane.f32.xlu1 %v3958_v28  ;;  %v1063_v58 = vpop.permute.xlu1 %1062  ;;  %v696_v13 = vld [vmem:[#allocation4 + $0x10] sm:$0xff]  ;;  %v619_v52 = vmul.f32 %v3730_v23, %v603_v15  ;;  %v601_v15 = vld [vmem:[#allocation3 + $0x20] sm:$0xff] }
 0x22f   :  { %1203 = vmax.xlane.f32.xlu0 %v3962_v3  ;;  %v1091_v54 = vadd.f32 %v3845_v6, %v1063_v58  ;;  %v695_v58 = vld [vmem:[#allocation4 + $0x8] sm:$0xff] }
 0x230   :  { %v791_v11 = vmul.f32 %v3849_v42, %v695_v58  ;;  %v792_v42 = vmul.f32 %v3830_v17, %v696_v13  ;;  %v606_v58 = vld [vmem:[#allocation3 + $0x48] sm:$0xff]  ;;  %v621_v17 = vmul.f32 %v3732_v45, %v605_v34  ;;  %v609_v45 = vld [vmem:[#allocation3 + $0x60] sm:$0xff]  ;;  %v617_v13 = vmul.f32 %v3686_v31, %v601_v15  ;;  %v604_v31 = vld [vmem:[#allocation3 + $0x38] sm:$0xff] }
 0x231   :  { %v1123_v44 = vmul.f32 0.2, %v1091_v54  ;;  %vm1107_vm5 = vcmp.gt.f32.partialorder %v1091_v54, 0.0 }
 0x233   :  { %v1139_v36 = vsel %vm1107_vm5, %v1091_v54, %v1123_v44  ;;  %v615_v54 = vmul.f32 %v3669_v14, %v599_v43  ;;  %v598_v43 = vld [vmem:[#allocation3 + $0x8] sm:$0xff] }
 0x234   :  { %v3980_v6 = vadd.f32 %v4865_v26, %v1139_v36  ;;  %v602_v26 = vld [vmem:[#allocation3 + $0x28] sm:$0xff]  ;;  %v614_v23 = vmul.f32 %v3701_v63, %v598_v43  ;;  %v608_v63 = vld [vmem:[#allocation3 + $0x58] sm:$0xff] }
 0x235   :  { %1195 = vmax.xlane.f32.xlu2 %v3970_v39  ;;  %v618_v14 = vmul.f32 %v3714_v55, %v602_v26  ;;  %v697_v55 = vld [vmem:[#allocation4 + $0x18] sm:$0xff] }
 0x236   :  { %1205 = vmax.xlane.f32.xlu1 %v3974_v57 }
 0x23d   :  { %1201 = vmax.xlane.f32.xlu2 %v3980_v6 }
 0x252   :  { %v630_v53 = vpop.xlane.xlu0 %629  ;;  %v887_v50 = vpop.f32.mrf.mxu0 }
 0x253   :  { %v661_v56 = vadd.f32 %v630_v53, %v613_v10  ;;  %v927_v18 = vadd.f32 %v887_v50, %v790_v1 }
 0x255   :  { %678 = vst.msk [vmem:[#allocation3] sm:$0xff] %vm39_vm0, %v661_v56 }
 0x256   :  { %944 = vst.msk [vmem:[#allocation4] sm:$0xff] %vm104_vm1, %v927_v18 }
 0x259   :  { %v634_v4 = vpop.xlane.xlu1 %633 }
 0x25a   :  { %v636_v38 = vpop.xlane.xlu0 %635  ;;  %v663_v32 = vadd.f32 %v634_v4, %v615_v54  ;;  %v889_v44 = vpop.f32.mrf.mxu0  ;;  %v622_v4 = vmul.f32 %v3749_v35, %v606_v58  ;;  %v698_v35 = vld [vmem:[#allocation4 + $0x20] sm:$0xff] }
 0x25b   :  { %v664_v48 = vadd.f32 %v636_v38, %v616_v49  ;;  %v928_v36 = vadd.f32 %v889_v44, %v791_v11  ;;  %v793_v38 = vmul.f32 %v3827_v47, %v697_v55 }
 0x25c   :  { %680 = vst.msk [vmem:[#allocation3 + $0x10] sm:$0xff] %vm39_vm0, %v663_v32 }
 0x25d   :  { %681 = vst.msk [vmem:[#allocation3 + $0x18] sm:$0xff] %vm39_vm0, %v664_v48 }
 0x25e   :  { %945 = vst.msk [vmem:[#allocation4 + $0x8] sm:$0xff] %vm104_vm1, %v928_v36 }
 0x261   :  { %v640_v10 = vpop.xlane.xlu1 %639 }
 0x262   :  { %v642_v1 = vpop.xlane.xlu0 %641  ;;  %v666_v53 = vadd.f32 %v640_v10, %v618_v14  ;;  %v892_v56 = vpop.f32.mrf.mxu0  ;;  %v624_v14 = vmul.f32 %v3754_v27, %v608_v63  ;;  %v625_v10 = vmul.f32 %v3766_v51, %v609_v45  ;;  %v611_v27 = vld [vmem:[#allocation3 + $0x70] sm:$0xff]  ;;  %v612_v51 = vld [vmem:[#allocation3 + $0x78] sm:$0xff] }
 0x263   :  { %v667_v50 = vadd.f32 %v642_v1, %v619_v52  ;;  %v929_v18 = vadd.f32 %v892_v56, %v792_v42  ;;  %v794_v1 = vmul.f32 %v3839_v40, %v698_v35  ;;  %v699_v40 = vld [vmem:[#allocation4 + $0x28] sm:$0xff]  ;;  %v607_v63 = vld [vmem:[#allocation3 + $0x50] sm:$0xff]  ;;  %v4867_v35 = vld [vmem:[#allocation7_spill] sm:$0xff] }
 0x264   :  { %683 = vst.msk [vmem:[#allocation3 + $0x28] sm:$0xff] %vm39_vm0, %v666_v53 }
 0x265   :  { %684 = vst.msk [vmem:[#allocation3 + $0x30] sm:$0xff] %vm39_vm0, %v667_v50  ;;  %v702_v50 = vld [vmem:[#allocation4 + $0x40] sm:$0xff] }
 0x266   :  { %946 = vst.msk [vmem:[#allocation4 + $0x10] sm:$0xff] %vm104_vm1, %v929_v18  ;;  %v798_v58 = vmul.f32 %v3886_v8, %v702_v50  ;;  %v704_v50 = vld [vmem:[#allocation4 + $0x50] sm:$0xff] }
 0x268   :  { %v632_v54 = vpop.xlane.xlu2 %631 }
 0x269   :  { %v662_v49 = vadd.f32 %v632_v54, %v614_v23  ;;  %v646_v11 = vpop.xlane.xlu1 %645  ;;  %v620_v23 = vmul.f32 %v3703_v62, %v604_v31 }
 0x26a   :  { %v648_v32 = vpop.xlane.xlu0 %647  ;;  %v669_v44 = vadd.f32 %v646_v11, %v621_v17  ;;  %v894_v48 = vpop.f32.mrf.mxu0  ;;  %v4866_v11 = vld [vmem:[#allocation9_spill] sm:$0xff] }
 0x26b   :  { %679 = vst.msk [vmem:[#allocation3 + $0x8] sm:$0xff] %vm39_vm0, %v662_v49  ;;  %v670_v36 = vadd.f32 %v648_v32, %v622_v4  ;;  %v930_v26 = vadd.f32 %v894_v48, %v793_v38  ;;  %v627_v49 = vmul.f32 %v3771_v33, %v611_v27  ;;  %v628_v38 = vmul.f32 %v4866_v11, %v612_v51  ;;  %v701_v51 = vld [vmem:[#allocation4 + $0x38] sm:$0xff] }
 0x26c   :  { %686 = vst.msk [vmem:[#allocation3 + $0x40] sm:$0xff] %vm39_vm0, %v669_v44  ;;  %v795_v44 = vmul.f32 %v3866_v46, %v699_v40  ;;  %v700_v46 = vld [vmem:[#allocation4 + $0x30] sm:$0xff] }
 0x26d   :  { %687 = vst.msk [vmem:[#allocation3 + $0x48] sm:$0xff] %vm39_vm0, %v670_v36  ;;  %v703_v36 = vld [vmem:[#allocation4 + $0x48] sm:$0xff] }
 0x26e   :  { %947 = vst.msk [vmem:[#allocation4 + $0x18] sm:$0xff] %vm104_vm1, %v930_v26  ;;  %v799_v33 = vmul.f32 %v3847_v21, %v703_v36 }
 0x270   :  { %v638_v47 = vpop.xlane.xlu2 %637 }
 0x271   :  { %v665_v52 = vadd.f32 %v638_v47, %v617_v13  ;;  %v652_v42 = vpop.xlane.xlu1 %651  ;;  %v623_v13 = vmul.f32 %v4867_v35, %v607_v63  ;;  %v4027_v47 = vld [vmem:[#allocation2 + $0x80] sm:$0xff]  ;;  %v4077_v63 = vld [vmem:[#allocation2 + $0x88] sm:$0xff] }
 0x272   :  { %v654_v53 = vpop.xlane.xlu0 %653  ;;  %v672_v56 = vadd.f32 %v652_v42, %v624_v14  ;;  %v897_v18 = vpop.f32.mrf.mxu0 }
 0x273   :  { %682 = vst.msk [vmem:[#allocation3 + $0x20] sm:$0xff] %vm39_vm0, %v665_v52  ;;  %v673_v43 = vadd.f32 %v654_v53, %v625_v10  ;;  %v931_v34 = vadd.f32 %v897_v18, %v794_v1  ;;  %v4029_v10 = vld [vmem:[#allocation2 + $0x90] sm:$0xff]  ;;  %v796_v53 = vmul.f32 %v3836_v16, %v700_v46  ;;  %v610_v16 = vld [vmem:[#allocation3 + $0x68] sm:$0xff] }
 0x274   :  { %689 = vst.msk [vmem:[#allocation3 + $0x58] sm:$0xff] %vm39_vm0, %v672_v56  ;;  %v4079_v46 = vld [vmem:[#allocation2 + $0xb0] sm:$0xff] }
 0x275   :  { %690 = vst.msk [vmem:[#allocation3 + $0x60] sm:$0xff] %vm39_vm0, %v673_v43 }
 0x276   :  { %948 = vst.msk [vmem:[#allocation4 + $0x20] sm:$0xff] %vm104_vm1, %v931_v34 }
 0x277   :  { %v907_v55 = vpop.f32.mrf.mxu2 }
 0x278   :  { %v935_v54 = vadd.f32 %v907_v55, %v798_v58  ;;  %v644_v17 = vpop.xlane.xlu2 %643  ;;  %v800_v58 = vmul.f32 %v3868_v7, %v704_v50  ;;  %v4868_v55 = vld [vmem:[#allocation8_spill] sm:$0xff] }
 0x279   :  { %v668_v4 = vadd.f32 %v644_v17, %v620_v23  ;;  %v658_v32 = vpop.xlane.xlu1 %657  ;;  %v626_v23 = vmul.f32 %v4868_v55, %v610_v16  ;;  %v4107_v16 = vld [vmem:[#allocation2 + $0xa0] sm:$0xff] }
 0x27a   :  { %952 = vst.msk [vmem:[#allocation4 + $0x40] sm:$0xff] %vm104_vm1, %v935_v54  ;;  %v660_v8 = vpop.xlane.xlu0 %659  ;;  %v675_v48 = vadd.f32 %v658_v32, %v627_v49  ;;  %v899_v26 = vpop.f32.mrf.mxu0  ;;  %v4053_v54 = vld [vmem:[#allocation2 + $0x98] sm:$0xff]  ;;  %v797_v32 = vmul.f32 %v3851_v12, %v701_v51  ;;  %v4109_v51 = vld [vmem:[#allocation2 + $0xc8] sm:$0xff] }
 0x27b   :  { %685 = vst.msk [vmem:[#allocation3 + $0x38] sm:$0xff] %vm39_vm0, %v668_v4  ;;  %v676_v15 = vadd.f32 %v660_v8, %v628_v38  ;;  %v932_v62 = vadd.f32 %v899_v26, %v795_v44  ;;  %v4055_v4 = vld [vmem:[#allocation2 + $0xa8] sm:$0xff]  ;;  %v705_v8 = vld [vmem:[#allocation4 + $0x58] sm:$0xff] }
 0x27c   :  { %692 = vst.msk [vmem:[#allocation3 + $0x70] sm:$0xff] %vm39_vm0, %v675_v48 }
 0x27d   :  { %693 = vst.msk [vmem:[#allocation3 + $0x78] sm:$0xff] %vm39_vm0, %v676_v15 }
 0x27e   :  { %949 = vst.msk [vmem:[#allocation4 + $0x28] sm:$0xff] %vm104_vm1, %v932_v62  ;;  %v801_v62 = vmul.f32 %v3904_v60, %v705_v8 }
 0x27f   :  { %v909_v45 = vpop.f32.mrf.mxu2 }
 0x280   :  { %v936_v14 = vadd.f32 %v909_v45, %v799_v33  ;;  %v650_v52 = vpop.xlane.xlu2 %649 }
 0x281   :  { %v671_v42 = vadd.f32 %v650_v52, %v623_v13  ;;  %v1176_v1 = vpop.xlane.xlu1 %1175  ;;  %v4081_v13 = vld [vmem:[#allocation2 + $0xc0] sm:$0xff] }
 0x282   :  { %953 = vst.msk [vmem:[#allocation4 + $0x48] sm:$0xff] %vm104_vm1, %v936_v14  ;;  %v1180_v56 = vpop.xlane.xlu0 %1179  ;;  %v4034_v21 = vmax.f32 %v4027_v47, %v1176_v1  ;;  %v902_v18 = vpop.f32.mrf.mxu0  ;;  %v706_v1 = vld [vmem:[#allocation4 + $0x60] sm:$0xff] }
 0x283   :  { %688 = vst.msk [vmem:[#allocation3 + $0x50] sm:$0xff] %vm39_vm0, %v671_v42  ;;  %v4038_v43 = vmax.f32 %v4029_v10, %v1180_v56  ;;  %v933_v34 = vadd.f32 %v902_v18, %v796_v53 }
 0x284   :  { %1763 = vst.msk [vmem:[#allocation2 + $0x80] sm:$0xff] %vm39_vm0, %v4034_v21  ;;  %1273 = vperm.xlu2 %2890, %v4034_v21  }
 0x285   :  { %1765 = vst.msk [vmem:[#allocation2 + $0x90] sm:$0xff] %vm39_vm0, %v4038_v43  ;;  %1283 = vperm.xlu1 %2889, %v4038_v43  }
 0x286   :  { %950 = vst.msk [vmem:[#allocation4 + $0x30] sm:$0xff] %vm104_vm1, %v933_v34  ;;  %v802_v34 = vmul.f32 %v3864_v37, %v706_v1  ;;  %v707_v37 = vld [vmem:[#allocation4 + $0x68] sm:$0xff] }
 0x287   :  { %v912_v40 = vpop.f32.mrf.mxu2 }
 0x288   :  { %v937_v17 = vadd.f32 %v912_v40, %v800_v58  ;;  %v656_v49 = vpop.xlane.xlu2 %655 }
 0x289   :  { %v674_v11 = vadd.f32 %v656_v49, %v626_v23  ;;  %v1182_v38 = vpop.xlane.xlu1 %1181  ;;  %v4111_v23 = vld [vmem:[#allocation2 + $0xd8] sm:$0xff] }
 0x28a   :  { %954 = vst.msk [vmem:[#allocation4 + $0x50] sm:$0xff] %vm104_vm1, %v937_v17  ;;  %v1186_v44 = vpop.xlane.xlu0 %1185  ;;  %v4060_v7 = vmax.f32 %v4053_v54, %v1182_v38  ;;  %v904_v48 = vpop.f32.mrf.mxu0 }
 0x28b   :  { %691 = vst.msk [vmem:[#allocation3 + $0x68] sm:$0xff] %vm39_vm0, %v674_v11  ;;  %v4064_v36 = vmax.f32 %v4055_v4, %v1186_v44  ;;  %v934_v26 = vadd.f32 %v904_v48, %v797_v32  ;;  %v709_v32 = vld [vmem:[#allocation4 + $0x78] sm:$0xff] }
 0x28c   :  { %v1226_v15 = vsub.f32 %v4053_v54, %v4060_v7  ;;  %1766 = vst.msk [vmem:[#allocation2 + $0x98] sm:$0xff] %vm39_vm0, %v4060_v7 }
 0x28d   :  { %1768 = vst.msk [vmem:[#allocation2 + $0xa8] sm:$0xff] %vm39_vm0, %v4064_v36  ;;  %1288 = vperm.xlu1 %2889, %v4060_v7  }
 0x28e   :  { %951 = vst.msk [vmem:[#allocation4 + $0x38] sm:$0xff] %vm104_vm1, %v934_v26  ;;  %v803_v26 = vmul.f32 %v3888_v41, %v707_v37  ;;  %v708_v41 = vld [vmem:[#allocation4 + $0x70] sm:$0xff] }
 0x28f   :  { %v914_v33 = vpop.f32.mrf.mxu2 }
 0x290   :  { %v938_v45 = vadd.f32 %v914_v33, %v801_v62  ;;  %v1178_v35 = vpop.xlane.xlu2 %1177  ;;  %v4139_v62 = vld [vmem:[#allocation2 + $0xb8] sm:$0xff] }
 0x291   :  { %v4084_v14 = vmax.f32 %v4077_v63, %v1178_v35  ;;  %v1188_v52 = vpop.xlane.xlu1 %1187 }
 0x292   :  { %955 = vst.msk [vmem:[#allocation4 + $0x58] sm:$0xff] %vm104_vm1, %v938_v45  ;;  %v1192_v42 = vpop.xlane.xlu0 %1191  ;;  %v4088_v60 = vmax.f32 %v4079_v46, %v1188_v52  ;;  %v4141_v45 = vld [vmem:[#allocation2 + $0xe0] sm:$0xff] }
 0x293   :  { %v1224_v53 = vsub.f32 %v4077_v63, %v4084_v14  ;;  %1764 = vst.msk [vmem:[#allocation2 + $0x88] sm:$0xff] %vm39_vm0, %v4084_v14  ;;  %v4095_v56 = vmax.f32 %v4081_v13, %v1192_v42  ;;  %1278 = vperm.xlu0 %2888, %v4084_v14   ;;  %v4143_v42 = vld [vmem:[#allocation2 + $0xf0] sm:$0xff]  ;;  %v4870_v63 = vsub.f32 %v4029_v10, %v4038_v43 }
 0x294   :  { %1769 = vst.msk [vmem:[#allocation2 + $0xb0] sm:$0xff] %vm39_vm0, %v4088_v60  ;;  %v4871_v54 = vsub.f32 %v4079_v46, %v4088_v60 }
 0x295   :  { %1771 = vst.msk [vmem:[#allocation2 + $0xc0] sm:$0xff] %vm39_vm0, %v4095_v56  ;;  %v1243_v14 = vmul.f32 1.442695, %v4870_v63 }
 0x296   :  { %v1251_v7 = vmul.f32 1.442695, %v4871_v54  ;;  %v1408_v54 = vld [vmem:[#allocation3 + $0xc0] sm:$0xff] }
 0x297   :  { %v917_v58 = vpop.f32.mrf.mxu2 }
 0x298   :  { %v939_v40 = vadd.f32 %v917_v58, %v802_v34  ;;  %v1184_v55 = vpop.xlane.xlu2 %1183 }
 0x299   :  { %v4114_v17 = vmax.f32 %v4107_v16, %v1184_v55  ;;  %v1194_v49 = vpop.xlane.xlu1 %1193 }
 0x29a   :  { %956 = vst.msk [vmem:[#allocation4 + $0x60] sm:$0xff] %vm104_vm1, %v939_v40  ;;  %v1198_v11 = vpop.xlane.xlu0 %1197  ;;  %v4118_v38 = vmax.f32 %v4109_v51, %v1194_v49 }
 0x29b   :  { %1767 = vst.msk [vmem:[#allocation2 + $0xa0] sm:$0xff] %vm39_vm0, %v4114_v17  ;;  %v4125_v44 = vmax.f32 %v4111_v23, %v1198_v11  ;;  %1313 = vperm.xlu0 %2888, %v4095_v56   ;;  %1293 = vperm.xlu1 %2889, %v4114_v17  }
 0x29c   :  { %1772 = vst.msk [vmem:[#allocation2 + $0xc8] sm:$0xff] %vm39_vm0, %v4118_v38  ;;  %1318 = vperm.xlu2 %2890, %v4118_v38   ;;  %v4873_v10 = vsub.f32 %v4109_v51, %v4118_v38 }
 0x29d   :  { %1774 = vst.msk [vmem:[#allocation2 + $0xd8] sm:$0xff] %vm39_vm0, %v4125_v44 }
 0x29e   :  { %v1257_v43 = vmul.f32 1.442695, %v4873_v10 }
 0x29f   :  { %v919_v33 = vpop.f32.mrf.mxu2 }
 0x2a0   :  { %v940_v35 = vadd.f32 %v919_v33, %v803_v26  ;;  %v1190_v52 = vpop.xlane.xlu2 %1189  ;;  %v804_v26 = vmul.f32 %v3925_v25, %v708_v41  ;;  %v4170_v33 = vld [vmem:[#allocation2 + $0xd0] sm:$0xff] }
 0x2a1   :  { %v4146_v1 = vmax.f32 %v4139_v62, %v1190_v52  ;;  %v1200_v34 = vpop.xlane.xlu1 %1199  ;;  %v4172_v52 = vld [vmem:[#allocation2 + $0xf8] sm:$0xff] }
 0x2a2   :  { %957 = vst.msk [vmem:[#allocation4 + $0x68] sm:$0xff] %vm104_vm1, %v940_v35  ;;  %v1204_v58 = vpop.xlane.xlu0 %1203  ;;  %v4150_v40 = vmax.f32 %v4141_v45, %v1200_v34 }
 0x2a3   :  { %1770 = vst.msk [vmem:[#allocation2 + $0xb8] sm:$0xff] %vm39_vm0, %v4146_v1  ;;  %v4157_v49 = vmax.f32 %v4143_v42, %v1204_v58  ;;  %1298 = vperm.xlu1 %2889, %v4064_v36  }
 0x2a4   :  { %1775 = vst.msk [vmem:[#allocation2 + $0xe0] sm:$0xff] %vm39_vm0, %v4150_v40  ;;  %1328 = vperm.xlu2 %2890, %v4125_v44   ;;  %v4875_v51 = vsub.f32 %v4141_v45, %v4150_v40 }
 0x2a5   :  { %1777 = vst.msk [vmem:[#allocation2 + $0xf0] sm:$0xff] %vm39_vm0, %v4157_v49 }
 0x2a6   :  { %v1263_v38 = vmul.f32 1.442695, %v4875_v51 }
 0x2a7   :  { %v922_v35 = vpop.f32.mrf.mxu2 }
 0x2a8   :  { %v941_v34 = vadd.f32 %v922_v35, %v804_v26  ;;  %v1196_v58 = vpop.xlane.xlu2 %1195  ;;  %v4192_v26 = vld [vmem:[#allocation2 + $0xe8] sm:$0xff] }
 0x2a9   :  { %v4175_v55 = vmax.f32 %v4170_v33, %v1196_v58  ;;  %v1206_v48 = vpop.xlane.xlu1 %1205 }
 0x2aa   :  { %958 = vst.msk [vmem:[#allocation4 + $0x70] sm:$0xff] %vm104_vm1, %v941_v34  ;;  %v4179_v37 = vmax.f32 %v4172_v52, %v1206_v48  ;;  %v805_v48 = vmul.f32 %v3884_v19, %v709_v32  ;;  %v2821_v19 = vld [vmem:[%s4818_s1 + $0x78] sm:$0xff]  ;;  %v2820_v32 = vld [vmem:[%s4818_s1 + $0x70] sm:$0xff] }
 0x2ab   :  { %1773 = vst.msk [vmem:[#allocation2 + $0xd0] sm:$0xff] %vm39_vm0, %v4175_v55  ;;  %1323 = vperm.xlu0 %2888, %v4175_v55   ;;  %1303 = vperm.xlu1 %2889, %v4088_v60  }
 0x2ac   :  { %1778 = vst.msk [vmem:[#allocation2 + $0xf8] sm:$0xff] %vm39_vm0, %v4179_v37  ;;  %1682 = vmatpush.bf16.msra.mxu1 %v2821_v19  ;;  %2869 = vmatpush.bf16.msra.mxu3 %v2821_v19  ;;  %v4878_v45 = vsub.f32 %v4172_v52, %v4179_v37 }
 0x2af   :  { %v924_v35 = vpop.f32.mrf.mxu2 }
 0x2b0   :  { %v942_v34 = vadd.f32 %v924_v35, %v805_v48  ;;  %v1202_v58 = vpop.xlane.xlu2 %1201  ;;  %1683 = vmatpush.bf16.msra.mxu1 %v2820_v32  ;;  %2870 = vmatpush.bf16.msra.mxu3 %v2820_v32  ;;  %v2819_v48 = vld [vmem:[%s4818_s1 + $0x68] sm:$0xff]  ;;  %v2817_v32 = vld [vmem:[%s4818_s1 + $0x58] sm:$0xff] }
 0x2b1   :  { %v4195_v25 = vmax.f32 %v4192_v26, %v1202_v58  ;;  %v2818_v58 = vld [vmem:[%s4818_s1 + $0x60] sm:$0xff] }
 0x2b2   :  { %959 = vst.msk [vmem:[#allocation4 + $0x78] sm:$0xff] %vm104_vm1, %v942_v34 }
 0x2b3   :  { %1776 = vst.msk [vmem:[#allocation2 + $0xe8] sm:$0xff] %vm39_vm0, %v4195_v25  ;;  %1338 = vperm.xlu2 %2890, %v4195_v25   ;;  %1333 = vperm.xlu0 %2888, %v4150_v40   ;;  %v1269_v40 = vmul.f32 1.442695, %v4878_v45 }
 0x2b4   :  { %1684 = vmatpush.bf16.msra.mxu1 %v2819_v48  ;;  %2871 = vmatpush.bf16.msra.mxu3 %v2819_v48  ;;  %v2816_v48 = vld [vmem:[%s4818_s1 + $0x50] sm:$0xff] }
 0x2b8   :  { %1685 = vmatpush.bf16.msra.mxu1 %v2818_v58  ;;  %2872 = vmatpush.bf16.msra.mxu3 %v2818_v58 }
 0x2bb   :  { %1343 = vperm.xlu0 %2888, %v4157_v49   ;;  %1348 = vperm.xlu2 %2890, %v4179_v37   ;;  %v1402_v37 = vld [vmem:[#allocation3 + $0x90] sm:$0xff] }
 0x2bc   :  { %1686 = vmatpush.bf16.msra.mxu1 %v2817_v32  ;;  %2873 = vmatpush.bf16.msra.mxu3 %v2817_v32 }
 0x2c0   :  { %1687 = vmatpush.bf16.msra.mxu1 %v2816_v48  ;;  %2874 = vmatpush.bf16.msra.mxu3 %v2816_v48 }
 0x2c3   :  { %1308 = vperm.xlu0 %2888, %v4146_v1  }
 0x2de   :  { %v1274_v35 = vpop.permute.xlu2 %1273 }
 0x2df   :  { %v1351_v34 = vsub.f32 %v3877_v5, %v1274_v35  ;;  %v2815_v5 = vld [vmem:[%s4818_s1 + $0x48] sm:$0xff]  ;;  %v2814_v35 = vld [vmem:[%s4818_s1 + $0x40] sm:$0xff] }
 0x2e0   :  { %1688 = vmatpush.bf16.msra.mxu1 %v2815_v5  ;;  %2875 = vmatpush.bf16.msra.mxu3 %v2815_v5 }
 0x2e1   :  { %v1367_v19 = vmul.f32 1.442695, %v1351_v34 }
 0x2e3   :  { %2957 = vpow2.f32 %v1367_v19 }
 0x2e4   :  { %1689 = vmatpush.bf16.msra.mxu1 %v2814_v35  ;;  %2876 = vmatpush.bf16.msra.mxu3 %v2814_v35 }
 0x2e9   :  { %v2958_v11 = vpop.eup %2957 }
 0x2ea   :  { %1432 = vadd.xlane.f32.xlu2 %v2958_v11 }
 0x2f6   :  { %v1319_v5 = vpop.permute.xlu2 %1318 }
 0x2f7   :  { %v1284_v34 = vpop.permute.xlu1 %1283  ;;  %v1360_v27 = vsub.f32 %v3940_v20, %v1319_v5 }
 0x2f8   :  { %v1353_v58 = vsub.f32 %v3881_v61, %v1284_v34 }
 0x2f9   :  { %v1385_v61 = vmul.f32 1.442695, %v1360_v27 }
 0x2fa   :  { %v1371_v19 = vmul.f32 1.442695, %v1353_v58 }
 0x2fc   :  { %2959 = vpow2.f32 %v1371_v19 }
 0x2ff   :  { %v1289_v32 = vpop.permute.xlu1 %1288 }
 0x300   :  { %v1354_v41 = vsub.f32 %v3897_v0, %v1289_v32 }
 0x302   :  { %v2960_v18 = vpop.eup %2959  ;;  %v1373_v8 = vmul.f32 1.442695, %v1354_v41 }
 0x303   :  { %1436 = vadd.xlane.f32.xlu0 %v2960_v18 }
 0x304   :  { %2961 = vpow2.f32 %v1373_v8 }
 0x305   :  { %v1279_v48 = vpop.permute.xlu0 %1278 }
 0x306   :  { %v1352_v12 = vsub.f32 %v3913_v29, %v1279_v48  ;;  %v1329_v29 = vpop.permute.xlu2 %1328 }
 0x308   :  { %v1369_v50 = vmul.f32 1.442695, %v1352_v12 }
 0x30a   :  { %v2962_v35 = vpop.eup %2961  ;;  %2963 = vpow2.f32 %v1369_v50 }
 0x30b   :  { %1438 = vadd.xlane.f32.xlu2 %v2962_v35  ;;  %2965 = vpow2.f32 %v1385_v61 }
 0x30d   :  { %v1314_v34 = vpop.permute.xlu0 %1313  ;;  %v1294_v19 = vpop.permute.xlu1 %1293 }
 0x30e   :  { %v1359_v58 = vsub.f32 %v3921_v2, %v1314_v34  ;;  %v1355_v0 = vsub.f32 %v3936_v30, %v1294_v19  ;;  %v1362_v2 = vsub.f32 %v3944_v24, %v1329_v29 }
 0x310   :  { %v2964_v41 = vpop.eup %2963  ;;  %v1383_v32 = vmul.f32 1.442695, %v1359_v58  ;;  %v1375_v8 = vmul.f32 1.442695, %v1355_v0  ;;  %v1389_v61 = vmul.f32 1.442695, %v1362_v2 }
 0x311   :  { %1434 = vadd.xlane.f32.xlu1 %v2964_v41  ;;  %v1609_v31 = vpack.c.bf16 %v2964_v41, %v2958_v11  ;;  %v2966_v12 = vpop.eup %2965  ;;  %v1610_v41 = vpack.c.bf16 %v2962_v35, %v2960_v18 }
 0x312   :  { %2967 = vpow2.f32 %v1383_v32  ;;  %v1339_v32 = vpop.permute.xlu2 %1338 }
 0x313   :  { %1690 = vmatmul.bf16.vlgmr.msra.gmra.mxu1 %v1609_v31  ;;  %2969 = vpow2.f32 %v1375_v8 }
 0x315   :  { %v1299_v20 = vpop.permute.xlu1 %1298 }
 0x316   :  { %v1356_v27 = vsub.f32 %v3901_v59, %v1299_v20 }
 0x318   :  { %v2968_v50 = vpop.eup %2967  ;;  %v1377_v48 = vmul.f32 1.442695, %v1356_v27 }
 0x319   :  { %v1613_v5 = vpack.c.bf16 %v2966_v12, %v2968_v50  ;;  %v2970_v30 = vpop.eup %2969 }
 0x31a   :  { %2971 = vpow2.f32 %v1377_v48  ;;  %1440 = vadd.xlane.f32.xlu1 %v2970_v30 }
 0x31b   :  { %1710 = vmatmul.bf16.vlgmr.msra.gmra.mxu3 %v1613_v5  ;;  %2973 = vpow2.f32 %v1389_v61  ;;  %v1349_v5 = vpop.permute.xlu2 %1348 }
 0x31d   :  { %v1324_v34 = vpop.permute.xlu0 %1323  ;;  %v1304_v31 = vpop.permute.xlu1 %1303 }
 0x31e   :  { %v1361_v11 = vsub.f32 %v3970_v39, %v1324_v34  ;;  %v1357_v58 = vsub.f32 %v3917_v9, %v1304_v31  ;;  %v1364_v39 = vsub.f32 %v3980_v6, %v1339_v32  ;;  %v4869_v32 = vsub.f32 %v4027_v47, %v4034_v21 }
 0x31f   :  { %v4872_v47 = vsub.f32 %v4055_v4, %v4064_v36  ;;  %v4874_v4 = vsub.f32 %v4081_v13, %v4095_v56  ;;  %v4877_v13 = vsub.f32 %v4111_v23, %v4125_v44  ;;  %v4880_v23 = vsub.f32 %v4143_v42, %v4157_v49 }
 0x320   :  { %v1387_v19 = vmul.f32 1.442695, %v1361_v11  ;;  %v2972_v0 = vpop.eup %2971  ;;  %v1379_v59 = vmul.f32 1.442695, %v1357_v58  ;;  %v1393_v48 = vmul.f32 1.442695, %v1364_v39 }
 0x321   :  { %1442 = vadd.xlane.f32.xlu0 %v2972_v0  ;;  %v2974_v8 = vpop.eup %2973  ;;  %v1611_v34 = vpack.c.bf16 %v2972_v0, %v2970_v30  ;;  %v1249_v21 = vmul.f32 1.442695, %v4872_v47  ;;  %v1255_v36 = vmul.f32 1.442695, %v4874_v4  ;;  %v1261_v56 = vmul.f32 1.442695, %v4877_v13 }
 0x322   :  { %2975 = vpow2.f32 %v1387_v19  ;;  %v1267_v44 = vmul.f32 1.442695, %v4880_v23  ;;  %v1415_v23 = vld [vmem:[#allocation3 + $0xf8] sm:$0xff] }
 0x323   :  { %2977 = vpow2.f32 %v1379_v59  ;;  %1695 = vmatmul.bf16.gmra.mxu1 %v1610_v41  ;;  %v1245_v41 = vmul.f32 1.442695, %v1226_v15 }
 0x325   :  { %v1334_v24 = vpop.permute.xlu0 %1333 }
 0x326   :  { %v1363_v20 = vsub.f32 %v3958_v28, %v1334_v24  ;;  %v1366_v28 = vsub.f32 %v3974_v57, %v1349_v5  ;;  %v1241_v57 = vmul.f32 1.442695, %v1224_v53 }
 0x328   :  { %v2976_v29 = vpop.eup %2975  ;;  %v1391_v9 = vmul.f32 1.442695, %v1363_v20  ;;  %v1397_v58 = vmul.f32 1.442695, %v1366_v28  ;;  %v1400_v20 = vld [vmem:[#allocation3 + $0x80] sm:$0xff] }
 0x329   :  { %v2978_v27 = vpop.eup %2977  ;;  %v1614_v2 = vpack.c.bf16 %v2974_v8, %v2976_v29  ;;  %1448 = vadd.xlane.f32.xlu0 %v2968_v50 }
 0x32a   :  { %1444 = vadd.xlane.f32.xlu2 %v2978_v27  ;;  %2979 = vpow2.f32 %v1391_v9 }
 0x32b   :  { %1715 = vmatmul.bf16.gmra.mxu3 %v1614_v2  ;;  %2981 = vpow2.f32 %v1393_v48  ;;  %v4876_v48 = vsub.f32 %v4107_v16, %v4114_v17  ;;  %v4879_v16 = vsub.f32 %v4139_v62, %v4146_v1  ;;  %v4881_v62 = vsub.f32 %v4170_v33, %v4175_v55  ;;  %v1401_v55 = vld [vmem:[#allocation3 + $0x88] sm:$0xff] }
 0x32d   :  { %v1344_v18 = vpop.permute.xlu0 %1343  ;;  %v1253_v17 = vmul.f32 1.442695, %v4879_v16  ;;  %v1259_v1 = vmul.f32 1.442695, %v4881_v62 }
 0x32e   :  { %v1365_v35 = vsub.f32 %v3962_v3, %v1344_v18  ;;  %v1247_v18 = vmul.f32 1.442695, %v4876_v48  ;;  %v1414_v48 = vld [vmem:[#allocation3 + $0xf0] sm:$0xff] }
 0x330   :  { %v1395_v61 = vmul.f32 1.442695, %v1365_v35  ;;  %v2980_v50 = vpop.eup %2979 }
 0x331   :  { %1454 = vadd.xlane.f32.xlu0 %v2974_v8  ;;  %v2982_v31 = vpop.eup %2981  ;;  %v1239_v8 = vmul.f32 1.442695, %v4869_v32  ;;  %v1405_v32 = vld [vmem:[#allocation3 + $0xa8] sm:$0xff] }
 0x332   :  { %2983 = vpow2.f32 %v1395_v61  ;;  %1450 = vadd.xlane.f32.xlu2 %v2966_v12  ;;  %v1615_v3 = vpack.c.bf16 %v2982_v31, %v2980_v50 }
 0x333   :  { %1700 = vmatmul.bf16.gmra.mxu1 %v1611_v34 }
 0x335   :  { %v1309_v6 = vpop.permute.xlu0 %1308 }
 0x336   :  { %v1358_v11 = vsub.f32 %v3954_v22, %v1309_v6 }
 0x338   :  { %v2984_v19 = vpop.eup %2983  ;;  %v1381_v59 = vmul.f32 1.442695, %v1358_v11  ;;  %v1403_v11 = vld [vmem:[#allocation3 + $0x98] sm:$0xff] }
 0x339   :  { %1460 = vadd.xlane.f32.xlu0 %v2984_v19 }
 0x33a   :  { %2985 = vpow2.f32 %v1381_v59  ;;  %1456 = vadd.xlane.f32.xlu2 %v2980_v50 }
 0x33b   :  { %2987 = vpow2.f32 %v1397_v58  ;;  %1720 = vmatmul.bf16.gmra.mxu3 %v1615_v3 }
 0x33c   :  { %2989 = vpow2.f32 %v1241_v57 }
 0x33d   :  { %2991 = vpow2.f32 %v1245_v41 }
 0x33e   :  { %2993 = vpow2.f32 %v1239_v8 }
 0x33f   :  { %2995 = vpow2.f32 %v1243_v14 }
 0x340   :  { %v2986_v30 = vpop.eup %2985  ;;  %2997 = vpow2.f32 %v1251_v7  ;;  %v1406_v7 = vld [vmem:[#allocation3 + $0xb0] sm:$0xff] }
 0x341   :  { %v2988_v0 = vpop.eup %2987  ;;  %1446 = vadd.xlane.f32.xlu1 %v2986_v30  ;;  %v1612_v12 = vpack.c.bf16 %v2986_v30, %v2978_v27  ;;  %2999 = vpow2.f32 %v1249_v21 }
 0x342   :  { %1462 = vadd.xlane.f32.xlu2 %v2988_v0  ;;  %v1616_v22 = vpack.c.bf16 %v2988_v0, %v2984_v19  ;;  %v4253_v24 = vpop.eup %2989  ;;  %3001 = vpow2.f32 %v1257_v43  ;;  %v4882_v19 = vsub.f32 %v4192_v26, %v4195_v25  ;;  %v1404_v25 = vld [vmem:[#allocation3 + $0xa0] sm:$0xff]  ;;  %v1411_v43 = vld [vmem:[#allocation3 + $0xd8] sm:$0xff] }
 0x343   :  { %1705 = vmatmul.bf16.gmra.mxu1 %v1612_v12  ;;  %v2992_v15 = vpop.eup %2991  ;;  %3003 = vpow2.f32 %v1255_v36  ;;  %v1417_v30 = vmul.f32 %v4253_v24, %v1401_v55  ;;  %v1413_v55 = vld [vmem:[#allocation3 + $0xe8] sm:$0xff] }
 0x344   :  { %v2994_v53 = vpop.eup %2993  ;;  %3005 = vpow2.f32 %v1263_v38  ;;  %v1265_v59 = vmul.f32 1.442695, %v4882_v19  ;;  %v1498_v19 = vld [vmem:[#allocation4 + $0x88] sm:$0xff] }
 0x345   :  { %v1416_v27 = vmul.f32 %v2994_v53, %v1400_v20  ;;  %3007 = vpow2.f32 %v1247_v18  ;;  %v1412_v18 = vld [vmem:[#allocation3 + $0xe0] sm:$0xff] }
 0x346   :  { %3009 = vpow2.f32 %v1261_v56 }
 0x347   :  { %3011 = vpow2.f32 %v1269_v40 }
 0x348   :  { %3013 = vpow2.f32 %v1253_v17  ;;  %v1407_v17 = vld [vmem:[#allocation3 + $0xb8] sm:$0xff] }
 0x349   :  { %1452 = vadd.xlane.f32.xlu1 %v2976_v29  ;;  %v2996_v29 = vpop.eup %2995  ;;  %3015 = vpow2.f32 %v1267_v44 }
 0x34a   :  { %v4271_v39 = vpop.eup %2997  ;;  %v1418_v28 = vmul.f32 %v2996_v29, %v1402_v37  ;;  %3017 = vpow2.f32 %v1259_v1  ;;  %v1410_v1 = vld [vmem:[#allocation3 + $0xd0] sm:$0xff] }
 0x34b   :  { %1725 = vmatmul.bf16.gmra.mxu3 %v1616_v22  ;;  %v3000_v2 = vpop.eup %2999  ;;  %3019 = vpow2.f32 %v1265_v59  ;;  %v1422_v47 = vmul.f32 %v4271_v39, %v1406_v7 }
 0x34c   :  { %v4281_v9 = vpop.eup %3001  ;;  %v1421_v8 = vmul.f32 %v3000_v2, %v1405_v32 }
 0x34d   :  { %1520 = vperm.xlu0 %2888, %v4253_v24   ;;  %v3004_v35 = vpop.eup %3003 }
 0x34e   :  { %v4293_v5 = vpop.eup %3005 }
 0x34f   :  { %v3008_v61 = vpop.eup %3007 }
 0x350   :  { %v3010_v34 = vpop.eup %3009  ;;  %v1420_v26 = vmul.f32 %v3008_v61, %v1404_v25  ;;  %v1502_v25 = vld [vmem:[#allocation4 + $0xa8] sm:$0xff] }
 0x351   :  { %1458 = vadd.xlane.f32.xlu1 %v2982_v31  ;;  %v4302_v52 = vpop.eup %3011  ;;  %v1419_v31 = vmul.f32 %v2992_v15, %v1403_v11 }
 0x352   :  { %v4308_v49 = vpop.eup %3013 }
 0x353   :  { %v3016_v50 = vpop.eup %3015 }
 0x354   :  { %v4315_v33 = vpop.eup %3017  ;;  %v1430_v56 = vmul.f32 %v3016_v50, %v1414_v48 }
 0x355   :  { %1530 = vperm.xlu0 %2888, %v2992_v15   ;;  %v4321_v57 = vpop.eup %3019  ;;  %v1424_v15 = vmul.f32 %v3004_v35, %v1408_v54 }
 0x35a   :  { %1525 = vperm.xlu2 %2890, %v2996_v29  }
 0x35d   :  { %v1433_v46 = vpop.xlane.xlu2 %1432  ;;  %1545 = vperm.xlu0 %2888, %v4271_v39  }
 0x35e   :  { %v1464_v60 = vadd.f32 %v1433_v46, %v1416_v27  ;;  %v1409_v27 = vld [vmem:[#allocation3 + $0xc8] sm:$0xff] }
 0x35f   :  { %v1425_v4 = vmul.f32 %v4281_v9, %v1409_v27 }
 0x360   :  { %1480 = vst.msk [vmem:[#allocation3 + $0x80] sm:$0xff] %vm39_vm0, %v1464_v60  ;;  %v1427_v60 = vmul.f32 %v3010_v34, %v1411_v43 }
 0x362   :  { %1540 = vperm.xlu2 %2890, %v3000_v2  }
 0x365   :  { %1560 = vperm.xlu0 %2888, %v4281_v9  }
 0x36a   :  { %1555 = vperm.xlu2 %2890, %v3004_v35   ;;  %1515 = vperm.xlu1 %2889, %v2994_v53   ;;  %v1428_v35 = vmul.f32 %v4293_v5, %v1412_v18 }
 0x36d   :  { %1575 = vperm.xlu0 %2888, %v4293_v5  }
 0x372   :  { %1570 = vperm.xlu2 %2890, %v3010_v34   ;;  %1535 = vperm.xlu1 %2889, %v3008_v61   ;;  %v1423_v61 = vmul.f32 %v4308_v49, %v1407_v17  ;;  %v1431_v34 = vmul.f32 %v4302_v52, %v1415_v23  ;;  %v1509_v17 = vld [vmem:[#allocation4 + $0xe0] sm:$0xff] }
 0x375   :  { %1590 = vperm.xlu0 %2888, %v4302_v52  }
 0x376   :  { %v1437_v6 = vpop.xlane.xlu0 %1436 }
 0x377   :  { %v1466_v42 = vadd.f32 %v1437_v6, %v1418_v28 }
 0x379   :  { %1482 = vst.msk [vmem:[#allocation3 + $0x90] sm:$0xff] %vm39_vm0, %v1466_v42  ;;  %v1499_v42 = vld [vmem:[#allocation4 + $0x90] sm:$0xff] }
 0x37a   :  { %1585 = vperm.xlu2 %2890, %v3016_v50   ;;  %1550 = vperm.xlu1 %2889, %v4308_v49   ;;  %v1426_v50 = vmul.f32 %v4315_v33, %v1410_v1  ;;  %v1512_v1 = vld [vmem:[#allocation4 + $0xf8] sm:$0xff] }
 0x37e   :  { %v1439_v58 = vpop.xlane.xlu2 %1438 }
 0x37f   :  { %v1467_v3 = vadd.f32 %v1439_v58, %v1419_v31 }
 0x381   :  { %1483 = vst.msk [vmem:[#allocation3 + $0x98] sm:$0xff] %vm39_vm0, %v1467_v3 }
 0x382   :  { %1565 = vperm.xlu1 %2889, %v4315_v33   ;;  %v1429_v33 = vmul.f32 %v4321_v57, %v1413_v55  ;;  %v1507_v55 = vld [vmem:[#allocation4 + $0xd0] sm:$0xff] }
 0x384   :  { %v1435_v0 = vpop.xlane.xlu1 %1434 }
 0x385   :  { %v1465_v12 = vadd.f32 %v1435_v0, %v1417_v30 }
 0x387   :  { %1481 = vst.msk [vmem:[#allocation3 + $0x88] sm:$0xff] %vm39_vm0, %v1465_v12 }
 0x38a   :  { %1580 = vperm.xlu1 %2889, %v4321_v57  }
 0x38d   :  { %v1441_v22 = vpop.xlane.xlu1 %1440 }
 0x38e   :  { %v1468_v41 = vadd.f32 %v1441_v22, %v1420_v26 }
 0x390   :  { %1484 = vst.msk [vmem:[#allocation3 + $0xa0] sm:$0xff] %vm39_vm0, %v1468_v41  ;;  %v4325_v63 = vpop.f32.mrf.mxu1 }
 0x394   :  { %v1443_v14 = vpop.xlane.xlu0 %1442 }
 0x395   :  { %v1469_v24 = vadd.f32 %v1443_v14, %v1421_v8  ;;  %v1500_v8 = vld [vmem:[#allocation4 + $0x98] sm:$0xff] }
 0x397   :  { %1485 = vst.msk [vmem:[#allocation3 + $0xa8] sm:$0xff] %vm39_vm0, %v1469_v24 }
 0x398   :  { %v1693_v10 = vpop.f32.mrf.mxu1 }
 0x39c   :  { %v1449_v21 = vpop.xlane.xlu0 %1448 }
 0x39d   :  { %v1445_v53 = vpop.xlane.xlu2 %1444  ;;  %v1472_v29 = vadd.f32 %v1449_v21, %v1424_v15  ;;  %v1505_v21 = vld [vmem:[#allocation4 + $0xc0] sm:$0xff] }
 0x39e   :  { %v1470_v20 = vadd.f32 %v1445_v53, %v1422_v47  ;;  %v4331_v46 = vpop.f32.mrf.mxu3 }
 0x39f   :  { %1488 = vst.msk [vmem:[#allocation3 + $0xc0] sm:$0xff] %vm39_vm0, %v1472_v29  ;;  %v1503_v29 = vld [vmem:[#allocation4 + $0xb0] sm:$0xff] }
 0x3a0   :  { %1486 = vst.msk [vmem:[#allocation3 + $0xb0] sm:$0xff] %vm39_vm0, %v1470_v20  ;;  %v1696_v38 = vpop.f32.mrf.mxu1 }
 0x3a4   :  { %v1455_v36 = vpop.xlane.xlu0 %1454 }
 0x3a5   :  { %v1451_v2 = vpop.xlane.xlu2 %1450  ;;  %v1475_v51 = vadd.f32 %v1455_v36, %v1427_v60 }
 0x3a6   :  { %v1473_v39 = vadd.f32 %v1451_v2, %v1425_v4  ;;  %v4336_v13 = vpop.f32.mrf.mxu3  ;;  %v1508_v4 = vld [vmem:[#allocation4 + $0xd8] sm:$0xff] }
 0x3a7   :  { %1491 = vst.msk [vmem:[#allocation3 + $0xd8] sm:$0xff] %vm39_vm0, %v1475_v51 }
 0x3a8   :  { %1489 = vst.msk [vmem:[#allocation3 + $0xc8] sm:$0xff] %vm39_vm0, %v1473_v39  ;;  %v1698_v44 = vpop.f32.mrf.mxu1  ;;  %v1506_v39 = vld [vmem:[#allocation4 + $0xc8] sm:$0xff] }
 0x3ac   :  { %v1461_v45 = vpop.xlane.xlu0 %1460 }
 0x3ad   :  { %v1457_v40 = vpop.xlane.xlu2 %1456  ;;  %v1478_v16 = vadd.f32 %v1461_v45, %v1430_v56  ;;  %v1497_v56 = vld [vmem:[#allocation4 + $0x80] sm:$0xff] }
 0x3ae   :  { %v1476_v9 = vadd.f32 %v1457_v40, %v1428_v35  ;;  %v4343_v5 = vpop.f32.mrf.mxu3  ;;  %v1511_v35 = vld [vmem:[#allocation4 + $0xf0] sm:$0xff] }
 0x3af   :  { %1494 = vst.msk [vmem:[#allocation3 + $0xf0] sm:$0xff] %vm39_vm0, %v1478_v16 }
 0x3b0   :  { %1492 = vst.msk [vmem:[#allocation3 + $0xe0] sm:$0xff] %vm39_vm0, %v1476_v9  ;;  %v4348_v31 = vpop.f32.mrf.mxu1 }
 0x3b4   :  { %v1447_v37 = vpop.xlane.xlu1 %1446 }
 0x3b5   :  { %v1463_v28 = vpop.xlane.xlu2 %1462  ;;  %v1471_v6 = vadd.f32 %v1447_v37, %v1423_v61 }
 0x3b6   :  { %v1479_v62 = vadd.f32 %v1463_v28, %v1431_v34  ;;  %v1718_v30 = vpop.f32.mrf.mxu3  ;;  %v1501_v28 = vld [vmem:[#allocation4 + $0xa0] sm:$0xff] }
 0x3b7   :  { %1487 = vst.msk [vmem:[#allocation3 + $0xb8] sm:$0xff] %vm39_vm0, %v1471_v6 }
 0x3b8   :  { %1495 = vst.msk [vmem:[#allocation3 + $0xf8] sm:$0xff] %vm39_vm0, %v1479_v62  ;;  %v1703_v14 = vpop.f32.mrf.mxu1 }
 0x3bc   :  { %v1453_v11 = vpop.xlane.xlu1 %1452 }
 0x3bd   :  { %v1526_v49 = vpop.permute.xlu2 %1525  ;;  %v1474_v58 = vadd.f32 %v1453_v11, %v1426_v50 }
 0x3be   :  { %v1595_v52 = vmul.f32 %v1526_v49, %v1499_v42  ;;  %v1721_v15 = vpop.f32.mrf.mxu3  ;;  %v1504_v49 = vld [vmem:[#allocation4 + $0xb8] sm:$0xff] }
 0x3bf   :  { %1490 = vst.msk [vmem:[#allocation3 + $0xd0] sm:$0xff] %vm39_vm0, %v1474_v58  ;;  %v1521_v3 = vpop.permute.xlu0 %1520 }
 0x3c0   :  { %v1733_v59 = vadd.f32 %v1696_v38, %v1595_v52  ;;  %v1594_v0 = vmul.f32 %v1521_v3, %v1498_v19  ;;  %v1706_v27 = vpop.f32.mrf.mxu1 }
 0x3c2   :  { %1749 = vst.msk [vmem:[#allocation4 + $0x90] sm:$0xff] %vm104_vm1, %v1733_v59  ;;  %v1732_v12 = vadd.f32 %v1693_v10, %v1594_v0 }
 0x3c4   :  { %v1459_v26 = vpop.xlane.xlu1 %1458  ;;  %1748 = vst.msk [vmem:[#allocation4 + $0x88] sm:$0xff] %vm104_vm1, %v1732_v12  ;;  %v1510_v12 = vld [vmem:[#allocation4 + $0xe8] sm:$0xff] }
 0x3c5   :  { %v1541_v22 = vpop.permute.xlu2 %1540  ;;  %v1477_v41 = vadd.f32 %v1459_v26, %v1429_v33 }
 0x3c6   :  { %v1598_v32 = vmul.f32 %v1541_v22, %v1502_v25  ;;  %v1723_v36 = vpop.f32.mrf.mxu3 }
 0x3c7   :  { %1493 = vst.msk [vmem:[#allocation3 + $0xe8] sm:$0xff] %vm39_vm0, %v1477_v41  ;;  %v1531_v54 = vpop.permute.xlu0 %1530 }
 0x3c8   :  { %v1736_v24 = vadd.f32 %v1703_v14, %v1598_v32  ;;  %v1596_v7 = vmul.f32 %v1531_v54, %v1500_v8  ;;  %v1708_v59 = vpop.f32.mrf.mxu1 }
 0x3ca   :  { %1752 = vst.msk [vmem:[#allocation4 + $0xa8] sm:$0xff] %vm104_vm1, %v1736_v24  ;;  %v1734_v47 = vadd.f32 %v1698_v44, %v1596_v7 }
 0x3cc   :  { %1750 = vst.msk [vmem:[#allocation4 + $0x98] sm:$0xff] %vm104_vm1, %v1734_v47 }
 0x3cd   :  { %v1556_v57 = vpop.permute.xlu2 %1555 }
 0x3ce   :  { %v1601_v53 = vmul.f32 %v1556_v57, %v1505_v21  ;;  %v1726_v23 = vpop.f32.mrf.mxu3 }
 0x3cf   :  { %v1546_v10 = vpop.permute.xlu0 %1545 }
 0x3d0   :  { %v1739_v20 = vadd.f32 %v4331_v46, %v1601_v53  ;;  %v1599_v43 = vmul.f32 %v1546_v10, %v1503_v29 }
 0x3d2   :  { %1755 = vst.msk [vmem:[#allocation4 + $0xc0] sm:$0xff] %vm104_vm1, %v1739_v20  ;;  %v1737_v60 = vadd.f32 %v1706_v27, %v1599_v43 }
 0x3d4   :  { %1753 = vst.msk [vmem:[#allocation4 + $0xb0] sm:$0xff] %vm104_vm1, %v1737_v60 }
 0x3d5   :  { %v1571_v2 = vpop.permute.xlu2 %1570 }
 0x3d6   :  { %v1604_v51 = vmul.f32 %v1571_v2, %v1508_v4  ;;  %v1728_v11 = vpop.f32.mrf.mxu3 }
 0x3d7   :  { %v1561_v48 = vpop.permute.xlu0 %1560 }
 0x3d8   :  { %v1742_v38 = vadd.f32 %v1718_v30, %v1604_v51  ;;  %v1602_v18 = vmul.f32 %v1561_v48, %v1506_v39 }
 0x3da   :  { %1758 = vst.msk [vmem:[#allocation4 + $0xd8] sm:$0xff] %vm104_vm1, %v1742_v38  ;;  %v1740_v46 = vadd.f32 %v4336_v13, %v1602_v18 }
 0x3dc   :  { %v1516_v45 = vpop.permute.xlu1 %1515  ;;  %1756 = vst.msk [vmem:[#allocation4 + $0xc8] sm:$0xff] %vm104_vm1, %v1740_v46 }
 0x3dd   :  { %v1586_v40 = vpop.permute.xlu2 %1585  ;;  %v1593_v16 = vmul.f32 %v1516_v45, %v1497_v56 }
 0x3de   :  { %v1607_v9 = vmul.f32 %v1586_v40, %v1511_v35 }
 0x3df   :  { %v1731_v44 = vadd.f32 %v4325_v63, %v1593_v16  ;;  %v1576_v34 = vpop.permute.xlu0 %1575 }
 0x3e0   :  { %v1745_v61 = vadd.f32 %v1726_v23, %v1607_v9  ;;  %v1605_v37 = vmul.f32 %v1576_v34, %v1509_v17 }
 0x3e1   :  { %1747 = vst.msk [vmem:[#allocation4 + $0x80] sm:$0xff] %vm104_vm1, %v1731_v44 }
 0x3e2   :  { %1761 = vst.msk [vmem:[#allocation4 + $0xf0] sm:$0xff] %vm104_vm1, %v1745_v61  ;;  %v1743_v13 = vadd.f32 %v1721_v15, %v1605_v37 }
 0x3e4   :  { %v1536_v6 = vpop.permute.xlu1 %1535  ;;  %1759 = vst.msk [vmem:[#allocation4 + $0xe0] sm:$0xff] %vm104_vm1, %v1743_v13 }
 0x3e5   :  { %v1597_v62 = vmul.f32 %v1536_v6, %v1501_v28 }
 0x3e7   :  { %v1735_v42 = vadd.f32 %v4348_v31, %v1597_v62  ;;  %v1591_v50 = vpop.permute.xlu0 %1590 }
 0x3e8   :  { %v1608_v63 = vmul.f32 %v1591_v50, %v1512_v1 }
 0x3e9   :  { %1751 = vst.msk [vmem:[#allocation4 + $0xa0] sm:$0xff] %vm104_vm1, %v1735_v42 }
 0x3ea   :  { %v1746_v58 = vadd.f32 %v1728_v11, %v1608_v63 }
 0x3ec   :  { %v1551_v52 = vpop.permute.xlu1 %1550  ;;  %1762 = vst.msk [vmem:[#allocation4 + $0xf8] sm:$0xff] %vm104_vm1, %v1746_v58 }
 0x3ed   :  { %v1600_v19 = vmul.f32 %v1551_v52, %v1504_v49 }
 0x3ef   :  { %v1738_v3 = vadd.f32 %v1708_v59, %v1600_v19 }
 0x3f1   :  { %1754 = vst.msk [vmem:[#allocation4 + $0xb8] sm:$0xff] %vm104_vm1, %v1738_v3 }
 0x3f4   :  { %v1566_v30 = vpop.permute.xlu1 %1565 }
 0x3f5   :  { %v1603_v0 = vmul.f32 %v1566_v30, %v1507_v55 }
 0x3f7   :  { %v1741_v31 = vadd.f32 %v4343_v5, %v1603_v0 }
 0x3f9   :  { %1757 = vst.msk [vmem:[#allocation4 + $0xd0] sm:$0xff] %vm104_vm1, %v1741_v31 }
 0x3fc   :  { %v1581_v25 = vpop.permute.xlu1 %1580 }
 0x3fd   :  { %v1606_v33 = vmul.f32 %v1581_v25, %v1510_v12 }
 0x3ff   :  { %v1744_v26 = vadd.f32 %v1723_v36, %v1606_v33 }
 0x401   :  { %1760 = vst.msk [vmem:[#allocation4 + $0xe8] sm:$0xff] %vm104_vm1, %v1744_v26 }
 0x402 PF:  { %v1967_v22 = vld [vmem:[#allocation3 + $0xc0] sm:$0xff]  ;;  %v3129_v8 = vmov 0   ;;  %v1968_v5 = vld [vmem:[#allocation3 + $0xc8] sm:$0xff]  ;;  %v1793_v6 = vld [vmem:[#allocation3 + $0x58] sm:$0xff] }
 0x403   :  { %v1794_v41 = vld [vmem:[#allocation3 + $0x60] sm:$0xff]  ;;  %3023 = vset.pattern.permute.xlu2 %v3129_v8  ;;  %3022 = vset.pattern.permute.xlu1 %v3129_v8  ;;  %v1983_v14 = vmax.f32 %v1967_v22, 1e-20  ;;  %v1795_v7 = vld [vmem:[#allocation3 + $0x68] sm:$0xff]  ;;  %v1984_v47 = vmax.f32 %v1968_v5, 1e-20 }
 0x404   :  { %v1790_v32 = vld [vmem:[#allocation3 + $0x40] sm:$0xff]  ;;  %v1810_v24 = vmax.f32 %v1794_v41, 1e-20  ;;  %3021 = vset.pattern.permute.xlu0 %v3129_v8  ;;  %v1791_v15 = vld [vmem:[#allocation3 + $0x48] sm:$0xff]  ;;  %v1811_v21 = vmax.f32 %v1795_v7, 1e-20 }
 0x405   :  { %v1806_v54 = vmax.f32 %v1790_v32, 1e-20  ;;  %3028 = vrcp.f32 %v1983_v14  ;;  %v1807_v57 = vmax.f32 %v1791_v15, 1e-20  ;;  %v1782_v20 = vld [vmem:[#allocation3] sm:$0xff]  ;;  %v1972_v43 = vld [vmem:[#allocation3 + $0xe8] sm:$0xff] }
 0x406   :  { %3030 = vrcp.f32 %v1810_v24  ;;  %v1971_v27 = vld [vmem:[#allocation3 + $0xe0] sm:$0xff]  ;;  %v1798_v60 = vmax.f32 %v1782_v20, 1e-20  ;;  %v1988_v4 = vmax.f32 %v1972_v43, 1e-20  ;;  %v1787_v38 = vld [vmem:[#allocation3 + $0x28] sm:$0xff] }
 0x407   :  { %3032 = vrcp.f32 %v1806_v54  ;;  %v1987_v2 = vmax.f32 %v1971_v27, 1e-20  ;;  %v1786_v48 = vld [vmem:[#allocation3 + $0x20] sm:$0xff]  ;;  %v1783_v18 = vld [vmem:[#allocation3 + $0x8] sm:$0xff]  ;;  %v1803_v56 = vmax.f32 %v1787_v38, 1e-20 }
 0x408   :  { %3034 = vrcp.f32 %v1984_v47  ;;  %v1802_v46 = vmax.f32 %v1786_v48, 1e-20  ;;  %v1799_v45 = vmax.f32 %v1783_v18, 1e-20  ;;  %v1963_v9 = vld [vmem:[#allocation3 + $0xa0] sm:$0xff]  ;;  %v1960_v17 = vld [vmem:[#allocation3 + $0x88] sm:$0xff] }
 0x409   :  { %3036 = vrcp.f32 %v1811_v21  ;;  %v1959_v23 = vld [vmem:[#allocation3 + $0x80] sm:$0xff]  ;;  %v1979_v44 = vmax.f32 %v1963_v9, 1e-20  ;;  %v1976_v61 = vmax.f32 %v1960_v17, 1e-20  ;;  %v1792_v62 = vld [vmem:[#allocation3 + $0x50] sm:$0xff] }
 0x40a   :  { %3038 = vrcp.f32 %v1807_v57  ;;  %v1975_v37 = vmax.f32 %v1959_v23, 1e-20  ;;  %v1964_v1 = vld [vmem:[#allocation3 + $0xa8] sm:$0xff]  ;;  %v1809_v42 = vmax.f32 %v1793_v6, 1e-20  ;;  %v1969_v52 = vld [vmem:[#allocation3 + $0xd0] sm:$0xff] }
 0x40b   :  { %v3029_v53 = vpop.eup %3028  ;;  %3040 = vrcp.f32 %v1798_v60  ;;  %v1808_v50 = vmax.f32 %v1792_v62, 1e-20  ;;  %v1980_v11 = vmax.f32 %v1964_v1, 1e-20  ;;  %v1797_v19 = vld [vmem:[#allocation3 + $0x78] sm:$0xff]  ;;  %v1796_v59 = vld [vmem:[#allocation3 + $0x70] sm:$0xff] }
 0x40c   :  { %v3031_v29 = vpop.eup %3030  ;;  %2066 = vperm.xlu2 %3023, %v3029_v53   ;;  %3042 = vrcp.f32 %v1988_v4  ;;  %v1985_v3 = vmax.f32 %v1969_v52, 1e-20  ;;  %v1813_v55 = vmax.f32 %v1797_v19, 1e-20  ;;  %v1812_v0 = vmax.f32 %v1796_v59, 1e-20 }
 0x40d   :  { %v3033_v10 = vpop.eup %3032  ;;  %1908 = vperm.xlu1 %3022, %v3031_v29   ;;  %3044 = vrcp.f32 %v1987_v2  ;;  %v1974_v25 = vld [vmem:[#allocation3 + $0xf8] sm:$0xff]  ;;  %v1973_v33 = vld [vmem:[#allocation3 + $0xf0] sm:$0xff]  ;;  %v2016_v23 = vld [vmem:[#allocation4 + $0xc0] sm:$0xff] }
 0x40e   :  { %1888 = vperm.xlu0 %3021, %v3033_v10   ;;  %v3035_v36 = vpop.eup %3034  ;;  %3046 = vrcp.f32 %v1803_v56  ;;  %v1970_v26 = vld [vmem:[#allocation3 + $0xd8] sm:$0xff]  ;;  %v1990_v22 = vmax.f32 %v1974_v25, 1e-20  ;;  %v1989_v41 = vmax.f32 %v1973_v33, 1e-20  ;;  %v1788_v54 = vld [vmem:[#allocation3 + $0x30] sm:$0xff] }
 0x40f   :  { %v3037_v51 = vpop.eup %3036  ;;  %3048 = vrcp.f32 %v1802_v46  ;;  %v1986_v8 = vmax.f32 %v1970_v26, 1e-20  ;;  %v1785_v5 = vld [vmem:[#allocation3 + $0x18] sm:$0xff]  ;;  %v1784_v7 = vld [vmem:[#allocation3 + $0x10] sm:$0xff]  ;;  %v1804_v15 = vmax.f32 %v1788_v54, 1e-20 }
 0x410   :  { %v3039_v39 = vpop.eup %3038  ;;  %3050 = vrcp.f32 %v1799_v45  ;;  %v1801_v47 = vmax.f32 %v1785_v5, 1e-20  ;;  %v1800_v57 = vmax.f32 %v1784_v7, 1e-20  ;;  %v1962_v20 = vld [vmem:[#allocation3 + $0x98] sm:$0xff]  ;;  %v1961_v10 = vld [vmem:[#allocation3 + $0x90] sm:$0xff] }
 0x411   :  { %v3041_v35 = vpop.eup %3040  ;;  %3052 = vrcp.f32 %v1979_v44  ;;  %v1789_v43 = vld [vmem:[#allocation3 + $0x38] sm:$0xff]  ;;  %v1978_v27 = vmax.f32 %v1962_v20, 1e-20  ;;  %v1977_v60 = vmax.f32 %v1961_v10, 1e-20  ;;  %v1965_v38 = vld [vmem:[#allocation3 + $0xb0] sm:$0xff] }
 0x412   :  { %v3043_v40 = vpop.eup %3042  ;;  %3054 = vrcp.f32 %v1976_v61  ;;  %v1981_v56 = vmax.f32 %v1965_v38, 1e-20  ;;  %v1838_v44 = vld [vmem:[#allocation4 + $0x40] sm:$0xff]  ;;  %v2017_v1 = vld [vmem:[#allocation4 + $0xc8] sm:$0xff] }
 0x413   :  { %v3045_v16 = vpop.eup %3044  ;;  %3056 = vrcp.f32 %v1975_v37  ;;  %v4381_v62 = vld [vmem:[%s4822_s5] ss:$0 sm:$0xff] }
 0x414   :  { %2071 = vperm.xlu2 %3023, %v3035_v36   ;;  %v3047_v34 = vpop.eup %3046  ;;  %3058 = vrcp.f32 %v1809_v42  ;;  %v1805_v36 = vmax.f32 %v1789_v43, 1e-20  ;;  %v2012_v7 = vld [vmem:[#allocation4 + $0xa0] sm:$0xff] }
 0x415   :  { %1913 = vperm.xlu1 %3022, %v3037_v51   ;;  %v3049_v28 = vpop.eup %3048  ;;  %3060 = vrcp.f32 %v1808_v50  ;;  %v1839_v50 = vld [vmem:[#allocation4 + $0x48] sm:$0xff]  ;;  %v2008_v38 = vld [vmem:[#allocation4 + $0x80] sm:$0xff] }
 0x416   :  { %1893 = vperm.xlu0 %3021, %v3039_v39   ;;  %v3051_v13 = vpop.eup %3050  ;;  %3062 = vrcp.f32 %v1980_v11  ;;  %v1966_v39 = vld [vmem:[#allocation3 + $0xb8] sm:$0xff] }
 0x417   :  { %v3053_v63 = vpop.eup %3052  ;;  %3064 = vrcp.f32 %v1985_v3  ;;  %v1982_v48 = vmax.f32 %v1966_v39, 1e-20  ;;  %v1830_v39 = vld [vmem:[#allocation4] sm:$0xff] }
 0x418   :  { %v3055_v49 = vpop.eup %3054  ;;  %3066 = vrcp.f32 %v1813_v55  ;;  %v1843_v55 = vld [vmem:[#allocation4 + $0x68] sm:$0xff] }
 0x419   :  { %v3057_v58 = vpop.eup %3056  ;;  %3068 = vrcp.f32 %v1812_v0  ;;  %v2021_v0 = vld [vmem:[#allocation4 + $0xe8] sm:$0xff] }
 0x41a   :  { %v3059_v30 = vpop.eup %3058  ;;  %3070 = vrcp.f32 %v1990_v22 }
 0x41b   :  { %v3061_v31 = vpop.eup %3060  ;;  %3072 = vrcp.f32 %v1989_v41 }
 0x41c   :  { %1848 = vperm.xlu2 %3023, %v3041_v35   ;;  %v3063_v12 = vpop.eup %3062  ;;  %3074 = vrcp.f32 %v1986_v8 }
 0x41d   :  { %2091 = vperm.xlu1 %3022, %v3043_v40   ;;  %v3065_v32 = vpop.eup %3064  ;;  %3076 = vrcp.f32 %v1804_v15 }
 0x41e   :  { %2086 = vperm.xlu0 %3021, %v3045_v16   ;;  %v3067_v14 = vpop.eup %3066  ;;  %3078 = vrcp.f32 %v1801_v47 }
 0x41f   :  { %v3069_v24 = vpop.eup %3068  ;;  %3080 = vrcp.f32 %v1800_v57 }
 0x420   :  { %v3071_v21 = vpop.eup %3070  ;;  %3082 = vrcp.f32 %v1978_v27 }
 0x421   :  { %v3073_v53 = vpop.eup %3072  ;;  %3084 = vrcp.f32 %v1977_v60 }
 0x422   :  { %v3075_v29 = vpop.eup %3074  ;;  %3086 = vrcp.f32 %v1805_v36 }
 0x423   :  { %v3077_v4 = vpop.eup %3076  ;;  %3088 = vrcp.f32 %v1982_v48 }
 0x424   :  { %1873 = vperm.xlu2 %3023, %v3047_v34   ;;  %v3079_v2 = vpop.eup %3078  ;;  %3090 = vrcp.f32 %v1981_v56 }
 0x425   :  { %1868 = vperm.xlu1 %3022, %v3049_v28   ;;  %v3081_v51 = vpop.eup %3080 }
 0x426   :  { %1853 = vperm.xlu0 %3021, %v3051_v13   ;;  %v3083_v18 = vpop.eup %3082 }
 0x427   :  { %v3085_v46 = vpop.eup %3084 }
 0x428   :  { %v3087_v35 = vpop.eup %3086 }
 0x429   :  { %v3089_v45 = vpop.eup %3088 }
 0x42a   :  { %v3091_v40 = vpop.eup %3090 }
 0x42c   :  { %2046 = vperm.xlu2 %3023, %v3053_v63  }
 0x42d   :  { %2031 = vperm.xlu1 %3022, %v3055_v49  }
 0x42e   :  { %2026 = vperm.xlu0 %3021, %v3057_v58  }
 0x434   :  { %1903 = vperm.xlu2 %3023, %v3059_v30  }
 0x435   :  { %1898 = vperm.xlu1 %3022, %v3061_v31   ;;  %v1842_v31 = vld [vmem:[#allocation4 + $0x60] sm:$0xff] }
 0x436   :  { %2051 = vperm.xlu0 %3021, %v3063_v12   ;;  %v2020_v12 = vld [vmem:[#allocation4 + $0xe0] sm:$0xff] }
 0x43c   :  { %2076 = vperm.xlu2 %3023, %v3065_v32  }
 0x43d   :  { %1923 = vperm.xlu1 %3022, %v3067_v14  }
 0x43e   :  { %1918 = vperm.xlu0 %3021, %v3069_v24  }
 0x444   :  { %2101 = vperm.xlu2 %3023, %v3071_v21   ;;  %v1834_v21 = vld [vmem:[#allocation4 + $0x20] sm:$0xff] }
 0x445   :  { %2096 = vperm.xlu1 %3022, %v3073_v53  }
 0x446   :  { %2081 = vperm.xlu0 %3021, %v3075_v29  }
 0x44c   :  { %1878 = vperm.xlu2 %3023, %v3077_v4  }
 0x44d   :  { %1863 = vperm.xlu1 %3022, %v3079_v2   ;;  %v1831_v2 = vld [vmem:[#allocation4 + $0x8] sm:$0xff] }
 0x44e   :  { %1858 = vperm.xlu0 %3021, %v3081_v51   ;;  %v2009_v51 = vld [vmem:[#allocation4 + $0x88] sm:$0xff] }
 0x454   :  { %2041 = vperm.xlu2 %3023, %v3083_v18  }
 0x455   :  { %2036 = vperm.xlu1 %3022, %v3085_v46  }
 0x456   :  { %1883 = vperm.xlu0 %3021, %v3087_v35  }
 0x45d   :  { %2061 = vperm.xlu1 %3022, %v3089_v45  }
 0x45e   :  { %2056 = vperm.xlu0 %3021, %v3091_v40  }
 0x466   :  { %v2067_v16 = vpop.permute.xlu2 %2066 }
 0x467   :  { %v2112_v61 = vmul.f32 %v2067_v16, %v2016_v23 }
 0x46e   :  { %v2072_v9 = vpop.permute.xlu2 %2071 }
 0x46f   :  { %v2113_v63 = vmul.f32 %v2072_v9, %v2017_v1  ;;  %v2013_v1 = vld [vmem:[#allocation4 + $0xa8] sm:$0xff] }
 0x476   :  { %v4374_v17 = vpop.permute.xlu2 %1848 }
 0x477   :  { %v1926_v16 = vmul.f32 %v4374_v17, %v1830_v39 }
 0x47e   :  { %v4376_v13 = vpop.permute.xlu2 %1873 }
 0x47f   :  { %v1909_v34 = vpop.permute.xlu1 %1908 }
 0x480   :  { %v1889_v37 = vpop.permute.xlu0 %1888  ;;  %v1938_v32 = vmul.f32 %v1909_v34, %v1842_v31  ;;  %v2018_v34 = vld [vmem:[#allocation4 + $0xd0] sm:$0xff] }
 0x481   :  { %v1934_v28 = vmul.f32 %v1889_v37, %v1838_v44 }
 0x483   :  { %v2128_v6 = vadd.f32 %v2112_v61, %v1934_v28  ;;  %v1840_v28 = vld [vmem:[#allocation4 + $0x50] sm:$0xff] }
 0x485   :  { %v2144_v42 = vmul.f32 0.5, %v2128_v6  ;;  %v1835_v6 = vld [vmem:[#allocation4 + $0x28] sm:$0xff] }
 0x486   :  { %v2047_v3 = vpop.permute.xlu2 %2046 }
 0x487   :  { %v1914_v11 = vpop.permute.xlu1 %1913  ;;  %v4384_v49 = vadd.f32 %v4381_v62, %v2144_v42  ;;  %v2108_v20 = vmul.f32 %v2047_v3, %v2012_v7 }
 0x488   :  { %v1894_v58 = vpop.permute.xlu0 %1893  ;;  %v1939_v26 = vmul.f32 %v1914_v11, %v1843_v55 }
 0x489   :  { %v1935_v52 = vmul.f32 %v1894_v58, %v1839_v50  ;;  %v2197_v19 = vsel %vm104_vm1, %v4384_v49, 0.0 }
 0x48a   :  { %2198 = vadd.xlane.f32.xlu2 %v2197_v19  ;;  %v1931_v19 = vmul.f32 %v4376_v13, %v1835_v6 }
 0x48b   :  { %v2129_v59 = vadd.f32 %v2113_v63, %v1935_v52 }
 0x48d   :  { %v2145_v30 = vmul.f32 0.5, %v2129_v59 }
 0x48e   :  { %v4393_v47 = vpop.permute.xlu2 %1903 }
 0x48f   :  { %v2092_v25 = vpop.permute.xlu1 %2091  ;;  %v4389_v33 = vadd.f32 %v4381_v62, %v2145_v30 }
 0x490   :  { %v2117_v22 = vmul.f32 %v2092_v25, %v2021_v0  ;;  %v2087_v41 = vpop.permute.xlu0 %2086 }
 0x491   :  { %v2116_v8 = vmul.f32 %v2087_v41, %v2020_v12  ;;  %v2200_v14 = vsel %vm104_vm1, %v4389_v33, 0.0  ;;  %v2023_v12 = vld [vmem:[#allocation4 + $0xf8] sm:$0xff] }
 0x492   :  { %v2133_v24 = vadd.f32 %v2117_v22, %v1939_v26  ;;  %2201 = vadd.xlane.f32.xlu0 %v2200_v14  ;;  %v1845_v26 = vld [vmem:[#allocation4 + $0x78] sm:$0xff] }
 0x493   :  { %v2132_v54 = vadd.f32 %v2116_v8, %v1938_v32 }
 0x494   :  { %v2149_v5 = vmul.f32 0.5, %v2133_v24 }
 0x495   :  { %v2148_v15 = vmul.f32 0.5, %v2132_v54 }
 0x496   :  { %v4396_v57 = vadd.f32 %v4381_v62, %v2149_v5  ;;  %v2077_v18 = vpop.permute.xlu2 %2076 }
 0x497   :  { %v1869_v53 = vpop.permute.xlu1 %1868  ;;  %v4399_v29 = vadd.f32 %v4381_v62, %v2148_v15  ;;  %v2114_v11 = vmul.f32 %v2077_v18, %v2018_v34 }
 0x498   :  { %v1930_v10 = vmul.f32 %v1869_v53, %v1834_v21  ;;  %v1854_v43 = vpop.permute.xlu0 %1853  ;;  %v2212_v27 = vsel %vm104_vm1, %v4396_v57, 0.0  ;;  %v1844_v21 = vld [vmem:[#allocation4 + $0x70] sm:$0xff] }
 0x499   :  { %v2209_v60 = vsel %vm104_vm1, %v4399_v29, 0.0  ;;  %2213 = vadd.xlane.f32.xlu2 %v2212_v27  ;;  %v1927_v46 = vmul.f32 %v1854_v43, %v1831_v2  ;;  %v2022_v53 = vld [vmem:[#allocation4 + $0xf0] sm:$0xff] }
 0x49a   :  { %v2124_v4 = vadd.f32 %v2108_v20, %v1930_v10  ;;  %2210 = vadd.xlane.f32.xlu1 %v2209_v60  ;;  %v1841_v20 = vld [vmem:[#allocation4 + $0x58] sm:$0xff] }
 0x49b   :  { %v2019_v10 = vld [vmem:[#allocation4 + $0xd8] sm:$0xff] }
 0x49c   :  { %v2140_v36 = vmul.f32 0.5, %v2124_v4 }
 0x49e   :  { %v4406_v48 = vadd.f32 %v4381_v62, %v2140_v36  ;;  %v2102_v59 = vpop.permute.xlu2 %2101 }
 0x49f   :  { %v2032_v56 = vpop.permute.xlu1 %2031  ;;  %v2119_v13 = vmul.f32 %v2102_v59, %v2023_v12  ;;  %v2014_v12 = vld [vmem:[#allocation4 + $0xb0] sm:$0xff] }
 0x4a0   :  { %v2105_v35 = vmul.f32 %v2032_v56, %v2009_v51  ;;  %v2027_v45 = vpop.permute.xlu0 %2026  ;;  %v2185_v40 = vsel %vm104_vm1, %v4406_v48, 0.0  ;;  %v1937_v51 = vmul.f32 %v4393_v47, %v1841_v20 }
 0x4a1   :  { %v2104_v9 = vmul.f32 %v2027_v45, %v2008_v38 }
 0x4a2   :  { %v2121_v23 = vadd.f32 %v2105_v35, %v1927_v46  ;;  %2186 = vadd.xlane.f32.xlu1 %v2185_v40  ;;  %v2011_v46 = vld [vmem:[#allocation4 + $0x98] sm:$0xff] }
 0x4a3   :  { %v2120_v44 = vadd.f32 %v2104_v9, %v1926_v16  ;;  %v1833_v40 = vld [vmem:[#allocation4 + $0x18] sm:$0xff] }
 0x4a4   :  { %v2137_v61 = vmul.f32 0.5, %v2121_v23 }
 0x4a5   :  { %v2136_v37 = vmul.f32 0.5, %v2120_v44 }
 0x4a6   :  { %v4412_v42 = vadd.f32 %v4381_v62, %v2137_v61  ;;  %v1879_v7 = vpop.permute.xlu2 %1878 }
 0x4a7   :  { %v1899_v50 = vpop.permute.xlu1 %1898  ;;  %v4415_v63 = vadd.f32 %v4381_v62, %v2136_v37 }
 0x4a8   :  { %v1936_v58 = vmul.f32 %v1899_v50, %v1840_v28  ;;  %v2052_v17 = vpop.permute.xlu0 %2051  ;;  %v2176_v52 = vsel %vm104_vm1, %v4412_v42, 0.0  ;;  %v2010_v50 = vld [vmem:[#allocation4 + $0x90] sm:$0xff] }
 0x4a9   :  { %v2109_v3 = vmul.f32 %v2052_v17, %v2013_v1  ;;  %2177 = vadd.xlane.f32.xlu0 %v2176_v52  ;;  %v2173_v55 = vsel %vm104_vm1, %v4415_v63, 0.0  ;;  %v1832_v1 = vld [vmem:[#allocation4 + $0x10] sm:$0xff] }
 0x4aa   :  { %v2130_v30 = vadd.f32 %v2114_v11, %v1936_v58  ;;  %2174 = vadd.xlane.f32.xlu2 %v2173_v55 }
 0x4ab   :  { %v2125_v0 = vadd.f32 %v2109_v3, %v1931_v19 }
 0x4ac   :  { %v2146_v31 = vmul.f32 0.5, %v2130_v30  ;;  %v1837_v30 = vld [vmem:[#allocation4 + $0x38] sm:$0xff] }
 0x4ad   :  { %v2141_v25 = vmul.f32 0.5, %v2125_v0  ;;  %v2015_v0 = vld [vmem:[#allocation4 + $0xb8] sm:$0xff] }
 0x4ae   :  { %v4423_v22 = vadd.f32 %v4381_v62, %v2146_v31  ;;  %v2042_v35 = vpop.permute.xlu2 %2041  ;;  %v1836_v31 = vld [vmem:[#allocation4 + $0x30] sm:$0xff] }
 0x4af   :  { %v1924_v41 = vpop.permute.xlu1 %1923  ;;  %v4426_v32 = vadd.f32 %v4381_v62, %v2141_v25  ;;  %v2107_v44 = vmul.f32 %v2042_v35, %v2011_v46 }
 0x4b0   :  { %v1941_v8 = vmul.f32 %v1924_v41, %v1845_v26  ;;  %v1919_v14 = vpop.permute.xlu0 %1918  ;;  %v2203_v24 = vsel %vm104_vm1, %v4423_v22, 0.0 }
 0x4b1   :  { %v2188_v54 = vsel %vm104_vm1, %v4426_v32, 0.0  ;;  %2204 = vadd.xlane.f32.xlu0 %v2203_v24  ;;  %v1940_v60 = vmul.f32 %v1919_v14, %v1844_v21  ;;  %v1932_v24 = vmul.f32 %v1879_v7, %v1836_v31  ;;  %v3130_v7 = vmov 32.0  }
 0x4b2   :  { %v2135_v5 = vadd.f32 %v2119_v13, %v1941_v8  ;;  %2189 = vadd.xlane.f32.xlu2 %v2188_v54  ;;  %3092 = vrcp.f32 %v3130_v7 }
 0x4b4   :  { %v2151_v15 = vmul.f32 0.5, %v2135_v5 }
 0x4b6   :  { %v4433_v43 = vadd.f32 %v4381_v62, %v2151_v15 }
 0x4b7   :  { %v2097_v27 = vpop.permute.xlu1 %2096 }
 0x4b8   :  { %v2118_v4 = vmul.f32 %v2097_v27, %v2022_v53  ;;  %v2082_v36 = vpop.permute.xlu0 %2081  ;;  %v2218_v2 = vsel %vm104_vm1, %v4433_v43, 0.0 }
 0x4b9   :  { %v2115_v39 = vmul.f32 %v2082_v36, %v2019_v10  ;;  %2219 = vadd.xlane.f32.xlu0 %v2218_v2 }
 0x4ba   :  { %v2134_v38 = vadd.f32 %v2118_v4, %v1940_v60  ;;  %v3093_v4 = vpop.eup %3092 }
 0x4bb   :  { %v2131_v18 = vadd.f32 %v2115_v39, %v1937_v51  ;;  %v2222_v36 = vmul.f32 32.0, %v3093_v4  ;;  %vm2226_vm0 = vweird.f32 %v3093_v4 }
 0x4bc   :  { %v2150_v56 = vmul.f32 0.5, %v2134_v38 }
 0x4bd   :  { %v2147_v45 = vmul.f32 0.5, %v2131_v18  ;;  %v2223_v2 = vsub.f32 1.0, %v2222_v36 }
 0x4be   :  { %v4439_v16 = vadd.f32 %v4381_v62, %v2150_v56 }
 0x4bf   :  { %v1864_v9 = vpop.permute.xlu1 %1863  ;;  %v4442_v23 = vadd.f32 %v4381_v62, %v2147_v45  ;;  %v2224_v51 = vmul.f32 %v3093_v4, %v2223_v2 }
 0x4c0   :  { %v1929_v61 = vmul.f32 %v1864_v9, %v1833_v40  ;;  %v1859_v34 = vpop.permute.xlu0 %1858  ;;  %v2215_v47 = vsel %vm104_vm1, %v4439_v16, 0.0 }
 0x4c1   :  { %2216 = vadd.xlane.f32.xlu2 %v2215_v47  ;;  %v2206_v37 = vsel %vm104_vm1, %v4442_v23, 0.0  ;;  %v1928_v17 = vmul.f32 %v1859_v34, %v1832_v1  ;;  %v2225_v39 = vadd.f32 %v3093_v4, %v2224_v51 }
 0x4c2   :  { %v2123_v28 = vadd.f32 %v2107_v44, %v1929_v61  ;;  %2207 = vadd.xlane.f32.xlu1 %v2206_v37 }
 0x4c3   :  { %v4468_v38 = vsel %vm2226_vm0, %v3093_v4, %v2225_v39 }
 0x4c4   :  { %v2139_v6 = vmul.f32 0.5, %v2123_v28 }
 0x4c6   :  { %v4449_v11 = vadd.f32 %v4381_v62, %v2139_v6 }
 0x4c7   :  { %v2037_v58 = vpop.permute.xlu1 %2036 }
 0x4c8   :  { %v2106_v52 = vmul.f32 %v2037_v58, %v2010_v50  ;;  %v1884_v19 = vpop.permute.xlu0 %1883  ;;  %v2182_v59 = vsel %vm104_vm1, %v4449_v11, 0.0 }
 0x4c9   :  { %2183 = vadd.xlane.f32.xlu2 %v2182_v59  ;;  %v1933_v41 = vmul.f32 %v1884_v19, %v1837_v30 }
 0x4ca   :  { %v2122_v3 = vadd.f32 %v2106_v52, %v1928_v17 }
 0x4cc   :  { %v2138_v55 = vmul.f32 0.5, %v2122_v3 }
 0x4ce   :  { %v4454_v25 = vadd.f32 %v4381_v62, %v2138_v55 }
 0x4cf   :  { %v2062_v26 = vpop.permute.xlu1 %2061 }
 0x4d0   :  { %v2111_v13 = vmul.f32 %v2062_v26, %v2015_v0  ;;  %v2057_v8 = vpop.permute.xlu0 %2056  ;;  %v2179_v14 = vsel %vm104_vm1, %v4454_v25, 0.0 }
 0x4d1   :  { %v2110_v54 = vmul.f32 %v2057_v8, %v2014_v12  ;;  %2180 = vadd.xlane.f32.xlu1 %v2179_v14 }
 0x4d2   :  { %v2127_v5 = vadd.f32 %v2111_v13, %v1933_v41 }
 0x4d3   :  { %v2126_v15 = vadd.f32 %v2110_v54, %v1932_v24 }
 0x4d4   :  { %v2143_v21 = vmul.f32 0.5, %v2127_v5 }
 0x4d5   :  { %v2142_v53 = vmul.f32 0.5, %v2126_v15 }
 0x4d6   :  { %v4459_v20 = vadd.f32 %v4381_v62, %v2143_v21 }
 0x4d7   :  { %v4462_v10 = vadd.f32 %v4381_v62, %v2142_v53 }
 0x4d8   :  { %v2194_v27 = vsel %vm104_vm1, %v4459_v20, 0.0 }
 0x4d9   :  { %2195 = vadd.xlane.f32.xlu1 %v2194_v27  ;;  %v2191_v60 = vsel %vm104_vm1, %v4462_v10, 0.0 }
 0x4da   :  { %2192 = vadd.xlane.f32.xlu0 %v2191_v60 }
 0x4fd   :  { %v2199_v62 = vpop.xlane.xlu2 %2198 }
 0x4fe   :  { %v2236_v18 = vmul.f32 %v4468_v38, %v2199_v62 }
 0x500   :  { %v4472_v56 = vsub.f32 %v4384_v49, %v2236_v18 }
 0x502   :  { %v2268_v46 = vmul.f32 %v4472_v56, %v4472_v56 }
 0x504   :  { %v2300_v35 = vsel %vm104_vm1, %v2268_v46, 0.0 }
 0x505   :  { %v2202_v45 = vpop.xlane.xlu0 %2201  ;;  %2301 = vadd.xlane.f32.xlu2 %v2300_v35 }
 0x506   :  { %v2237_v40 = vmul.f32 %v4468_v38, %v2202_v45 }
 0x508   :  { %v4479_v9 = vsub.f32 %v4389_v33, %v2237_v40 }
 0x50a   :  { %v2269_v44 = vmul.f32 %v4479_v9, %v4479_v9 }
 0x50c   :  { %v2303_v61 = vsel %vm104_vm1, %v2269_v44, 0.0  ;;  %v2214_v34 = vpop.xlane.xlu2 %2213 }
 0x50d   :  { %v2211_v49 = vpop.xlane.xlu1 %2210  ;;  %2304 = vadd.xlane.f32.xlu0 %v2303_v61  ;;  %v2241_v47 = vmul.f32 %v4468_v38, %v2214_v34 }
 0x50e   :  { %v2240_v37 = vmul.f32 %v4468_v38, %v2211_v49 }
 0x50f   :  { %v4487_v28 = vsub.f32 %v4396_v57, %v2241_v47 }
 0x510   :  { %v4490_v6 = vsub.f32 %v4399_v29, %v2240_v37 }
 0x511   :  { %v2273_v33 = vmul.f32 %v4487_v28, %v4487_v28 }
 0x512   :  { %v2272_v1 = vmul.f32 %v4490_v6, %v4490_v6 }
 0x513   :  { %v2315_v50 = vsel %vm104_vm1, %v2273_v33, 0.0 }
 0x514   :  { %v2312_v58 = vsel %vm104_vm1, %v2272_v1, 0.0  ;;  %2316 = vadd.xlane.f32.xlu2 %v2315_v50 }
 0x515   :  { %v2187_v17 = vpop.xlane.xlu1 %2186  ;;  %2313 = vadd.xlane.f32.xlu1 %v2312_v58 }
 0x516   :  { %v2232_v52 = vmul.f32 %v4468_v38, %v2187_v17 }
 0x518   :  { %v4500_v57 = vsub.f32 %v4406_v48, %v2232_v52 }
 0x51a   :  { %v2264_v29 = vmul.f32 %v4500_v57, %v4500_v57 }
 0x51c   :  { %v2178_v19 = vpop.xlane.xlu0 %2177  ;;  %v2288_v59 = vsel %vm104_vm1, %v2264_v29, 0.0 }
 0x51d   :  { %v2229_v3 = vmul.f32 %v4468_v38, %v2178_v19  ;;  %2289 = vadd.xlane.f32.xlu2 %v2288_v59  ;;  %v2175_v55 = vpop.xlane.xlu2 %2174 }
 0x51e   :  { %v2228_v30 = vmul.f32 %v4468_v38, %v2175_v55 }
 0x51f   :  { %v4508_v0 = vsub.f32 %v4412_v42, %v2229_v3 }
 0x520   :  { %v4511_v31 = vsub.f32 %v4415_v63, %v2228_v30  ;;  %v2596_v30 = vld [vmem:[%s4825_s8] sm:$0xff] }
 0x521   :  { %v2261_v48 = vmul.f32 %v4508_v0, %v4508_v0 }
 0x522   :  { %v2260_v12 = vmul.f32 %v4511_v31, %v4511_v31 }
 0x523   :  { %v2279_v26 = vsel %vm104_vm1, %v2261_v48, 0.0  ;;  %v2597_v48 = vld [vmem:[%s4825_s8 + $0x8] sm:$0xff] }
 0x524   :  { %2280 = vadd.xlane.f32.xlu1 %v2279_v26  ;;  %v2205_v41 = vpop.xlane.xlu0 %2204  ;;  %v2276_v13 = vsel %vm104_vm1, %v2260_v12, 0.0  ;;  %v2600_v12 = vpack.c.bf16 %v2597_v48, %v2596_v30 }
 0x525   :  { %v2238_v8 = vmul.f32 %v4468_v38, %v2205_v41  ;;  %2277 = vadd.xlane.f32.xlu0 %v2276_v13  ;;  %v2190_v42 = vpop.xlane.xlu2 %2189 }
 0x526   :  { %v2233_v14 = vmul.f32 %v4468_v38, %v2190_v42 }
 0x527   :  { %v4522_v63 = vsub.f32 %v4423_v22, %v2238_v8 }
 0x528   :  { %v4525_v24 = vsub.f32 %v4426_v32, %v2233_v14 }
 0x529   :  { %v2270_v54 = vmul.f32 %v4522_v63, %v4522_v63 }
 0x52a   :  { %v2265_v5 = vmul.f32 %v4525_v24, %v4525_v24 }
 0x52b   :  { %v2306_v15 = vsel %vm104_vm1, %v2270_v54, 0.0 }
 0x52c   :  { %2307 = vadd.xlane.f32.xlu1 %v2306_v15  ;;  %v2220_v21 = vpop.xlane.xlu0 %2219  ;;  %v2291_v53 = vsel %vm104_vm1, %v2265_v5, 0.0 }
 0x52d   :  { %v2243_v27 = vmul.f32 %v4468_v38, %v2220_v21  ;;  %2292 = vadd.xlane.f32.xlu0 %v2291_v53 }
 0x52f   :  { %v4535_v22 = vsub.f32 %v4433_v43, %v2243_v27 }
 0x531   :  { %v2275_v32 = vmul.f32 %v4535_v22, %v4535_v22 }
 0x533   :  { %v2321_v60 = vsel %vm104_vm1, %v2275_v32, 0.0 }
 0x534   :  { %2322 = vadd.xlane.f32.xlu1 %v2321_v60  ;;  %v2217_v7 = vpop.xlane.xlu2 %2216 }
 0x535   :  { %v2208_v4 = vpop.xlane.xlu1 %2207  ;;  %v2242_v36 = vmul.f32 %v4468_v38, %v2217_v7 }
 0x536   :  { %v2239_v2 = vmul.f32 %v4468_v38, %v2208_v4 }
 0x537   :  { %v4543_v51 = vsub.f32 %v4439_v16, %v2242_v36 }
 0x538   :  { %v4546_v39 = vsub.f32 %v4442_v23, %v2239_v2 }
 0x539   :  { %v2274_v43 = vmul.f32 %v4543_v51, %v4543_v51 }
 0x53a   :  { %v2271_v62 = vmul.f32 %v4546_v39, %v4546_v39 }
 0x53b   :  { %v2318_v18 = vsel %vm104_vm1, %v2274_v43, 0.0 }
 0x53c   :  { %v2309_v46 = vsel %vm104_vm1, %v2271_v62, 0.0  ;;  %2319 = vadd.xlane.f32.xlu0 %v2318_v18  ;;  %v2184_v35 = vpop.xlane.xlu2 %2183 }
 0x53d   :  { %2310 = vadd.xlane.f32.xlu2 %v2309_v46  ;;  %v2231_v45 = vmul.f32 %v4468_v38, %v2184_v35 }
 0x53f   :  { %v4556_v16 = vsub.f32 %v4449_v11, %v2231_v45  ;;  %v4603_v45 = vld [vmem:[%s4823_s6] ss:$0 sm:$0xff] }
 0x541   :  { %v2263_v23 = vmul.f32 %v4556_v16, %v4556_v16 }
 0x543   :  { %v2285_v40 = vsel %vm104_vm1, %v2263_v23, 0.0 }
 0x544   :  { %v2181_v44 = vpop.xlane.xlu1 %2180  ;;  %2286 = vadd.xlane.f32.xlu0 %v2285_v40 }
 0x545   :  { %v2230_v61 = vmul.f32 %v4468_v38, %v2181_v44 }
 0x547   :  { %v4563_v34 = vsub.f32 %v4454_v25, %v2230_v61 }
 0x549   :  { %v2262_v49 = vmul.f32 %v4563_v34, %v4563_v34 }
 0x54b   :  { %v2282_v47 = vsel %vm104_vm1, %v2262_v49, 0.0 }
 0x54c   :  { %v2196_v37 = vpop.xlane.xlu1 %2195  ;;  %2283 = vadd.xlane.f32.xlu2 %v2282_v47 }
 0x54d   :  { %v2235_v11 = vmul.f32 %v4468_v38, %v2196_v37  ;;  %v2193_v33 = vpop.xlane.xlu0 %2192 }
 0x54e   :  { %v2234_v1 = vmul.f32 %v4468_v38, %v2193_v33  ;;  %v4612_v33 = vld [vmem:[%s4824_s7] ss:$0 sm:$0xff] }
 0x54f   :  { %v4571_v50 = vsub.f32 %v4459_v20, %v2235_v11  ;;  %v2598_v20 = vld [vmem:[%s4825_s8 + $0x10] sm:$0xff] }
 0x550   :  { %v4574_v58 = vsub.f32 %v4462_v10, %v2234_v1  ;;  %v2599_v10 = vld [vmem:[%s4825_s8 + $0x18] sm:$0xff] }
 0x551   :  { %v2267_v25 = vmul.f32 %v4571_v50, %v4571_v50  ;;  %v2601_v59 = vpack.c.bf16 %v2599_v10, %v2598_v20 }
 0x552   :  { %v2266_v17 = vmul.f32 %v4574_v58, %v4574_v58 }
 0x553   :  { %v2297_v52 = vsel %vm104_vm1, %v2267_v25, 0.0  ;;  %2878 = vmatpush.bf16.msra.mxu2 %v2601_v59  ;;  %2879 = vmatpush.bf16.msra.mxu3 %v2601_v59 }
 0x554   :  { %v2294_v29 = vsel %vm104_vm1, %v2266_v17, 0.0  ;;  %2298 = vadd.xlane.f32.xlu2 %v2297_v52  ;;  %2636 = vmatpush.bf16.msra.mxu0 %v2601_v59 }
 0x555   :  { %2295 = vadd.xlane.f32.xlu1 %v2294_v29  ;;  %2877 = vmatpush.bf16.msra.mxu1 %v2601_v59 }
 0x557   :  { %2881 = vmatpush.bf16.msra.mxu2 %v2600_v12  ;;  %2882 = vmatpush.bf16.msra.mxu3 %v2600_v12 }
 0x558   :  { %2637 = vmatpush.bf16.msra.mxu0 %v2600_v12 }
 0x559   :  { %2880 = vmatpush.bf16.msra.mxu1 %v2600_v12 }
 0x578   :  { %v2302_v19 = vpop.xlane.xlu2 %2301 }
 0x579   :  { %v2332_v3 = vmul.f32 %v2302_v19, %v4468_v38 }
 0x57b   :  { %v2348_v55 = vadd.f32 1e-05, %v2332_v3 }
 0x57d   :  { %3094 = vrsqrt.f32 %v2348_v55  ;;  %vm2442_vm7 = vweird.f32 %v2348_v55 }
 0x580   :  { %v2305_v26 = vpop.xlane.xlu0 %2304 }
 0x581   :  { %v2333_v41 = vmul.f32 %v2305_v26, %v4468_v38 }
 0x583   :  { %v3095_v13 = vpop.eup %3094  ;;  %v2349_v8 = vadd.f32 1e-05, %v2333_v41 }
 0x584   :  { %v2437_v42 = vmul.f32 %v3095_v13, %v2348_v55  ;;  %vm2443_vm6 = vweird.f32 %v3095_v13 }
 0x585   :  { %3096 = vrsqrt.f32 %v2349_v8  ;;  %vm2444_vm8 = vmor %vm2442_vm7, %vm2443_vm6  ;;  %vm2452_vm10 = vweird.f32 %v2349_v8 }
 0x586   :  { %v2438_v14 = vmul.f32 %v3095_v13, %v2437_v42 }
 0x587   :  { %v2317_v54 = vpop.xlane.xlu2 %2316 }
 0x588   :  { %v2439_v5 = vmul.f32 0.5, %v2438_v14  ;;  %v2314_v15 = vpop.xlane.xlu1 %2313  ;;  %v2337_v21 = vmul.f32 %v2317_v54, %v4468_v38 }
 0x589   :  { %v2336_v53 = vmul.f32 %v2314_v15, %v4468_v38 }
 0x58a   :  { %v2440_v27 = vsub.f32 1.5, %v2439_v5  ;;  %v2353_v32 = vadd.f32 1e-05, %v2337_v21 }
 0x58b   :  { %v3097_v60 = vpop.eup %3096  ;;  %v2352_v7 = vadd.f32 1e-05, %v2336_v53 }
 0x58c   :  { %v2441_v4 = vmul.f32 %v3095_v13, %v2440_v27  ;;  %v2447_v36 = vmul.f32 %v3097_v60, %v2349_v8  ;;  %3098 = vrsqrt.f32 %v2353_v32  ;;  %vm2453_vm9 = vweird.f32 %v3097_v60 }
 0x58d   :  { %3100 = vrsqrt.f32 %v2352_v7  ;;  %vm2454_vm11 = vmor %vm2452_vm10, %vm2453_vm9  ;;  %vm2492_vm14 = vweird.f32 %v2353_v32  ;;  %vm2482_vm15 = vweird.f32 %v2352_v7 }
 0x58e   :  { %v2445_v2 = vsel %vm2444_vm8, %v3095_v13, %v2441_v4  ;;  %v2448_v43 = vmul.f32 %v3097_v60, %v2447_v36 }
 0x58f   :  { %v2524_v35 = vmul.f32 %v2445_v2, %v4472_v56 }
 0x590   :  { %v2449_v62 = vmul.f32 0.5, %v2448_v43  ;;  %v2290_v18 = vpop.xlane.xlu2 %2289 }
 0x591   :  { %v2328_v46 = vmul.f32 %v2290_v18, %v4468_v38  ;;  %v2544_v56 = vmul.f32 %v4603_v45, %v2524_v35 }
 0x592   :  { %v3099_v23 = vpop.eup %3098  ;;  %v2450_v40 = vsub.f32 1.5, %v2449_v62 }
 0x593   :  { %v3101_v44 = vpop.eup %3100  ;;  %v2487_v61 = vmul.f32 %v3099_v23, %v2353_v32  ;;  %v4605_v49 = vadd.f32 1e-05, %v2328_v46  ;;  %vm2493_vm12 = vweird.f32 %v3099_v23  ;;  %v2564_v30 = vadd.f32 %v4612_v33, %v2544_v56 }
 0x594   :  { %v2451_v47 = vmul.f32 %v3097_v60, %v2450_v40  ;;  %v2477_v37 = vmul.f32 %v3101_v44, %v2352_v7  ;;  %vm2483_vm13 = vweird.f32 %v3101_v44  ;;  %vm2494_vm2 = vmor %vm2492_vm14, %vm2493_vm12 }
 0x595   :  { %v2488_v11 = vmul.f32 %v3099_v23, %v2487_v61  ;;  %3102 = vrsqrt.f32 %v4605_v49  ;;  %vm2484_vm3 = vmor %vm2482_vm15, %vm2483_vm13  ;;  %v2580_v54 = vmax.f32 %v2564_v30, 0.0  ;;  %vm2402_vm5 = vweird.f32 %v4605_v49 }
 0x596   :  { %v2455_v1 = vsel %vm2454_vm11, %v3097_v60, %v2451_v47  ;;  %v2478_v25 = vmul.f32 %v3101_v44, %v2477_v37 }
 0x597   :  { %v2489_v17 = vmul.f32 0.5, %v2488_v11  ;;  %v2281_v52 = vpop.xlane.xlu1 %2280  ;;  %v2525_v29 = vmul.f32 %v2455_v1, %v4479_v9 }
 0x598   :  { %v2479_v20 = vmul.f32 0.5, %v2478_v25  ;;  %v2325_v10 = vmul.f32 %v2281_v52, %v4468_v38  ;;  %v2278_v19 = vpop.xlane.xlu0 %2277 }
 0x599   :  { %v2490_v59 = vsub.f32 1.5, %v2489_v17  ;;  %v2324_v3 = vmul.f32 %v2278_v19, %v4468_v38  ;;  %v2545_v55 = vmul.f32 %v4603_v45, %v2525_v29 }
 0x59a   :  { %v2480_v48 = vsub.f32 1.5, %v2479_v20  ;;  %v4619_v12 = vadd.f32 1e-05, %v2325_v10 }
 0x59b   :  { %v4621_v26 = vpop.eup %3102  ;;  %v2491_v41 = vmul.f32 %v3099_v23, %v2490_v59  ;;  %v4623_v9 = vadd.f32 1e-05, %v2324_v3  ;;  %v2565_v13 = vadd.f32 %v4612_v33, %v2545_v55 }
 0x59c   :  { %v2481_v8 = vmul.f32 %v3101_v44, %v2480_v48  ;;  %v2397_v42 = vmul.f32 %v4621_v26, %v4605_v49  ;;  %3104 = vrsqrt.f32 %v4619_v12  ;;  %vm2403_vm4 = vweird.f32 %v4621_v26 }
 0x59d   :  { %v2495_v14 = vsel %vm2494_vm2, %v3099_v23, %v2491_v41  ;;  %3106 = vrsqrt.f32 %v4623_v9  ;;  %v2581_v21 = vmax.f32 %v2565_v13, 0.0  ;;  %vm4658_vm7 = vmor %vm2402_vm5, %vm2403_vm4  ;;  %vm2372_vm8 = vweird.f32 %v4619_v12 }
 0x59e   :  { %v2485_v5 = vsel %vm2484_vm3, %v3101_v44, %v2481_v8  ;;  %v2398_v15 = vmul.f32 %v4621_v26, %v2397_v42  ;;  %v2529_v53 = vmul.f32 %v2495_v14, %v4487_v28  ;;  %vm2362_vm10 = vweird.f32 %v4623_v9 }
 0x59f   :  { %v2308_v27 = vpop.xlane.xlu1 %2307  ;;  %v2528_v32 = vmul.f32 %v2485_v5, %v4490_v6  ;;  %v2592_v4 = vpack.c.bf16 %v2581_v21, %v2580_v54 }
 0x5a0   :  { %v2334_v60 = vmul.f32 %v2308_v27, %v4468_v38  ;;  %v2293_v7 = vpop.xlane.xlu0 %2292  ;;  %v2549_v36 = vmul.f32 %v4603_v45, %v2529_v53  ;;  %v2399_v18 = vmul.f32 0.5, %v2398_v15 }
 0x5a1   :  { %v2329_v2 = vmul.f32 %v2293_v7, %v4468_v38  ;;  %v2548_v43 = vmul.f32 %v4603_v45, %v2528_v32  ;;  %2802 = vmatmul.msk.bf16.vlgmr.msra.gmra.mxu2 %vm104_vm1, %v2592_v4 }
 0x5a2   :  { %v3105_v62 = vpop.eup %3104  ;;  %v4638_v46 = vadd.f32 1e-05, %v2334_v60  ;;  %v2569_v28 = vadd.f32 %v4612_v33, %v2549_v36  ;;  %v2400_v47 = vsub.f32 1.5, %v2399_v18 }
 0x5a3   :  { %v3107_v35 = vpop.eup %3106  ;;  %v2367_v6 = vmul.f32 %v3105_v62, %v4619_v12  ;;  %v4643_v23 = vadd.f32 1e-05, %v2329_v2  ;;  %v2568_v40 = vadd.f32 %v4612_v33, %v2548_v43  ;;  %vm2373_vm0 = vweird.f32 %v3105_v62 }
 0x5a4   :  { %v2357_v44 = vmul.f32 %v3107_v35, %v4623_v9  ;;  %3108 = vrsqrt.f32 %v4638_v46  ;;  %v2585_v56 = vmax.f32 %v2569_v28, 0.0  ;;  %v2401_v19 = vmul.f32 %v4621_v26, %v2400_v47  ;;  %vm2374_vm9 = vmor %vm2372_vm8, %vm2373_vm0 }
 0x5a5   :  { %v2368_v61 = vmul.f32 %v3105_v62, %v2367_v6  ;;  %3110 = vrsqrt.f32 %v4643_v23  ;;  %v2584_v11 = vmax.f32 %v2568_v40, 0.0  ;;  %vm2363_vm6 = vweird.f32 %v3107_v35 }
 0x5a6   :  { %v2358_v37 = vmul.f32 %v3107_v35, %v2357_v44  ;;  %vm2364_vm11 = vmor %vm2362_vm10, %vm2363_vm6  ;;  %v2405_v42 = vsel %vm4658_vm7, %v4621_v26, %v2401_v19  ;;  %vm2412_vm13 = vweird.f32 %v4643_v23  ;;  %vm2462_vm4 = vweird.f32 %v4638_v46 }
 0x5a7   :  { %v2369_v1 = vmul.f32 0.5, %v2368_v61  ;;  %v2323_v25 = vpop.xlane.xlu1 %2322  ;;  %v2594_v29 = vpack.c.bf16 %v2585_v56, %v2584_v11  ;;  %v2520_v26 = vmul.f32 %v2405_v42, %v4500_v57 }
 0x5a8   :  { %v2359_v17 = vmul.f32 0.5, %v2358_v37  ;;  %v2339_v52 = vmul.f32 %v2323_v25, %v4468_v38 }
 0x5a9   :  { %v2370_v20 = vsub.f32 1.5, %v2369_v1  ;;  %2804 = vmatmul.msk.bf16.vlgmr.msra.gmra.mxu3 %vm104_vm1, %v2594_v29 }
 0x5aa   :  { %v4652_v10 = vpop.eup %3108  ;;  %v2360_v59 = vsub.f32 1.5, %v2359_v17  ;;  %v4655_v3 = vadd.f32 1e-05, %v2339_v52 }
 0x5ab   :  { %v3111_v55 = vpop.eup %3110  ;;  %v2371_v48 = vmul.f32 %v3105_v62, %v2370_v20  ;;  %v2457_v49 = vmul.f32 %v4652_v10, %v4638_v46  ;;  %vm2463_vm2 = vweird.f32 %v4652_v10 }
 0x5ac   :  { %v2361_v41 = vmul.f32 %v3107_v35, %v2360_v59  ;;  %v2407_v13 = vmul.f32 %v3111_v55, %v4643_v23  ;;  %3112 = vrsqrt.f32 %v4655_v3  ;;  %vm2413_vm12 = vweird.f32 %v3111_v55  ;;  %vm4707_vm0 = vmor %vm2462_vm4, %vm2463_vm2 }
 0x5ad   :  { %v2375_v8 = vsel %vm2374_vm9, %v3105_v62, %v2371_v48  ;;  %v2458_v5 = vmul.f32 %v4652_v10, %v2457_v49  ;;  %vm2414_vm14 = vmor %vm2412_vm13, %vm2413_vm12  ;;  %vm2512_vm3 = vweird.f32 %v4655_v3 }
 0x5ae   :  { %v2365_v14 = vsel %vm2364_vm11, %v3107_v35, %v2361_v41  ;;  %v2408_v54 = vmul.f32 %v3111_v55, %v2407_v13  ;;  %v2517_v12 = vmul.f32 %v2375_v8, %v4508_v0  ;;  %v2540_v35 = vmul.f32 %v4603_v45, %v2520_v26 }
 0x5af   :  { %v2320_v15 = vpop.xlane.xlu0 %2319  ;;  %v2516_v21 = vmul.f32 %v2365_v14, %v4511_v31  ;;  %v2459_v31 = vmul.f32 0.5, %v2458_v5 }
 0x5b0   :  { %v2409_v9 = vmul.f32 0.5, %v2408_v54  ;;  %v2338_v53 = vmul.f32 %v2320_v15, %v4468_v38  ;;  %v2311_v27 = vpop.xlane.xlu2 %2310  ;;  %v2537_v32 = vmul.f32 %v4603_v45, %v2517_v12  ;;  %v2560_v17 = vadd.f32 %v4612_v33, %v2540_v35 }
 0x5b1   :  { %v2335_v60 = vmul.f32 %v2311_v27, %v4468_v38  ;;  %v2536_v7 = vmul.f32 %v4603_v45, %v2516_v21  ;;  %v2460_v61 = vsub.f32 1.5, %v2459_v31 }
 0x5b2   :  { %v3113_v4 = vpop.eup %3112  ;;  %v2410_v36 = vsub.f32 1.5, %v2409_v9  ;;  %v4679_v0 = vadd.f32 1e-05, %v2338_v53  ;;  %v2557_v2 = vadd.f32 %v4612_v33, %v2537_v32  ;;  %v2576_v49 = vmax.f32 %v2560_v17, 0.0 }
 0x5b3   :  { %v2507_v43 = vmul.f32 %v3113_v4, %v4655_v3  ;;  %v4683_v62 = vadd.f32 1e-05, %v2335_v60  ;;  %v2556_v28 = vadd.f32 %v4612_v33, %v2536_v7  ;;  %vm2513_vm15 = vweird.f32 %v3113_v4 }
 0x5b4   :  { %v2411_v18 = vmul.f32 %v3111_v55, %v2410_v36  ;;  %3114 = vrsqrt.f32 %v4679_v0  ;;  %v2573_v44 = vmax.f32 %v2557_v2, 0.0  ;;  %vm2514_vm5 = vmor %vm2512_vm3, %vm2513_vm15  ;;  %vm2502_vm8 = vweird.f32 %v4679_v0 }
 0x5b5   :  { %v2508_v57 = vmul.f32 %v3113_v4, %v2507_v43  ;;  %3116 = vrsqrt.f32 %v4683_v62  ;;  %v2572_v40 = vmax.f32 %v2556_v28, 0.0  ;;  %vm2472_vm10 = vweird.f32 %v4683_v62 }
 0x5b6   :  { %v2415_v6 = vsel %vm2414_vm14, %v3111_v55, %v2411_v18 }
 0x5b7   :  { %v2509_v47 = vmul.f32 0.5, %v2508_v57  ;;  %v2287_v37 = vpop.xlane.xlu0 %2286  ;;  %v2521_v11 = vmul.f32 %v2415_v6, %v4525_v24  ;;  %v2588_v56 = vpack.c.bf16 %v2573_v44, %v2572_v40  ;;  %v2461_v24 = vmul.f32 %v4652_v10, %v2460_v61 }
 0x5b8   :  { %v2327_v23 = vmul.f32 %v2287_v37, %v4468_v38 }
 0x5b9   :  { %v2510_v1 = vsub.f32 1.5, %v2509_v47  ;;  %v2541_v25 = vmul.f32 %v4603_v45, %v2521_v11  ;;  %2798 = vmatmul.msk.bf16.vlgmr.msra.gmra.mxu0 %vm104_vm1, %v2588_v56  ;;  %v2465_v46 = vsel %vm4707_vm0, %v4652_v10, %v2461_v24 }
 0x5ba   :  { %v3115_v52 = vpop.eup %3114  ;;  %v4696_v29 = vadd.f32 1e-05, %v2327_v23  ;;  %v2526_v32 = vmul.f32 %v2465_v46, %v4522_v63 }
 0x5bb   :  { %v3117_v20 = vpop.eup %3116  ;;  %v2511_v19 = vmul.f32 %v3113_v4, %v2510_v1  ;;  %v2497_v59 = vmul.f32 %v3115_v52, %v4679_v0  ;;  %v2561_v55 = vadd.f32 %v4612_v33, %v2541_v25  ;;  %vm2503_vm6 = vweird.f32 %v3115_v52 }
 0x5bc   :  { %v2467_v30 = vmul.f32 %v3117_v20, %v4683_v62  ;;  %3118 = vrsqrt.f32 %v4696_v29  ;;  %vm2473_vm7 = vweird.f32 %v3117_v20  ;;  %vm2504_vm9 = vmor %vm2502_vm8, %vm2503_vm6  ;;  %v2546_v2 = vmul.f32 %v4603_v45, %v2526_v32 }
 0x5bd   :  { %v2515_v3 = vsel %vm2514_vm5, %v3113_v4, %v2511_v19  ;;  %v2498_v48 = vmul.f32 %v3115_v52, %v2497_v59  ;;  %v2577_v41 = vmax.f32 %v2561_v55, 0.0  ;;  %vm2474_vm11 = vmor %vm2472_vm10, %vm2473_vm7  ;;  %vm2392_vm13 = vweird.f32 %v4696_v29 }
 0x5be   :  { %v2468_v8 = vmul.f32 %v3117_v20, %v2467_v30  ;;  %v2531_v15 = vmul.f32 %v2515_v3, %v4535_v22 }
 0x5bf   :  { %v2499_v42 = vmul.f32 0.5, %v2498_v48  ;;  %v2284_v14 = vpop.xlane.xlu2 %2283  ;;  %v2590_v54 = vpack.c.bf16 %v2577_v41, %v2576_v49 }
 0x5c0   :  { %v2469_v12 = vmul.f32 0.5, %v2468_v8  ;;  %v2326_v5 = vmul.f32 %v2284_v14, %v4468_v38  ;;  %v2551_v22 = vmul.f32 %v4603_v45, %v2531_v15 }
 0x5c1   :  { %v2500_v21 = vsub.f32 1.5, %v2499_v42  ;;  %2800 = vmatmul.msk.bf16.vlgmr.msra.gmra.mxu1 %vm104_vm1, %v2590_v54 }
 0x5c2   :  { %v3119_v9 = vpop.eup %3118  ;;  %v2470_v53 = vsub.f32 1.5, %v2469_v12  ;;  %v2342_v27 = vadd.f32 1e-05, %v2326_v5  ;;  %v2571_v57 = vadd.f32 %v4612_v33, %v2551_v22 }
 0x5c3   :  { %v2501_v60 = vmul.f32 %v3115_v52, %v2500_v21  ;;  %v2387_v10 = vmul.f32 %v3119_v9, %v4696_v29  ;;  %vm2393_vm12 = vweird.f32 %v3119_v9 }
 0x5c4   :  { %v2471_v7 = vmul.f32 %v3117_v20, %v2470_v53  ;;  %3120 = vrsqrt.f32 %v2342_v27  ;;  %vm2394_vm14 = vmor %vm2392_vm13, %vm2393_vm12  ;;  %v2587_v1 = vmax.f32 %v2571_v57, 0.0  ;;  %vm2382_vm2 = vweird.f32 %v2342_v27 }
 0x5c5   :  { %v2505_v26 = vsel %vm2504_vm9, %v3115_v52, %v2501_v60  ;;  %v2388_v4 = vmul.f32 %v3119_v9, %v2387_v10  ;;  %vm2679_vm9 = vcmask 64512  }
 0x5c6   :  { %v2475_v36 = vsel %vm2474_vm11, %v3117_v20, %v2471_v7  ;;  %v2530_v63 = vmul.f32 %v2505_v26, %v4543_v51  ;;  %v2566_v51 = vadd.f32 %v4612_v33, %v2546_v2 }
 0x5c7   :  { %v2389_v31 = vmul.f32 0.5, %v2388_v4  ;;  %v2299_v43 = vpop.xlane.xlu2 %2298  ;;  %v2527_v0 = vmul.f32 %v2475_v36, %v4546_v39 }
 0x5c8   :  { %v2296_v18 = vpop.xlane.xlu1 %2295  ;;  %v2331_v28 = vmul.f32 %v2299_v43, %v4468_v38  ;;  %v2550_v62 = vmul.f32 %v4603_v45, %v2530_v63  ;;  %v2582_v17 = vmax.f32 %v2566_v51, 0.0 }
 0x5c9   :  { %v2390_v35 = vsub.f32 1.5, %v2389_v31  ;;  %v2330_v6 = vmul.f32 %v2296_v18, %v4468_v38  ;;  %v2547_v40 = vmul.f32 %v4603_v45, %v2527_v0 }
 0x5ca   :  { %v3121_v44 = vpop.eup %3120  ;;  %v2347_v61 = vadd.f32 1e-05, %v2331_v28  ;;  %v2570_v47 = vadd.f32 %v4612_v33, %v2550_v62 }
 0x5cb   :  { %v2391_v39 = vmul.f32 %v3119_v9, %v2390_v35  ;;  %v2377_v37 = vmul.f32 %v3121_v44, %v2342_v27  ;;  %v2346_v11 = vadd.f32 1e-05, %v2330_v6  ;;  %v2567_v23 = vadd.f32 %v4612_v33, %v2547_v40 }
 0x5cc   :  { %3122 = vrsqrt.f32 %v2347_v61  ;;  %v2586_v56 = vmax.f32 %v2570_v47, 0.0  ;;  %vm2383_vm15 = vweird.f32 %v3121_v44  ;;  %vm2432_vm0 = vweird.f32 %v2347_v61 }
 0x5cd   :  { %v2395_v38 = vsel %vm2394_vm14, %v3119_v9, %v2391_v39  ;;  %v2378_v25 = vmul.f32 %v3121_v44, %v2377_v37  ;;  %3124 = vrsqrt.f32 %v2346_v11  ;;  %v2583_v52 = vmax.f32 %v2567_v23, 0.0  ;;  %vm2384_vm3 = vmor %vm2382_vm2, %vm2383_vm15 }
 0x5ce   :  { %v2595_v20 = vpack.c.bf16 %v2587_v1, %v2586_v56  ;;  %v2519_v29 = vmul.f32 %v2395_v38, %v4556_v16  ;;  %vm2422_vm6 = vweird.f32 %v2346_v11 }
 0x5cf   :  { %v2379_v24 = vmul.f32 0.5, %v2378_v25  ;;  %v2593_v19 = vpack.c.bf16 %v2583_v52, %v2582_v17 }
 0x5d0   :  { %2805 = vmatmul.msk.bf16.gmra.mxu3 %vm104_vm1, %v2595_v20  ;;  %v2539_v41 = vmul.f32 %v4603_v45, %v2519_v29 }
 0x5d1   :  { %v2380_v59 = vsub.f32 1.5, %v2379_v24  ;;  %2803 = vmatmul.msk.bf16.gmra.mxu2 %vm104_vm1, %v2593_v19 }
 0x5d2   :  { %v3123_v55 = vpop.eup %3122  ;;  %v2559_v12 = vadd.f32 %v4612_v33, %v2539_v41 }
 0x5d3   :  { %v3125_v30 = vpop.eup %3124  ;;  %v2381_v3 = vmul.f32 %v3121_v44, %v2380_v59  ;;  %v2427_v48 = vmul.f32 %v3123_v55, %v2347_v61  ;;  %vm2433_vm4 = vweird.f32 %v3123_v55 }
 0x5d4   :  { %v2417_v49 = vmul.f32 %v3125_v30, %v2346_v11  ;;  %vm2423_vm5 = vweird.f32 %v3125_v30  ;;  %vm2434_vm7 = vmor %vm2432_vm0, %vm2433_vm4  ;;  %v2575_v32 = vmax.f32 %v2559_v12, 0.0 }
 0x5d5   :  { %v2385_v13 = vsel %vm2384_vm3, %v3121_v44, %v2381_v3  ;;  %v2428_v8 = vmul.f32 %v3123_v55, %v2427_v48  ;;  %vm2424_vm8 = vmor %vm2422_vm6, %vm2423_vm5 }
 0x5d6   :  { %v2418_v46 = vmul.f32 %v3125_v30, %v2417_v49  ;;  %v2518_v42 = vmul.f32 %v2385_v13, %v4563_v34 }
 0x5d7   :  { %v2429_v14 = vmul.f32 0.5, %v2428_v8 }
 0x5d8   :  { %v2419_v16 = vmul.f32 0.5, %v2418_v46  ;;  %v2538_v54 = vmul.f32 %v4603_v45, %v2518_v42 }
 0x5d9   :  { %v2430_v5 = vsub.f32 1.5, %v2429_v14 }
 0x5da   :  { %v2420_v15 = vsub.f32 1.5, %v2419_v16  ;;  %v2558_v21 = vadd.f32 %v4612_v33, %v2538_v54 }
 0x5db   :  { %v2431_v9 = vmul.f32 %v3123_v55, %v2430_v5 }
 0x5dc   :  { %v2421_v53 = vmul.f32 %v3125_v30, %v2420_v15  ;;  %v2574_v27 = vmax.f32 %v2558_v21, 0.0 }
 0x5dd   :  { %v2435_v34 = vsel %vm2434_vm7, %v3123_v55, %v2431_v9 }
 0x5de   :  { %v2425_v60 = vsel %vm2424_vm8, %v3125_v30, %v2421_v53  ;;  %v2589_v10 = vpack.c.bf16 %v2575_v32, %v2574_v27  ;;  %v2523_v7 = vmul.f32 %v2435_v34, %v4571_v50  ;;  %v3027_v50 = vld [vmem:[%s4826_s9] ss:$0 sm:$0xff] }
 0x5df   :  { %v2522_v22 = vmul.f32 %v2425_v60, %v4574_v58 }
 0x5e0   :  { %2799 = vmatmul.msk.bf16.gmra.mxu0 %vm104_vm1, %v2589_v10  ;;  %v2543_v26 = vmul.f32 %v4603_v45, %v2523_v7 }
 0x5e1   :  { %v2542_v4 = vmul.f32 %v4603_v45, %v2522_v22 }
 0x5e2   :  { %v2563_v36 = vadd.f32 %v4612_v33, %v2543_v26 }
 0x5e3   :  { %v2562_v2 = vadd.f32 %v4612_v33, %v2542_v4 }
 0x5e4   :  { %v2579_v63 = vmax.f32 %v2563_v36, 0.0 }
 0x5e5   :  { %v2578_v31 = vmax.f32 %v2562_v2, 0.0 }
 0x5e7   :  { %v2591_v43 = vpack.c.bf16 %v2579_v63, %v2578_v31 }
 0x5e9   :  { %2801 = vmatmul.msk.bf16.gmra.mxu1 %vm104_vm1, %v2591_v43 }
 0x624   :  { %v2659_v58 = vpop.f32.mrf.mxu2 }
 0x625   :  { %v2660_v0 = vadd.f32 %v3027_v50, %v2659_v58 }
 0x627   :  { %2688 = vst.msk [vmem:[%s4827_s10 + $0x40] sm:$0xff] %vm2679_vm9, %v2660_v0 }
 0x62c   :  { %v2661_v45 = vpop.f32.mrf.mxu2  ;;  %v2669_v18 = vpop.f32.mrf.mxu3 }
 0x62d   :  { %v2662_v33 = vadd.f32 %v3027_v50, %v2661_v45  ;;  %v2670_v28 = vadd.f32 %v3027_v50, %v2669_v18 }
 0x62f   :  { %2689 = vst.msk [vmem:[%s4827_s10 + $0x48] sm:$0xff] %vm2679_vm9, %v2662_v33 }
 0x630   :  { %2692 = vst.msk [vmem:[%s4827_s10 + $0x60] sm:$0xff] %vm2679_vm9, %v2670_v28 }
 0x634   :  { %v2671_v62 = vpop.f32.mrf.mxu3 }
 0x635   :  { %v2672_v57 = vadd.f32 %v3027_v50, %v2671_v62 }
 0x636   :  { %v2639_v35 = vpop.f32.mrf.mxu0 }
 0x637   :  { %2693 = vst.msk [vmem:[%s4827_s10 + $0x68] sm:$0xff] %vm2679_vm9, %v2672_v57  ;;  %v2640_v6 = vadd.f32 %v3027_v50, %v2639_v35 }
 0x639   :  { %2680 = vst.msk [vmem:[%s4827_s10] sm:$0xff] %vm2679_vm9, %v2640_v6 }
 0x63e   :  { %v2649_v40 = vpop.f32.mrf.mxu1  ;;  %v2641_v44 = vpop.f32.mrf.mxu0 }
 0x63f   :  { %v2650_v61 = vadd.f32 %v3027_v50, %v2649_v40  ;;  %v2642_v51 = vadd.f32 %v3027_v50, %v2641_v44 }
 0x641   :  { %2684 = vst.msk [vmem:[%s4827_s10 + $0x20] sm:$0xff] %vm2679_vm9, %v2650_v61 }
 0x642   :  { %2681 = vst.msk [vmem:[%s4827_s10 + $0x8] sm:$0xff] %vm2679_vm9, %v2642_v51 }
 0x646   :  { %v2651_v47 = vpop.f32.mrf.mxu1 }
 0x647   :  { %v2652_v39 = vadd.f32 %v3027_v50, %v2651_v47 }
 0x649   :  { %2685 = vst.msk [vmem:[%s4827_s10 + $0x28] sm:$0xff] %vm2679_vm9, %v2652_v39 }
 0x653   :  { %v2674_v37 = vpop.f32.mrf.mxu3 }
 0x654   :  { %v2675_v11 = vadd.f32 %v3027_v50, %v2674_v37  ;;  %v2664_v23 = vpop.f32.mrf.mxu2 }
 0x655   :  { %v2665_v56 = vadd.f32 %v3027_v50, %v2664_v23 }
 0x656   :  { %2694 = vst.msk [vmem:[%s4827_s10 + $0x70] sm:$0xff] %vm2679_vm9, %v2675_v11 }
 0x657   :  { %2690 = vst.msk [vmem:[%s4827_s10 + $0x50] sm:$0xff] %vm2679_vm9, %v2665_v56 }
 0x65b   :  { %v2676_v1 = vpop.f32.mrf.mxu3 }
 0x65c   :  { %v2677_v38 = vadd.f32 %v3027_v50, %v2676_v1  ;;  %v2666_v25 = vpop.f32.mrf.mxu2 }
 0x65d   :  { %v2644_v17 = vpop.f32.mrf.mxu0  ;;  %v2667_v52 = vadd.f32 %v3027_v50, %v2666_v25 }
 0x65e   :  { %2695 = vst.msk [vmem:[%s4827_s10 + $0x78] sm:$0xff] %vm2679_vm9, %v2677_v38  ;;  %v2645_v20 = vadd.f32 %v3027_v50, %v2644_v17 }
 0x65f   :  { %2691 = vst.msk [vmem:[%s4827_s10 + $0x58] sm:$0xff] %vm2679_vm9, %v2667_v52 }
 0x660   :  { %2682 = vst.msk [vmem:[%s4827_s10 + $0x10] sm:$0xff] %vm2679_vm9, %v2645_v20 }
 0x665   :  { %v2646_v24 = vpop.f32.mrf.mxu0 }
 0x666   :  { %v2647_v19 = vadd.f32 %v3027_v50, %v2646_v24  ;;  %v2654_v29 = vpop.f32.mrf.mxu1 }
 0x667   :  { %v2655_v59 = vadd.f32 %v3027_v50, %v2654_v29 }
 0x668   :  { %2683 = vst.msk [vmem:[%s4827_s10 + $0x18] sm:$0xff] %vm2679_vm9, %v2647_v19 }
 0x669   :  { %2686 = vst.msk [vmem:[%s4827_s10 + $0x30] sm:$0xff] %vm2679_vm9, %v2655_v59 }
 0x66e   :  { %v2656_v55 = vpop.f32.mrf.mxu1 }
 0x66f   :  { %v2657_v30 = vadd.f32 %v3027_v50, %v2656_v55 }
 0x671   :  { %2687 = vst.msk [vmem:[%s4827_s10 + $0x38] sm:$0xff] %vm2679_vm9, %v2657_v30 }

</bundles_post_ra>
